<compile_context>
chip_gen: v7x
topology: tpu7x:2x2x1
jax: 0.10.0
libtpu: 0.0.40
codegen_flags: <defaults>
</compile_context>

<pallas_src>
import jax
import jax.numpy as jnp
from jax.experimental import pallas as pl
from jax.experimental.pallas import tpu as pltpu


# ----------------------------------------------------------------------------
# Pallas kernels
# ----------------------------------------------------------------------------
def _conv_pool_kernel(p_ref, w_ref, b_ref, o_ref):
    """Fused conv(3x3) + bias + ReLU + 2x2 maxpool.

    p_ref: (4, TILE_M, K) bf16   -- im2col patches, one slab per pool corner
    w_ref: (K, Cout)      bf16   -- conv weight, rows ordered (kh, kw, cin)
    b_ref: (1, Cout)      f32
    o_ref: (TILE_M, Cout)        -- pooled activations
    """
    bias = b_ref[...]

    def corner(c):
        y = jnp.dot(p_ref[c], w_ref[...], preferred_element_type=jnp.float32)
        return jnp.maximum(y + bias, 0.0)        # ReLU (commutes with max-pool)

    pooled = jnp.maximum(jnp.maximum(corner(0), corner(1)),
                         jnp.maximum(corner(2), corner(3)))
    o_ref[...] = pooled.astype(o_ref.dtype)


def _mlp_kernel(x_ref, w1_ref, b1_ref, w2_ref, b2_ref, o_ref):
    """Fused fc1 + ReLU + fc2.  x:(TB,K1) bf16, w1:(K1,H) bf16, w2:(H,N) bf16."""
    h = jnp.dot(x_ref[...], w1_ref[...], preferred_element_type=jnp.float32)
    h = jnp.maximum(h + b1_ref[...], 0.0)
    y = jnp.dot(h.astype(w2_ref.dtype), w2_ref[...],
                preferred_element_type=jnp.float32)
    o_ref[...] = (y + b2_ref[...]).astype(o_ref.dtype)


# ----------------------------------------------------------------------------
# Helpers
# ----------------------------------------------------------------------------
def _pick_tile(n, cap):
    """Largest divisor of n that is <= cap and a multiple of 8 (or n itself)."""
    if n <= cap:
        return n
    for t in range(cap, 0, -1):
        if n % t == 0 and t % 8 == 0:
            return t
    return n


def _corner_patches(x):
    """x: (B, H, W, C) NHWC -> (4, B*(H/2)*(W/2), 9*C) bf16.

    Leading axis = pooling-window corner (di, dj) in {0,1}^2 (row-major).
    Column order of the 9*C axis is (kh, kw, cin) -- matches the reshaped
    PyTorch conv weight.  Built as one XLA fusion; no pre-pool activation.
    """
    B, H, W, C = x.shape
    Ho, Wo = H // 2, W // 2
    xp = jnp.pad(x, ((0, 0), (1, 1), (1, 1), (0, 0)))
    taps = jnp.concatenate(
        [xp[:, dy:dy + H, dx:dx + W, :] for dy in range(3) for dx in range(3)],
        axis=-1)                                              # (B, H, W, 9C)
    corners = [taps[:, di::2, dj::2, :].reshape(B * Ho * Wo, 9 * C)
               for di in (0, 1) for dj in (0, 1)]
    return jnp.stack(corners, axis=0).astype(jnp.bfloat16)    # (4, M, 9C)


# ----------------------------------------------------------------------------
# Pallas wrappers
# ----------------------------------------------------------------------------
def conv3x3_relu_pool(x, w, b, *, out_dtype=jnp.bfloat16):
    """x: (B,H,W,Cin) NHWC; w: (9*Cin, Cout); b: (Cout,) -> (B,H/2,W/2,Cout)."""
    B, H, W, Cin = x.shape
    Cout = w.shape[1]
    Ho, Wo = H // 2, W // 2
    K = 9 * Cin
    M = B * Ho * Wo

    patches = _corner_patches(x)                              # (4, M, K) bf16
    tile_m = _pick_tile(M, 256)
    grid = (M // tile_m,)

    out = pl.pallas_call(
        _conv_pool_kernel,
        out_shape=jax.ShapeDtypeStruct((M, Cout), out_dtype),
        grid=grid,
        in_specs=[
            pl.BlockSpec((4, tile_m, K), lambda i: (0, i, 0)),
            pl.BlockSpec((K, Cout), lambda i: (0, 0)),
            pl.BlockSpec((1, Cout), lambda i: (0, 0)),
        ],
        out_specs=pl.BlockSpec((tile_m, Cout), lambda i: (i, 0)),
        compiler_params=pltpu.CompilerParams(
            dimension_semantics=("parallel",)),
    )(patches, w.astype(jnp.bfloat16), b.reshape(1, Cout).astype(jnp.float32))
    return out.reshape(B, Ho, Wo, Cout)


def mlp_head(x, w1, b1, w2, b2):
    """Fused fc1+ReLU+fc2.  x: (B, K1) -> (B, N) float32."""
    B, K1 = x.shape
    H1 = w1.shape[1]
    N = w2.shape[1]
    tile_b = _pick_tile(B, 256)
    grid = (B // tile_b,)

    return pl.pallas_call(
        _mlp_kernel,
        out_shape=jax.ShapeDtypeStruct((B, N), jnp.float32),
        grid=grid,
        in_specs=[
            pl.BlockSpec((tile_b, K1), lambda i: (i, 0)),
            pl.BlockSpec((K1, H1), lambda i: (0, 0)),
            pl.BlockSpec((1, H1), lambda i: (0, 0)),
            pl.BlockSpec((H1, N), lambda i: (0, 0)),
            pl.BlockSpec((1, N), lambda i: (0, 0)),
        ],
        out_specs=pl.BlockSpec((tile_b, N), lambda i: (i, 0)),
        compiler_params=pltpu.CompilerParams(
            dimension_semantics=("parallel",)),
    )(x.astype(jnp.bfloat16), w1.astype(jnp.bfloat16),
      b1.reshape(1, H1).astype(jnp.float32),
      w2.astype(jnp.bfloat16), b2.reshape(1, N).astype(jnp.float32))


# ----------------------------------------------------------------------------
# Forward pass (matches CNN.forward semantics)
# ----------------------------------------------------------------------------
def cnn_forward(x_nchw, params):
    B = x_nchw.shape[0]
    x = jnp.transpose(x_nchw, (0, 2, 3, 1)).astype(jnp.bfloat16)   # NCHW -> NHWC

    # conv1 (3->16, 3x3, pad 1) + relu + 2x2 maxpool  (one fused kernel)
    y1 = conv3x3_relu_pool(x, params["w1"], params["b1"])          # (B,16,16,16)
    # conv2 (16->32, 3x3, pad 1) + relu + 2x2 maxpool (one fused kernel)
    y2 = conv3x3_relu_pool(y1, params["w2"], params["b2"])         # (B,8,8,32)

    # Flatten in NHWC order; the NCHW permutation PyTorch's x.view implies is
    # folded into wfc1's row order at parameter-conversion time (no transpose).
    flat = y2.reshape(B, 8 * 8 * 32)

    # fc1 + relu + fc2 (one fused kernel)
    return mlp_head(flat, params["wfc1"], params["bfc1"],
                    params["wfc2"], params["bfc2"])


# ----------------------------------------------------------------------------
# Parameter conversion from PyTorch layouts + deterministic init
# ----------------------------------------------------------------------------
def convert_torch_params(w1, b1, w2, b2, wfc1, bfc1, wfc2, bfc2):
    """Convert PyTorch-layout weights to the layouts the kernels expect."""
    def conv_w(w):   # (Cout, Cin, kh, kw) -> (kh*kw*Cin, Cout), order (kh,kw,cin)
        Cout, Cin, KH, KW = w.shape
        return jnp.transpose(w, (2, 3, 1, 0)).reshape(KH * KW * Cin, Cout)

    # fc1: (128, 2048 NCHW-flat) -> (2048 NHWC-flat, 128): permute rows once.
    wfc1_rows = wfc1.T.reshape(32, 8, 8, 128)           # rows were c*64 + h*8 + w
    wfc1_nhwc = jnp.transpose(wfc1_rows, (1, 2, 0, 3)).reshape(8 * 8 * 32, 128)

    return dict(w1=conv_w(w1), b1=b1, w2=conv_w(w2), b2=b2,
                wfc1=wfc1_nhwc, bfc1=bfc1, wfc2=wfc2.T, bfc2=bfc2)


def init_params(key):
    ks = jax.random.split(key, 8)
    s = 0.05
    # Generated in PyTorch layouts, then converted once (documents the mapping
    # needed if real PyTorch weights were ever loaded).
    w1 = s * jax.random.normal(ks[0], (16, 3, 3, 3), jnp.float32)       # (Cout,Cin,kh,kw)
    b1 = s * jax.random.normal(ks[1], (16,), jnp.float32)
    w2 = s * jax.random.normal(ks[2], (32, 16, 3, 3), jnp.float32)
    b2 = s * jax.random.normal(ks[3], (32,), jnp.float32)
    wfc1 = s * jax.random.normal(ks[4], (128, 32 * 8 * 8), jnp.float32)  # (out,in)
    bfc1 = s * jax.random.normal(ks[5], (128,), jnp.float32)
    wfc2 = s * jax.random.normal(ks[6], (10, 128), jnp.float32)
    bfc2 = s * jax.random.normal(ks[7], (10,), jnp.float32)
    return convert_torch_params(w1, b1, w2, b2, wfc1, bfc1, wfc2, bfc2)


if __name__ == "__main__":
    key = jax.random.PRNGKey(0)
    pkey, xkey = jax.random.split(key)
    params = init_params(pkey)

    # Spatial size 32 is forced by fc1's 32*8*8 input (two 2x2 pools: 32->16->8).
    x = jax.random.normal(xkey, (2, 3, 32, 32), jnp.float32)

    fwd = jax.jit(cnn_forward)
    logits = fwd(x, params)
    jax.block_until_ready(logits)
    assert logits.shape == (2, 10)
    print("KERNEL_OK")
</pallas_src>

<mosaic_0001>
module attributes {stable_mosaic.version = 11 : i64} {
  func.func @_conv_pool_kernel(%arg0: i32, %arg1: memref<4x256x27xbf16, #tpu.memory_space<vmem>>, %arg2: memref<27x16xbf16, #tpu.memory_space<vmem>>, %arg3: memref<1x16xf32, #tpu.memory_space<vmem>>, %arg4: memref<256x16xbf16, #tpu.memory_space<vmem>>) attributes {dimension_semantics = [#tpu.dimension_semantics<parallel>], iteration_bounds = array<i64: 2>, scalar_prefetch = 0 : i64, scratch_operands = 0 : i64, tpu.core_type = #tpu.core_type<tc>, window_params = [{transform_indices = @transform_0, window_bounds = array<i64: 4, 256, 27>}, {pipeline_mode = #tpu.pipeline_mode<synchronous>, transform_indices = @transform_1, window_bounds = array<i64: 27, 16>}, {pipeline_mode = #tpu.pipeline_mode<synchronous>, transform_indices = @transform_2, window_bounds = array<i64: 1, 16>}, {transform_indices = @transform_3, window_bounds = array<i64: 256, 16>}]} {
    %c0 = arith.constant 0 : index
    %c0_0 = arith.constant 0 : index
    %0 = vector.load %arg3[%c0, %c0_0] : memref<1x16xf32, #tpu.memory_space<vmem>>, vector<1x16xf32>
    %c0_1 = arith.constant 0 : index
    %c0_2 = arith.constant 0 : index
    %c0_3 = arith.constant 0 : index
    %1 = vector.load %arg1[%c0_1, %c0_2, %c0_3] : memref<4x256x27xbf16, #tpu.memory_space<vmem>>, vector<1x256x27xbf16>
    %2 = vector.shape_cast %1 : vector<1x256x27xbf16> to vector<256x27xbf16>
    %c0_4 = arith.constant 0 : index
    %c0_5 = arith.constant 0 : index
    %3 = vector.load %arg2[%c0_4, %c0_5] : memref<27x16xbf16, #tpu.memory_space<vmem>>, vector<27x16xbf16>
    %cst = arith.constant dense<0.000000e+00> : vector<256x16xf32>
    %4 = tpu.matmul %2, %3, %cst {dimension_numbers = #tpu.dot_dimension_numbers<[1], [0], [0], [1], [0, 0, 1, 1], [], []>} : vector<256x27xbf16>, vector<27x16xbf16>, vector<256x16xf32> -> vector<256x16xf32>
    %5 = vector.broadcast %0 : vector<1x16xf32> to vector<256x16xf32>
    %6 = arith.addf %4, %5 : vector<256x16xf32>
    %cst_6 = arith.constant 0.000000e+00 : f32
    %7 = vector.broadcast %cst_6 : f32 to vector<256x16xf32>
    %8 = arith.maximumf %6, %7 : vector<256x16xf32>
    %c1 = arith.constant 1 : index
    %c0_7 = arith.constant 0 : index
    %c0_8 = arith.constant 0 : index
    %9 = vector.load %arg1[%c1, %c0_7, %c0_8] : memref<4x256x27xbf16, #tpu.memory_space<vmem>>, vector<1x256x27xbf16>
    %10 = vector.shape_cast %9 : vector<1x256x27xbf16> to vector<256x27xbf16>
    %c0_9 = arith.constant 0 : index
    %c0_10 = arith.constant 0 : index
    %11 = vector.load %arg2[%c0_9, %c0_10] : memref<27x16xbf16, #tpu.memory_space<vmem>>, vector<27x16xbf16>
    %cst_11 = arith.constant dense<0.000000e+00> : vector<256x16xf32>
    %12 = tpu.matmul %10, %11, %cst_11 {dimension_numbers = #tpu.dot_dimension_numbers<[1], [0], [0], [1], [0, 0, 1, 1], [], []>} : vector<256x27xbf16>, vector<27x16xbf16>, vector<256x16xf32> -> vector<256x16xf32>
    %13 = vector.broadcast %0 : vector<1x16xf32> to vector<256x16xf32>
    %14 = arith.addf %12, %13 : vector<256x16xf32>
    %cst_12 = arith.constant 0.000000e+00 : f32
    %15 = vector.broadcast %cst_12 : f32 to vector<256x16xf32>
    %16 = arith.maximumf %14, %15 : vector<256x16xf32>
    %17 = arith.maximumf %8, %16 : vector<256x16xf32>
    %c2 = arith.constant 2 : index
    %c0_13 = arith.constant 0 : index
    %c0_14 = arith.constant 0 : index
    %18 = vector.load %arg1[%c2, %c0_13, %c0_14] : memref<4x256x27xbf16, #tpu.memory_space<vmem>>, vector<1x256x27xbf16>
    %19 = vector.shape_cast %18 : vector<1x256x27xbf16> to vector<256x27xbf16>
    %c0_15 = arith.constant 0 : index
    %c0_16 = arith.constant 0 : index
    %20 = vector.load %arg2[%c0_15, %c0_16] : memref<27x16xbf16, #tpu.memory_space<vmem>>, vector<27x16xbf16>
    %cst_17 = arith.constant dense<0.000000e+00> : vector<256x16xf32>
    %21 = tpu.matmul %19, %20, %cst_17 {dimension_numbers = #tpu.dot_dimension_numbers<[1], [0], [0], [1], [0, 0, 1, 1], [], []>} : vector<256x27xbf16>, vector<27x16xbf16>, vector<256x16xf32> -> vector<256x16xf32>
    %22 = vector.broadcast %0 : vector<1x16xf32> to vector<256x16xf32>
    %23 = arith.addf %21, %22 : vector<256x16xf32>
    %cst_18 = arith.constant 0.000000e+00 : f32
    %24 = vector.broadcast %cst_18 : f32 to vector<256x16xf32>
    %25 = arith.maximumf %23, %24 : vector<256x16xf32>
    %c3 = arith.constant 3 : index
    %c0_19 = arith.constant 0 : index
    %c0_20 = arith.constant 0 : index
    %26 = vector.load %arg1[%c3, %c0_19, %c0_20] : memref<4x256x27xbf16, #tpu.memory_space<vmem>>, vector<1x256x27xbf16>
    %27 = vector.shape_cast %26 : vector<1x256x27xbf16> to vector<256x27xbf16>
    %c0_21 = arith.constant 0 : index
    %c0_22 = arith.constant 0 : index
    %28 = vector.load %arg2[%c0_21, %c0_22] : memref<27x16xbf16, #tpu.memory_space<vmem>>, vector<27x16xbf16>
    %cst_23 = arith.constant dense<0.000000e+00> : vector<256x16xf32>
    %29 = tpu.matmul %27, %28, %cst_23 {dimension_numbers = #tpu.dot_dimension_numbers<[1], [0], [0], [1], [0, 0, 1, 1], [], []>} : vector<256x27xbf16>, vector<27x16xbf16>, vector<256x16xf32> -> vector<256x16xf32>
    %30 = vector.broadcast %0 : vector<1x16xf32> to vector<256x16xf32>
    %31 = arith.addf %29, %30 : vector<256x16xf32>
    %cst_24 = arith.constant 0.000000e+00 : f32
    %32 = vector.broadcast %cst_24 : f32 to vector<256x16xf32>
    %33 = arith.maximumf %31, %32 : vector<256x16xf32>
    %34 = arith.maximumf %25, %33 : vector<256x16xf32>
    %35 = arith.maximumf %17, %34 : vector<256x16xf32>
    %36 = arith.truncf %35 : vector<256x16xf32> to vector<256x16xbf16>
    %c0_25 = arith.constant 0 : index
    %c0_26 = arith.constant 0 : index
    %37 = vector.load %arg4[%c0_25, %c0_26] : memref<256x16xbf16, #tpu.memory_space<vmem>>, vector<256x16xbf16>
    tpu.vector_store %arg4[%c0_25, %c0_26], %36 {strides = array<i32>} : memref<256x16xbf16, #tpu.memory_space<vmem>>, vector<256x16xbf16>,
    return
  }
  func.func @transform_0(%arg0: i32) -> (i32, i32, i32) {
    %c0_i32 = arith.constant 0 : i32
    %c0_i32_0 = arith.constant 0 : i32
    %c0_i32_1 = arith.constant 0 : i32
    return %c0_i32, %arg0, %c0_i32_0 : i32, i32, i32
  }
  func.func @transform_1(%arg0: i32) -> (i32, i32) {
    %c0_i32 = arith.constant 0 : i32
    %c0_i32_0 = arith.constant 0 : i32
    %c0_i32_1 = arith.constant 0 : i32
    return %c0_i32, %c0_i32_0 : i32, i32
  }
  func.func @transform_2(%arg0: i32) -> (i32, i32) {
    %c0_i32 = arith.constant 0 : i32
    %c0_i32_0 = arith.constant 0 : i32
    %c0_i32_1 = arith.constant 0 : i32
    return %c0_i32, %c0_i32_0 : i32, i32
  }
  func.func @transform_3(%arg0: i32) -> (i32, i32) {
    %c0_i32 = arith.constant 0 : i32
    %c0_i32_0 = arith.constant 0 : i32
    return %arg0, %c0_i32 : i32, i32
  }
}

module attributes {stable_mosaic.version = 11 : i64} {
  func.func @_conv_pool_kernel(%arg0: i32, %arg1: memref<4x128x144xbf16, #tpu.memory_space<vmem>>, %arg2: memref<144x32xbf16, #tpu.memory_space<vmem>>, %arg3: memref<1x32xf32, #tpu.memory_space<vmem>>, %arg4: memref<128x32xbf16, #tpu.memory_space<vmem>>) attributes {dimension_semantics = [#tpu.dimension_semantics<parallel>], iteration_bounds = array<i64: 1>, scalar_prefetch = 0 : i64, scratch_operands = 0 : i64, tpu.core_type = #tpu.core_type<tc>, window_params = [{transform_indices = @transform_0, window_bounds = array<i64: 4, 128, 144>}, {pipeline_mode = #tpu.pipeline_mode<synchronous>, transform_indices = @transform_1, window_bounds = array<i64: 144, 32>}, {pipeline_mode = #tpu.pipeline_mode<synchronous>, transform_indices = @transform_2, window_bounds = array<i64: 1, 32>}, {transform_indices = @transform_3, window_bounds = array<i64: 128, 32>}]} {
    %c0 = arith.constant 0 : index
    %c0_0 = arith.constant 0 : index
    %0 = vector.load %arg3[%c0, %c0_0] : memref<1x32xf32, #tpu.memory_space<vmem>>, vector<1x32xf32>
    %c0_1 = arith.constant 0 : index
    %c0_2 = arith.constant 0 : index
    %c0_3 = arith.constant 0 : index
    %1 = vector.load %arg1[%c0_1, %c0_2, %c0_3] : memref<4x128x144xbf16, #tpu.memory_space<vmem>>, vector<1x128x144xbf16>
    %2 = vector.shape_cast %1 : vector<1x128x144xbf16> to vector<128x144xbf16>
    %c0_4 = arith.constant 0 : index
    %c0_5 = arith.constant 0 : index
    %3 = vector.load %arg2[%c0_4, %c0_5] : memref<144x32xbf16, #tpu.memory_space<vmem>>, vector<144x32xbf16>
    %cst = arith.constant dense<0.000000e+00> : vector<128x32xf32>
    %4 = tpu.matmul %2, %3, %cst {dimension_numbers = #tpu.dot_dimension_numbers<[1], [0], [0], [1], [0, 0, 1, 1], [], []>} : vector<128x144xbf16>, vector<144x32xbf16>, vector<128x32xf32> -> vector<128x32xf32>
    %5 = vector.broadcast %0 : vector<1x32xf32> to vector<128x32xf32>
    %6 = arith.addf %4, %5 : vector<128x32xf32>
    %cst_6 = arith.constant 0.000000e+00 : f32
    %7 = vector.broadcast %cst_6 : f32 to vector<128x32xf32>
    %8 = arith.maximumf %6, %7 : vector<128x32xf32>
    %c1 = arith.constant 1 : index
    %c0_7 = arith.constant 0 : index
    %c0_8 = arith.constant 0 : index
    %9 = vector.load %arg1[%c1, %c0_7, %c0_8] : memref<4x128x144xbf16, #tpu.memory_space<vmem>>, vector<1x128x144xbf16>
    %10 = vector.shape_cast %9 : vector<1x128x144xbf16> to vector<128x144xbf16>
    %c0_9 = arith.constant 0 : index
    %c0_10 = arith.constant 0 : index
    %11 = vector.load %arg2[%c0_9, %c0_10] : memref<144x32xbf16, #tpu.memory_space<vmem>>, vector<144x32xbf16>
    %cst_11 = arith.constant dense<0.000000e+00> : vector<128x32xf32>
    %12 = tpu.matmul %10, %11, %cst_11 {dimension_numbers = #tpu.dot_dimension_numbers<[1], [0], [0], [1], [0, 0, 1, 1], [], []>} : vector<128x144xbf16>, vector<144x32xbf16>, vector<128x32xf32> -> vector<128x32xf32>
    %13 = vector.broadcast %0 : vector<1x32xf32> to vector<128x32xf32>
    %14 = arith.addf %12, %13 : vector<128x32xf32>
    %cst_12 = arith.constant 0.000000e+00 : f32
    %15 = vector.broadcast %cst_12 : f32 to vector<128x32xf32>
    %16 = arith.maximumf %14, %15 : vector<128x32xf32>
    %17 = arith.maximumf %8, %16 : vector<128x32xf32>
    %c2 = arith.constant 2 : index
    %c0_13 = arith.constant 0 : index
    %c0_14 = arith.constant 0 : index
    %18 = vector.load %arg1[%c2, %c0_13, %c0_14] : memref<4x128x144xbf16, #tpu.memory_space<vmem>>, vector<1x128x144xbf16>
    %19 = vector.shape_cast %18 : vector<1x128x144xbf16> to vector<128x144xbf16>
    %c0_15 = arith.constant 0 : index
    %c0_16 = arith.constant 0 : index
    %20 = vector.load %arg2[%c0_15, %c0_16] : memref<144x32xbf16, #tpu.memory_space<vmem>>, vector<144x32xbf16>
    %cst_17 = arith.constant dense<0.000000e+00> : vector<128x32xf32>
    %21 = tpu.matmul %19, %20, %cst_17 {dimension_numbers = #tpu.dot_dimension_numbers<[1], [0], [0], [1], [0, 0, 1, 1], [], []>} : vector<128x144xbf16>, vector<144x32xbf16>, vector<128x32xf32> -> vector<128x32xf32>
    %22 = vector.broadcast %0 : vector<1x32xf32> to vector<128x32xf32>
    %23 = arith.addf %21, %22 : vector<128x32xf32>
    %cst_18 = arith.constant 0.000000e+00 : f32
    %24 = vector.broadcast %cst_18 : f32 to vector<128x32xf32>
    %25 = arith.maximumf %23, %24 : vector<128x32xf32>
    %c3 = arith.constant 3 : index
    %c0_19 = arith.constant 0 : index
    %c0_20 = arith.constant 0 : index
    %26 = vector.load %arg1[%c3, %c0_19, %c0_20] : memref<4x128x144xbf16, #tpu.memory_space<vmem>>, vector<1x128x144xbf16>
    %27 = vector.shape_cast %26 : vector<1x128x144xbf16> to vector<128x144xbf16>
    %c0_21 = arith.constant 0 : index
    %c0_22 = arith.constant 0 : index
    %28 = vector.load %arg2[%c0_21, %c0_22] : memref<144x32xbf16, #tpu.memory_space<vmem>>, vector<144x32xbf16>
    %cst_23 = arith.constant dense<0.000000e+00> : vector<128x32xf32>
    %29 = tpu.matmul %27, %28, %cst_23 {dimension_numbers = #tpu.dot_dimension_numbers<[1], [0], [0], [1], [0, 0, 1, 1], [], []>} : vector<128x144xbf16>, vector<144x32xbf16>, vector<128x32xf32> -> vector<128x32xf32>
    %30 = vector.broadcast %0 : vector<1x32xf32> to vector<128x32xf32>
    %31 = arith.addf %29, %30 : vector<128x32xf32>
    %cst_24 = arith.constant 0.000000e+00 : f32
    %32 = vector.broadcast %cst_24 : f32 to vector<128x32xf32>
    %33 = arith.maximumf %31, %32 : vector<128x32xf32>
    %34 = arith.maximumf %25, %33 : vector<128x32xf32>
    %35 = arith.maximumf %17, %34 : vector<128x32xf32>
    %36 = arith.truncf %35 : vector<128x32xf32> to vector<128x32xbf16>
    %c0_25 = arith.constant 0 : index
    %c0_26 = arith.constant 0 : index
    %37 = vector.load %arg4[%c0_25, %c0_26] : memref<128x32xbf16, #tpu.memory_space<vmem>>, vector<128x32xbf16>
    tpu.vector_store %arg4[%c0_25, %c0_26], %36 {strides = array<i32>} : memref<128x32xbf16, #tpu.memory_space<vmem>>, vector<128x32xbf16>,
    return
  }
  func.func @transform_0(%arg0: i32) -> (i32, i32, i32) {
    %c0_i32 = arith.constant 0 : i32
    %c0_i32_0 = arith.constant 0 : i32
    %c0_i32_1 = arith.constant 0 : i32
    return %c0_i32, %arg0, %c0_i32_0 : i32, i32, i32
  }
  func.func @transform_1(%arg0: i32) -> (i32, i32) {
    %c0_i32 = arith.constant 0 : i32
    %c0_i32_0 = arith.constant 0 : i32
    %c0_i32_1 = arith.constant 0 : i32
    return %c0_i32, %c0_i32_0 : i32, i32
  }
  func.func @transform_2(%arg0: i32) -> (i32, i32) {
    %c0_i32 = arith.constant 0 : i32
    %c0_i32_0 = arith.constant 0 : i32
    %c0_i32_1 = arith.constant 0 : i32
    return %c0_i32, %c0_i32_0 : i32, i32
  }
  func.func @transform_3(%arg0: i32) -> (i32, i32) {
    %c0_i32 = arith.constant 0 : i32
    %c0_i32_0 = arith.constant 0 : i32
    return %arg0, %c0_i32 : i32, i32
  }
}

module attributes {stable_mosaic.version = 11 : i64} {
  func.func @_mlp_kernel(%arg0: i32, %arg1: memref<2x2048xbf16, #tpu.memory_space<vmem>>, %arg2: memref<2048x128xbf16, #tpu.memory_space<vmem>>, %arg3: memref<1x128xf32, #tpu.memory_space<vmem>>, %arg4: memref<128x10xbf16, #tpu.memory_space<vmem>>, %arg5: memref<1x10xf32, #tpu.memory_space<vmem>>, %arg6: memref<2x10xf32, #tpu.memory_space<vmem>>) attributes {dimension_semantics = [#tpu.dimension_semantics<parallel>], iteration_bounds = array<i64: 1>, scalar_prefetch = 0 : i64, scratch_operands = 0 : i64, tpu.core_type = #tpu.core_type<tc>, window_params = [{transform_indices = @transform_0, window_bounds = array<i64: 2, 2048>}, {pipeline_mode = #tpu.pipeline_mode<synchronous>, transform_indices = @transform_1, window_bounds = array<i64: 2048, 128>}, {pipeline_mode = #tpu.pipeline_mode<synchronous>, transform_indices = @transform_2, window_bounds = array<i64: 1, 128>}, {pipeline_mode = #tpu.pipeline_mode<synchronous>, transform_indices = @transform_3, window_bounds = array<i64: 128, 10>}, {pipeline_mode = #tpu.pipeline_mode<synchronous>, transform_indices = @transform_4, window_bounds = array<i64: 1, 10>}, {transform_indices = @transform_5, window_bounds = array<i64: 2, 10>}]} {
    %c0 = arith.constant 0 : index
    %c0_0 = arith.constant 0 : index
    %0 = vector.load %arg1[%c0, %c0_0] : memref<2x2048xbf16, #tpu.memory_space<vmem>>, vector<2x2048xbf16>
    %c0_1 = arith.constant 0 : index
    %c0_2 = arith.constant 0 : index
    %1 = vector.load %arg2[%c0_1, %c0_2] : memref<2048x128xbf16, #tpu.memory_space<vmem>>, vector<2048x128xbf16>
    %cst = arith.constant dense<0.000000e+00> : vector<2x128xf32>
    %2 = tpu.matmul %0, %1, %cst {dimension_numbers = #tpu.dot_dimension_numbers<[1], [0], [0], [1], [0, 0, 1, 1], [], []>} : vector<2x2048xbf16>, vector<2048x128xbf16>, vector<2x128xf32> -> vector<2x128xf32>
    %c0_3 = arith.constant 0 : index
    %c0_4 = arith.constant 0 : index
    %3 = vector.load %arg3[%c0_3, %c0_4] : memref<1x128xf32, #tpu.memory_space<vmem>>, vector<1x128xf32>
    %4 = vector.broadcast %3 : vector<1x128xf32> to vector<2x128xf32>
    %5 = arith.addf %2, %4 : vector<2x128xf32>
    %cst_5 = arith.constant 0.000000e+00 : f32
    %6 = vector.broadcast %cst_5 : f32 to vector<2x128xf32>
    %7 = arith.maximumf %5, %6 : vector<2x128xf32>
    %8 = arith.truncf %7 : vector<2x128xf32> to vector<2x128xbf16>
    %c0_6 = arith.constant 0 : index
    %c0_7 = arith.constant 0 : index
    %9 = vector.load %arg4[%c0_6, %c0_7] : memref<128x10xbf16, #tpu.memory_space<vmem>>, vector<128x10xbf16>
    %cst_8 = arith.constant dense<0.000000e+00> : vector<2x10xf32>
    %10 = tpu.matmul %8, %9, %cst_8 {dimension_numbers = #tpu.dot_dimension_numbers<[1], [0], [0], [1], [0, 0, 1, 1], [], []>} : vector<2x128xbf16>, vector<128x10xbf16>, vector<2x10xf32> -> vector<2x10xf32>
    %c0_9 = arith.constant 0 : index
    %c0_10 = arith.constant 0 : index
    %11 = vector.load %arg5[%c0_9, %c0_10] : memref<1x10xf32, #tpu.memory_space<vmem>>, vector<1x10xf32>
    %12 = vector.broadcast %11 : vector<1x10xf32> to vector<2x10xf32>
    %13 = arith.addf %10, %12 : vector<2x10xf32>
    %c0_11 = arith.constant 0 : index
    %c0_12 = arith.constant 0 : index
    %14 = vector.load %arg6[%c0_11, %c0_12] : memref<2x10xf32, #tpu.memory_space<vmem>>, vector<2x10xf32>
    tpu.vector_store %arg6[%c0_11, %c0_12], %13 {strides = array<i32>} : memref<2x10xf32, #tpu.memory_space<vmem>>, vector<2x10xf32>,
    return
  }
  func.func @transform_0(%arg0: i32) -> (i32, i32) {
    %c0_i32 = arith.constant 0 : i32
    %c0_i32_0 = arith.constant 0 : i32
    return %arg0, %c0_i32 : i32, i32
  }
  func.func @transform_1(%arg0: i32) -> (i32, i32) {
    %c0_i32 = arith.constant 0 : i32
    %c0_i32_0 = arith.constant 0 : i32
    %c0_i32_1 = arith.constant 0 : i32
    return %c0_i32, %c0_i32_0 : i32, i32
  }
  func.func @transform_2(%arg0: i32) -> (i32, i32) {
    %c0_i32 = arith.constant 0 : i32
    %c0_i32_0 = arith.constant 0 : i32
    %c0_i32_1 = arith.constant 0 : i32
    return %c0_i32, %c0_i32_0 : i32, i32
  }
  func.func @transform_3(%arg0: i32) -> (i32, i32) {
    %c0_i32 = arith.constant 0 : i32
    %c0_i32_0 = arith.constant 0 : i32
    %c0_i32_1 = arith.constant 0 : i32
    return %c0_i32, %c0_i32_0 : i32, i32
  }
  func.func @transform_4(%arg0: i32) -> (i32, i32) {
    %c0_i32 = arith.constant 0 : i32
    %c0_i32_0 = arith.constant 0 : i32
    %c0_i32_1 = arith.constant 0 : i32
    return %c0_i32, %c0_i32_0 : i32, i32
  }
  func.func @transform_5(%arg0: i32) -> (i32, i32) {
    %c0_i32 = arith.constant 0 : i32
    %c0_i32_0 = arith.constant 0 : i32
    return %arg0, %c0_i32 : i32, i32
  }
}

</mosaic_0001>

<bundles_post_ra>
// kernel: cnn_forward.3
= control target key start
LH: loop header
LB: loop body
LE: loop exit
PB: predicated region body
PF: predicated region fallthrough
CT: control target
= control target key end

     0   :  { %s3146_s12 = smov 0   ;;  %s3148_s13 = smov 0   ;;  %s3760_s0 = inlined_call_operand.vmem [shape: bf16[4,512,27], index: 0, kind: input, shape index: {}]   ;;  %s3761_s1 = inlined_call_operand.vmem [shape: bf16[27,16], index: 1, kind: input, shape index: {}]   ;;  %s3762_s2 = inlined_call_operand.vmem [shape: f32[1,16], index: 2, kind: input, shape index: {}]   ;;  %s3763_s3 = inlined_call_operand.vmem [shape: bf16[512,16], index: 3, kind: output, shape index: {}]  }
   0x1   :  { %s3150_s14 = smov 0  }
   0x2 LB: > { %s2488_s15 = sadd.s32 4294967295, %s3123_s14   ;;  %s3163_s16 = sadd.s32 1, %s3123_s14   ;;  %s3123_s14 = sphi %s3150_s14, %s3766_s14   ;;  %s3119_s13 = sphi %s3148_s13, %s3765_s13   ;;  %s3115_s12 = sphi %s3146_s12, %s3764_s12  }
   0x3   : > { %s17_s17 = ssub.s32 %s3123_s14, %s3163_s16  ;;  %s20_s18 = sadd.s32 1, %s3119_s13 }
   0x4   : > { %p18_p0 = scmp.eq.s32.totalorder %s17_s17, 0  ;;  %p27_p1 = scmp.ne.s32.totalorder %s3119_s13, %s3115_s12 }
   0x5   : > { %p28_p2 = scmp.eq.s32.totalorder %s3123_s14, 0  ;;  %p2491_p4 = scmp.ge.s32.totalorder %s3123_s14, 2 }
   0x6   : > { %s3172_s19 = scalar_select %p18_p0, %s3119_s13, %s20_s18  }
   0x7   : > { %p29_p3 = por %p28_p2, %p27_p1  ;;  %127 = sbr.rel (%p2491_p4) target bundleno = 50 (0x32), region = 24 }
   0xe   : > { %130 = sbr.rel (!%p29_p3) target bundleno = 50 (0x32), region = 28  ;;  %s132_s20 = sand.u32 (%p29_p3), 1, %s3119_s13  }
   0xf   : > { %s2760_s21 = sshll.u32 (%p29_p3), %s3123_s14, 7  ;;  %s2492_s22 = sshll.u32 (%p29_p3), %s132_s20, 9 }
  0x10   : > { %s3180_s25 = scalar_lea.vmem (%p29_p3), %s3760_s0, %s2760_s21  ;;  %s3185_s26 = scalar_lea.vmem (%p29_p3), [#allocation2], %s2492_s22 }
  0x11   : > { %v153_v0 = vld [vmem:[%s3180_s25] sm:$0xff] (%p29_p3)   ;;  %v157_v1 = vld [vmem:[%s3180_s25 + $0x8] sm:$0xff] (%p29_p3)   ;;  %v161_v2 = vld [vmem:[%s3180_s25 + $0x10] sm:$0xff] (%p29_p3)  }
  0x12   : > { %154 = vst [vmem:[%s3185_s26] sm:$0xff] (%p29_p3), %v153_v0   ;;  %158 = vst [vmem:[%s3185_s26 + $0x8] sm:$0xff] (%p29_p3), %v157_v1   ;;  %v165_v3 = vld [vmem:[%s3180_s25 + $0x18] sm:$0xff] (%p29_p3)   ;;  %v169_v4 = vld [vmem:[%s3180_s25 + $0x20] sm:$0xff] (%p29_p3)  }
  0x13   : > { %162 = vst [vmem:[%s3185_s26 + $0x10] sm:$0xff] (%p29_p3), %v161_v2   ;;  %v173_v5 = vld [vmem:[%s3180_s25 + $0x28] sm:$0xff] (%p29_p3)   ;;  %166 = vst [vmem:[%s3185_s26 + $0x18] sm:$0xff] (%p29_p3), %v165_v3   ;;  %v177_v6 = vld [vmem:[%s3180_s25 + $0x30] sm:$0xff] (%p29_p3)  }
  0x14   : > { %170 = vst [vmem:[%s3185_s26 + $0x20] sm:$0xff] (%p29_p3), %v169_v4   ;;  %174 = vst [vmem:[%s3185_s26 + $0x28] sm:$0xff] (%p29_p3), %v173_v5   ;;  %v181_v7 = vld [vmem:[%s3180_s25 + $0x38] sm:$0xff] (%p29_p3)   ;;  %v185_v8 = vld [vmem:[%s3180_s25 + $0x40] sm:$0xff] (%p29_p3)  }
  0x15   : > { %178 = vst [vmem:[%s3185_s26 + $0x30] sm:$0xff] %v177_v6   ;;  %182 = vst [vmem:[%s3185_s26 + $0x38] sm:$0xff] %v181_v7   ;;  %v189_v9 = vld [vmem:[%s3180_s25 + $0x48] sm:$0xff]   ;;  %v193_v10 = vld [vmem:[%s3180_s25 + $0x50] sm:$0xff]  }
  0x16   : > { %186 = vst [vmem:[%s3185_s26 + $0x40] sm:$0xff] %v185_v8   ;;  %v197_v11 = vld [vmem:[%s3180_s25 + $0x58] sm:$0xff]   ;;  %190 = vst [vmem:[%s3185_s26 + $0x48] sm:$0xff] %v189_v9   ;;  %v201_v12 = vld [vmem:[%s3180_s25 + $0x60] sm:$0xff]  }
  0x17   : > { %194 = vst [vmem:[%s3185_s26 + $0x50] sm:$0xff] %v193_v10   ;;  %198 = vst [vmem:[%s3185_s26 + $0x58] sm:$0xff] %v197_v11   ;;  %v205_v13 = vld [vmem:[%s3180_s25 + $0x68] sm:$0xff]   ;;  %v209_v14 = vld [vmem:[%s3180_s25 + $0x70] sm:$0xff]  }
  0x18   : > { %202 = vst [vmem:[%s3185_s26 + $0x60] sm:$0xff] %v201_v12   ;;  %206 = vst [vmem:[%s3185_s26 + $0x68] sm:$0xff] %v205_v13   ;;  %v213_v15 = vld [vmem:[%s3180_s25 + $0x78] sm:$0xff]   ;;  %v217_v16 = vld [vmem:[%s3180_s25 + $0x100] sm:$0xff]  }
  0x19   : > { %210 = vst [vmem:[%s3185_s26 + $0x70] sm:$0xff] %v209_v14   ;;  %v221_v17 = vld [vmem:[%s3180_s25 + $0x108] sm:$0xff]   ;;  %214 = vst [vmem:[%s3185_s26 + $0x78] sm:$0xff] %v213_v15   ;;  %v225_v18 = vld [vmem:[%s3180_s25 + $0x110] sm:$0xff]  }
  0x1a   : > { %218 = vst [vmem:[%s3185_s26 + $0x80] sm:$0xff] %v217_v16   ;;  %222 = vst [vmem:[%s3185_s26 + $0x88] sm:$0xff] %v221_v17   ;;  %v229_v19 = vld [vmem:[%s3180_s25 + $0x118] sm:$0xff]   ;;  %v233_v20 = vld [vmem:[%s3180_s25 + $0x120] sm:$0xff]  }
  0x1b   : > { %226 = vst [vmem:[%s3185_s26 + $0x90] sm:$0xff] %v225_v18   ;;  %230 = vst [vmem:[%s3185_s26 + $0x98] sm:$0xff] %v229_v19   ;;  %v237_v21 = vld [vmem:[%s3180_s25 + $0x128] sm:$0xff]   ;;  %v241_v22 = vld [vmem:[%s3180_s25 + $0x130] sm:$0xff]  }
  0x1c   : > { %234 = vst [vmem:[%s3185_s26 + $0xa0] sm:$0xff] %v233_v20   ;;  %v245_v23 = vld [vmem:[%s3180_s25 + $0x138] sm:$0xff]   ;;  %238 = vst [vmem:[%s3185_s26 + $0xa8] sm:$0xff] %v237_v21   ;;  %v249_v24 = vld [vmem:[%s3180_s25 + $0x140] sm:$0xff]  }
  0x1d   : > { %242 = vst [vmem:[%s3185_s26 + $0xb0] sm:$0xff] %v241_v22   ;;  %246 = vst [vmem:[%s3185_s26 + $0xb8] sm:$0xff] %v245_v23   ;;  %v253_v25 = vld [vmem:[%s3180_s25 + $0x148] sm:$0xff]   ;;  %v257_v26 = vld [vmem:[%s3180_s25 + $0x150] sm:$0xff]  }
  0x1e   : > { %250 = vst [vmem:[%s3185_s26 + $0xc0] sm:$0xff] %v249_v24   ;;  %254 = vst [vmem:[%s3185_s26 + $0xc8] sm:$0xff] %v253_v25   ;;  %v261_v27 = vld [vmem:[%s3180_s25 + $0x158] sm:$0xff]   ;;  %v265_v28 = vld [vmem:[%s3180_s25 + $0x160] sm:$0xff]  }
  0x1f   : > { %258 = vst [vmem:[%s3185_s26 + $0xd0] sm:$0xff] %v257_v26   ;;  %v269_v29 = vld [vmem:[%s3180_s25 + $0x168] sm:$0xff]   ;;  %262 = vst [vmem:[%s3185_s26 + $0xd8] sm:$0xff] %v261_v27   ;;  %v273_v30 = vld [vmem:[%s3180_s25 + $0x170] sm:$0xff]  }
  0x20   : > { %266 = vst [vmem:[%s3185_s26 + $0xe0] sm:$0xff] %v265_v28   ;;  %270 = vst [vmem:[%s3185_s26 + $0xe8] sm:$0xff] %v269_v29   ;;  %v277_v31 = vld [vmem:[%s3180_s25 + $0x178] sm:$0xff]   ;;  %v281_v32 = vld [vmem:[%s3180_s25 + $0x200] sm:$0xff]  }
  0x21   : > { %274 = vst [vmem:[%s3185_s26 + $0xf0] sm:$0xff] %v273_v30   ;;  %278 = vst [vmem:[%s3185_s26 + $0xf8] sm:$0xff] %v277_v31   ;;  %v285_v33 = vld [vmem:[%s3180_s25 + $0x208] sm:$0xff]   ;;  %v289_v34 = vld [vmem:[%s3180_s25 + $0x210] sm:$0xff]  }
  0x22   : > { %282 = vst [vmem:[%s3185_s26 + $0x100] sm:$0xff] %v281_v32   ;;  %v293_v35 = vld [vmem:[%s3180_s25 + $0x218] sm:$0xff]   ;;  %286 = vst [vmem:[%s3185_s26 + $0x108] sm:$0xff] %v285_v33   ;;  %v297_v36 = vld [vmem:[%s3180_s25 + $0x220] sm:$0xff]  }
  0x23   : > { %290 = vst [vmem:[%s3185_s26 + $0x110] sm:$0xff] %v289_v34   ;;  %294 = vst [vmem:[%s3185_s26 + $0x118] sm:$0xff] %v293_v35   ;;  %v301_v37 = vld [vmem:[%s3180_s25 + $0x228] sm:$0xff]   ;;  %v305_v38 = vld [vmem:[%s3180_s25 + $0x230] sm:$0xff]  }
  0x24   : > { %298 = vst [vmem:[%s3185_s26 + $0x120] sm:$0xff] %v297_v36   ;;  %302 = vst [vmem:[%s3185_s26 + $0x128] sm:$0xff] %v301_v37   ;;  %v309_v39 = vld [vmem:[%s3180_s25 + $0x238] sm:$0xff]   ;;  %v313_v40 = vld [vmem:[%s3180_s25 + $0x240] sm:$0xff]  }
  0x25   : > { %306 = vst [vmem:[%s3185_s26 + $0x130] sm:$0xff] %v305_v38   ;;  %v317_v41 = vld [vmem:[%s3180_s25 + $0x248] sm:$0xff]   ;;  %310 = vst [vmem:[%s3185_s26 + $0x138] sm:$0xff] %v309_v39   ;;  %v321_v42 = vld [vmem:[%s3180_s25 + $0x250] sm:$0xff]  }
  0x26   : > { %314 = vst [vmem:[%s3185_s26 + $0x140] sm:$0xff] %v313_v40   ;;  %318 = vst [vmem:[%s3185_s26 + $0x148] sm:$0xff] %v317_v41   ;;  %v325_v43 = vld [vmem:[%s3180_s25 + $0x258] sm:$0xff]   ;;  %v329_v44 = vld [vmem:[%s3180_s25 + $0x260] sm:$0xff]  }
  0x27   : > { %322 = vst [vmem:[%s3185_s26 + $0x150] sm:$0xff] %v321_v42   ;;  %326 = vst [vmem:[%s3185_s26 + $0x158] sm:$0xff] %v325_v43   ;;  %v333_v45 = vld [vmem:[%s3180_s25 + $0x268] sm:$0xff]   ;;  %v337_v46 = vld [vmem:[%s3180_s25 + $0x270] sm:$0xff]  }
  0x28   : > { %330 = vst [vmem:[%s3185_s26 + $0x160] sm:$0xff] %v329_v44   ;;  %v341_v47 = vld [vmem:[%s3180_s25 + $0x278] sm:$0xff]   ;;  %334 = vst [vmem:[%s3185_s26 + $0x168] sm:$0xff] %v333_v45   ;;  %v345_v48 = vld [vmem:[%s3180_s25 + $0x300] sm:$0xff]  }
  0x29   : > { %338 = vst [vmem:[%s3185_s26 + $0x170] sm:$0xff] %v337_v46   ;;  %342 = vst [vmem:[%s3185_s26 + $0x178] sm:$0xff] %v341_v47   ;;  %v349_v49 = vld [vmem:[%s3180_s25 + $0x308] sm:$0xff]   ;;  %v353_v50 = vld [vmem:[%s3180_s25 + $0x310] sm:$0xff]  }
  0x2a   : > { %346 = vst [vmem:[%s3185_s26 + $0x180] sm:$0xff] %v345_v48   ;;  %350 = vst [vmem:[%s3185_s26 + $0x188] sm:$0xff] %v349_v49   ;;  %v357_v51 = vld [vmem:[%s3180_s25 + $0x318] sm:$0xff]   ;;  %v361_v52 = vld [vmem:[%s3180_s25 + $0x320] sm:$0xff]  }
  0x2b   : > { %354 = vst [vmem:[%s3185_s26 + $0x190] sm:$0xff] %v353_v50   ;;  %v365_v53 = vld [vmem:[%s3180_s25 + $0x328] sm:$0xff]   ;;  %358 = vst [vmem:[%s3185_s26 + $0x198] sm:$0xff] %v357_v51   ;;  %v369_v54 = vld [vmem:[%s3180_s25 + $0x330] sm:$0xff]  }
  0x2c   : > { %362 = vst [vmem:[%s3185_s26 + $0x1a0] sm:$0xff] %v361_v52   ;;  %366 = vst [vmem:[%s3185_s26 + $0x1a8] sm:$0xff] %v365_v53   ;;  %v373_v55 = vld [vmem:[%s3180_s25 + $0x338] sm:$0xff]   ;;  %v377_v56 = vld [vmem:[%s3180_s25 + $0x340] sm:$0xff]  }
  0x2d   : > { %370 = vst [vmem:[%s3185_s26 + $0x1b0] sm:$0xff] %v369_v54   ;;  %374 = vst [vmem:[%s3185_s26 + $0x1b8] sm:$0xff] %v373_v55   ;;  %v381_v57 = vld [vmem:[%s3180_s25 + $0x348] sm:$0xff]   ;;  %v385_v58 = vld [vmem:[%s3180_s25 + $0x350] sm:$0xff]  }
  0x2e   : > { %378 = vst [vmem:[%s3185_s26 + $0x1c0] sm:$0xff] %v377_v56   ;;  %v389_v59 = vld [vmem:[%s3180_s25 + $0x358] sm:$0xff]   ;;  %382 = vst [vmem:[%s3185_s26 + $0x1c8] sm:$0xff] %v381_v57   ;;  %v393_v60 = vld [vmem:[%s3180_s25 + $0x360] sm:$0xff]  }
  0x2f   : > { %386 = vst [vmem:[%s3185_s26 + $0x1d0] sm:$0xff] %v385_v58   ;;  %390 = vst [vmem:[%s3185_s26 + $0x1d8] sm:$0xff] %v389_v59   ;;  %v397_v61 = vld [vmem:[%s3180_s25 + $0x368] sm:$0xff]   ;;  %v401_v62 = vld [vmem:[%s3180_s25 + $0x370] sm:$0xff]  }
  0x30   : > { %394 = vst [vmem:[%s3185_s26 + $0x1e0] sm:$0xff] %v393_v60   ;;  %398 = vst [vmem:[%s3185_s26 + $0x1e8] sm:$0xff] %v397_v61   ;;  %v405_v63 = vld [vmem:[%s3180_s25 + $0x378] sm:$0xff]  }
  0x31   : > { %402 = vst [vmem:[%s3185_s26 + $0x1f0] sm:$0xff] %v401_v62   ;;  %406 = vst [vmem:[%s3185_s26 + $0x1f8] sm:$0xff] %v405_v63  }
  0x32 PF: > { %p2495_p5 = scmp.ge.s32.totalorder %s3123_s14, 1  ;;  %p686_p6 = scmp.lt.s32.totalorder %s3123_s14, 3 }
  0x34   : > { %p687_p7 = pnand %p2495_p5, %p686_p6 }
  0x35   : > { %v3034_v0 = vld [vmem:[%s3761_s1] sm:$0xff] (!%p687_p7)   ;;  %vm907_vm0 = vcmask (!%p687_p7), 1044480   ;;  %v3035_v1 = vld [vmem:[%s3761_s1 + $0x8] sm:$0x3f] (!%p687_p7)   ;;  %vm908_vm1 = vcmask (!%p687_p7), 1045504   ;;  %s693_s4 = sand.u32 (!%p687_p7), 1, %s3115_s12  }
  0x36   : > { %690 = sbr.rel (%p687_p7) target bundleno = 411 (0x19b), region = 69  ;;  %2865 = vmatprep.subr.bf16.mxu0 (!%p687_p7), %v3034_v0  ;;  %2901 = vmatprep.subr.bf16.mxu1 (!%p687_p7), %v3034_v0  ;;  %v3125_v2 = vmov (!%p687_p7), 65535   ;;  %s2496_s5 = sshll.u32 (!%p687_p7), %s693_s4, 9  ;;  %vm858_vm2 = vcmask (!%p687_p7), 220160   ;;  %vm2393_vm3 = vcmask (!%p687_p7), 125952  }
  0x37   : > { %2866 = vmatpush3.bf16.msra.mxu0 (!%p687_p7), %v3034_v0  ;;  %2902 = vmatpush3.bf16.msra.mxu1 (!%p687_p7), %v3034_v0  ;;  %v909_v3 = vsel (!%p687_p7), %vm907_vm0, 4294967295, %v3125_v2  ;;  %s3321_s6 = scalar_lea.vmem (!%p687_p7), [#allocation2], %s2496_s5  ;;  %s2497_s9 = sshll.u32 (!%p687_p7), %s2488_s15, 5 }
  0x38   : > { %v910_v4 = vsel (!%p687_p7), %vm908_vm1, %v909_v3, 0  ;;  %v3036_v6 = vld [vmem:[%s3321_s6] sm:$0xff] (!%p687_p7)   ;;  %v3038_v8 = vld [vmem:[%s3321_s6 + $0x8] sm:$0xff] (!%p687_p7)   ;;  %v3040_v10 = vld [vmem:[%s3321_s6 + $0x10] sm:$0xff] (!%p687_p7)   ;;  %p718_p8 = scmp.lt.s32.totalorder (!%p687_p7), %s2497_s9, 63 }
  0x39   : > { %v912_v5 = vand.u32 (!%p687_p7), %v3035_v1, %v910_v4  ;;  %v3037_v7 = vld [vmem:[%s3321_s6 + $0x80] sm:$0xff] (!%p687_p7)   ;;  %v3039_v9 = vld [vmem:[%s3321_s6 + $0x88] sm:$0xff] (!%p687_p7)   ;;  %2869 = vmatprep.mubr.msk.bf16.mxu0 (!%p687_p7), %vm858_vm2, %v3036_v6  ;;  %v3041_v11 = vld [vmem:[%s3321_s6 + $0x90] sm:$0xff] (!%p687_p7)  }
  0x3a   : > { %2905 = vmatprep.mubr.msk.bf16.mxu1 (!%p687_p7), %vm858_vm2, %v3037_v7  ;;  %v3042_v12 = vld [vmem:[%s3321_s6 + $0x18] sm:$0xff] (!%p687_p7)   ;;  %v3044_v14 = vld [vmem:[%s3321_s6 + $0x20] sm:$0xff] (!%p687_p7)   ;;  %v3046_v16 = vld [vmem:[%s3321_s6 + $0x28] sm:$0xff] (!%p687_p7)  }
  0x3b   : > { %2867 = vmatprep.subr.bf16.mxu0 (!%p687_p7), %v912_v5  ;;  %2903 = vmatprep.subr.bf16.mxu1 (!%p687_p7), %v912_v5  ;;  %v3043_v13 = vld [vmem:[%s3321_s6 + $0x98] sm:$0xff] (!%p687_p7)   ;;  %v3045_v15 = vld [vmem:[%s3321_s6 + $0xa0] sm:$0xff] (!%p687_p7)   ;;  %v3047_v17 = vld [vmem:[%s3321_s6 + $0xa8] sm:$0xff] (!%p687_p7)  }
  0x3c   : > { %2868 = vmatpush3.bf16.msra.mxu0 (!%p687_p7), %v912_v5  ;;  %2904 = vmatpush3.bf16.msra.mxu1 (!%p687_p7), %v912_v5  ;;  %v3048_v18 = vld [vmem:[%s3321_s6 + $0x30] sm:$0xff] (!%p687_p7)   ;;  %v3050_v20 = vld [vmem:[%s3321_s6 + $0x38] sm:$0xff] (!%p687_p7)   ;;  %v3052_v22 = vld [vmem:[%s3321_s6 + $0x40] sm:$0xff] (!%p687_p7)  }
  0x3d   : > { %2937 = vmatprep.subr.bf16.mxu0 %v3034_v0  ;;  %2973 = vmatprep.subr.bf16.mxu1 %v3034_v0  ;;  %v3049_v19 = vld [vmem:[%s3321_s6 + $0xb0] sm:$0xff]   ;;  %v3051_v21 = vld [vmem:[%s3321_s6 + $0xb8] sm:$0xff]   ;;  %v3053_v23 = vld [vmem:[%s3321_s6 + $0xc0] sm:$0xff]   ;;  %s3768_s9 = smov (!%p718_p8, %s2497_s9), 63 }
  0x3e   : > { %v3054_v24 = vld [vmem:[%s3321_s6 + $0x48] sm:$0xff]   ;;  %v3056_v26 = vld [vmem:[%s3321_s6 + $0x50] sm:$0xff]   ;;  %v3058_v28 = vld [vmem:[%s3321_s6 + $0x58] sm:$0xff]   ;;  %s2498_s10 = sshll.u32 %s3768_s9, 2 }
  0x3f   : > { %2870 = vmatmul.mubr.msk.bf16.vlgmr.msra.gmra.mrb[0].mxu0 %vm858_vm2, %v3038_v8  ;;  %2906 = vmatmul.mubr.msk.bf16.vlgmr.msra.gmra.mrb[0].mxu1 %vm858_vm2, %v3039_v9  ;;  %v3055_v25 = vld [vmem:[%s3321_s6 + $0xc8] sm:$0xff]   ;;  %v3057_v27 = vld [vmem:[%s3321_s6 + $0xd0] sm:$0xff]   ;;  %v3059_v29 = vld [vmem:[%s3321_s6 + $0xd8] sm:$0xff]   ;;  %s3598_s14 = scalar_lea.vmem %s3763_s3, %s2498_s10 }
  0x40   : > { %2938 = vmatpush3.bf16.msra.mxu0 %v3034_v0  ;;  %2974 = vmatpush3.bf16.msra.mxu1 %v3034_v0  ;;  %v3060_v30 = vld [vmem:[%s3321_s6 + $0x60] sm:$0xff]   ;;  %v3062_v32 = vld [vmem:[%s3321_s6 + $0x68] sm:$0xff]   ;;  %v3064_v34 = vld [vmem:[%s3321_s6 + $0x70] sm:$0xff]  }
  0x41   : > { %2873 = vmatprep.mubr.msk.bf16.mxu0 %vm858_vm2, %v3040_v10  ;;  %2909 = vmatprep.mubr.msk.bf16.mxu1 %vm858_vm2, %v3041_v11  ;;  %v3061_v31 = vld [vmem:[%s3321_s6 + $0xe0] sm:$0xff]   ;;  %v3063_v33 = vld [vmem:[%s3321_s6 + $0xe8] sm:$0xff]   ;;  %v3065_v35 = vld [vmem:[%s3321_s6 + $0xf0] sm:$0xff]  }
  0x42   : > { %2939 = vmatprep.subr.bf16.mxu0 %v912_v5  ;;  %2975 = vmatprep.subr.bf16.mxu1 %v912_v5  ;;  %v3066_v36 = vld [vmem:[%s3321_s6 + $0x78] sm:$0xff]   ;;  %v3068_v38 = vld [vmem:[%s3321_s6 + $0x100] sm:$0xff]   ;;  %v3070_v40 = vld [vmem:[%s3321_s6 + $0x108] sm:$0xff]  }
  0x43   : > { %v3067_v37 = vld [vmem:[%s3321_s6 + $0xf8] sm:$0xff]   ;;  %v3069_v39 = vld [vmem:[%s3321_s6 + $0x180] sm:$0xff]   ;;  %v3071_v41 = vld [vmem:[%s3321_s6 + $0x188] sm:$0xff]  }
  0x44   : > { %2940 = vmatpush3.bf16.msra.mxu0 %v912_v5  ;;  %2976 = vmatpush3.bf16.msra.mxu1 %v912_v5  ;;  %v3072_v42 = vld [vmem:[%s3321_s6 + $0x110] sm:$0xff]   ;;  %v3074_v44 = vld [vmem:[%s3321_s6 + $0x118] sm:$0xff]   ;;  %v3076_v46 = vld [vmem:[%s3321_s6 + $0x120] sm:$0xff]  }
  0x45   : > { %v3073_v43 = vld [vmem:[%s3321_s6 + $0x190] sm:$0xff]   ;;  %v3075_v45 = vld [vmem:[%s3321_s6 + $0x198] sm:$0xff]   ;;  %v3077_v47 = vld [vmem:[%s3321_s6 + $0x1a0] sm:$0xff]  }
  0x46   : > { %v3078_v48 = vld [vmem:[%s3321_s6 + $0x128] sm:$0xff]   ;;  %v3080_v50 = vld [vmem:[%s3321_s6 + $0x130] sm:$0xff]   ;;  %v3082_v52 = vld [vmem:[%s3321_s6 + $0x138] sm:$0xff]  }
  0x47   : > { %2874 = vmatmul.mubr.msk.bf16.gmra.mrb[4].mxu0 %vm858_vm2, %v3042_v12  ;;  %2910 = vmatmul.mubr.msk.bf16.gmra.mrb[4].mxu1 %vm858_vm2, %v3043_v13  ;;  %v3079_v49 = vld [vmem:[%s3321_s6 + $0x1a8] sm:$0xff]   ;;  %v3081_v51 = vld [vmem:[%s3321_s6 + $0x1b0] sm:$0xff]   ;;  %v3083_v53 = vld [vmem:[%s3321_s6 + $0x1b8] sm:$0xff]  }
  0x48   : > { %2877 = vmatprep.mubr.msk.bf16.mxu0 %vm858_vm2, %v3044_v14  ;;  %2913 = vmatprep.mubr.msk.bf16.mxu1 %vm858_vm2, %v3045_v15  ;;  %v3084_v54 = vld [vmem:[%s3321_s6 + $0x140] sm:$0xff]   ;;  %v3086_v56 = vld [vmem:[%s3321_s6 + $0x148] sm:$0xff]   ;;  %v3088_v58 = vld [vmem:[%s3321_s6 + $0x150] sm:$0xff]  }
  0x49   : > { %v3085_v55 = vld [vmem:[%s3321_s6 + $0x1c0] sm:$0xff]   ;;  %v3087_v57 = vld [vmem:[%s3321_s6 + $0x1c8] sm:$0xff]   ;;  %v3089_v59 = vld [vmem:[%s3321_s6 + $0x1d0] sm:$0xff]  }
  0x4a   : > { %v3090_v60 = vld [vmem:[%s3321_s6 + $0x158] sm:$0xff]   ;;  %v3092_v62 = vld [vmem:[%s3321_s6 + $0x160] sm:$0xff]   ;;  %v3094_v0 = vld [vmem:[%s3321_s6 + $0x168] sm:$0xff]  }
  0x4b   : > { %v3091_v61 = vld [vmem:[%s3321_s6 + $0x1d8] sm:$0xff]   ;;  %v3093_v63 = vld [vmem:[%s3321_s6 + $0x1e0] sm:$0xff]   ;;  %v3095_v1 = vld [vmem:[%s3321_s6 + $0x1e8] sm:$0xff]  }
  0x4c   : > { %v3096_v2 = vld [vmem:[%s3321_s6 + $0x170] sm:$0xff]   ;;  %v3098_v4 = vld [vmem:[%s3321_s6 + $0x178] sm:$0xff]   ;;  %v3454_v6 = vld [vmem:[%s3762_s2] ss:$0 sm:$0xff] }
  0x4d   : > { %v3097_v3 = vld [vmem:[%s3321_s6 + $0x1f0] sm:$0xff]   ;;  %v3099_v5 = vld [vmem:[%s3321_s6 + $0x1f8] sm:$0xff]  }
  0x4f   : > { %2878 = vmatmul.mubr.msk.bf16.gmra.mrb[8].mxu0 %vm858_vm2, %v3046_v16  ;;  %2914 = vmatmul.mubr.msk.bf16.gmra.mrb[8].mxu1 %vm858_vm2, %v3047_v17 }
  0x50   : > { %2881 = vmatprep.mubr.msk.bf16.mxu0 %vm858_vm2, %v3048_v18  ;;  %2917 = vmatprep.mubr.msk.bf16.mxu1 %vm858_vm2, %v3049_v19 }
  0x57   : > { %2882 = vmatmul.mubr.msk.bf16.gmra.mrb[12].mxu0 %vm858_vm2, %v3050_v20  ;;  %2918 = vmatmul.mubr.msk.bf16.gmra.mrb[12].mxu1 %vm858_vm2, %v3051_v21 }
  0x58   : > { %2885 = vmatprep.mubr.msk.bf16.mxu0 %vm858_vm2, %v3052_v22  ;;  %2921 = vmatprep.mubr.msk.bf16.mxu1 %vm858_vm2, %v3053_v23 }
  0x5f   : > { %2886 = vmatmul.mubr.msk.bf16.gmra.mrb[16].mxu0 %vm858_vm2, %v3054_v24  ;;  %2922 = vmatmul.mubr.msk.bf16.gmra.mrb[16].mxu1 %vm858_vm2, %v3055_v25 }
  0x60   : > { %2889 = vmatprep.mubr.msk.bf16.mxu0 %vm858_vm2, %v3056_v26  ;;  %2925 = vmatprep.mubr.msk.bf16.mxu1 %vm858_vm2, %v3057_v27 }
  0x67   : > { %2890 = vmatmul.mubr.msk.bf16.gmra.mrb[20].mxu0 %vm858_vm2, %v3058_v28  ;;  %2926 = vmatmul.mubr.msk.bf16.gmra.mrb[20].mxu1 %vm858_vm2, %v3059_v29 }
  0x68   : > { %2893 = vmatprep.mubr.msk.bf16.mxu0 %vm858_vm2, %v3060_v30  ;;  %2929 = vmatprep.mubr.msk.bf16.mxu1 %vm858_vm2, %v3061_v31 }
  0x6f   : > { %2894 = vmatmul.mubr.msk.bf16.gmra.mrb[24].mxu0 %vm858_vm2, %v3062_v32  ;;  %2930 = vmatmul.mubr.msk.bf16.gmra.mrb[24].mxu1 %vm858_vm2, %v3063_v33 }
  0x70   : > { %2897 = vmatprep.mubr.msk.bf16.mxu0 %vm858_vm2, %v3064_v34  ;;  %2933 = vmatprep.mubr.msk.bf16.mxu1 %vm858_vm2, %v3065_v35 }
  0x77   : > { %2898 = vmatmul.mubr.msk.bf16.gmra.mrb[28].mxu0 %vm858_vm2, %v3066_v36  ;;  %2934 = vmatmul.mubr.msk.bf16.gmra.mrb[28].mxu1 %vm858_vm2, %v3067_v37 }
  0x78   : > { %2941 = vmatprep.mubr.msk.bf16.mxu0 %vm858_vm2, %v3068_v38  ;;  %2977 = vmatprep.mubr.msk.bf16.mxu1 %vm858_vm2, %v3069_v39 }
  0x7f   : > { %2942 = vmatmul.mubr.msk.bf16.vlgmr.msra.gmra.mrb[32].mxu0 %vm858_vm2, %v3070_v40  ;;  %2978 = vmatmul.mubr.msk.bf16.vlgmr.msra.gmra.mrb[32].mxu1 %vm858_vm2, %v3071_v41 }
  0x80   : > { %2945 = vmatprep.mubr.msk.bf16.mxu0 %vm858_vm2, %v3072_v42  ;;  %2981 = vmatprep.mubr.msk.bf16.mxu1 %vm858_vm2, %v3073_v43 }
  0x87   : > { %2946 = vmatmul.mubr.msk.bf16.gmra.mrb[36].mxu0 %vm858_vm2, %v3074_v44  ;;  %2982 = vmatmul.mubr.msk.bf16.gmra.mrb[36].mxu1 %vm858_vm2, %v3075_v45 }
  0x88   : > { %2949 = vmatprep.mubr.msk.bf16.mxu0 %vm858_vm2, %v3076_v46  ;;  %2985 = vmatprep.mubr.msk.bf16.mxu1 %vm858_vm2, %v3077_v47 }
  0x8f   : > { %2950 = vmatmul.mubr.msk.bf16.gmra.mrb[40].mxu0 %vm858_vm2, %v3078_v48  ;;  %2986 = vmatmul.mubr.msk.bf16.gmra.mrb[40].mxu1 %vm858_vm2, %v3079_v49 }
  0x90   : > { %2953 = vmatprep.mubr.msk.bf16.mxu0 %vm858_vm2, %v3080_v50  ;;  %2989 = vmatprep.mubr.msk.bf16.mxu1 %vm858_vm2, %v3081_v51 }
  0x97   : > { %2954 = vmatmul.mubr.msk.bf16.gmra.mrb[44].mxu0 %vm858_vm2, %v3082_v52  ;;  %2990 = vmatmul.mubr.msk.bf16.gmra.mrb[44].mxu1 %vm858_vm2, %v3083_v53 }
  0x98   : > { %2957 = vmatprep.mubr.msk.bf16.mxu0 %vm858_vm2, %v3084_v54  ;;  %2993 = vmatprep.mubr.msk.bf16.mxu1 %vm858_vm2, %v3085_v55 }
  0x9f   : > { %2958 = vmatmul.mubr.msk.bf16.gmra.mrb[48].mxu0 %vm858_vm2, %v3086_v56  ;;  %2994 = vmatmul.mubr.msk.bf16.gmra.mrb[48].mxu1 %vm858_vm2, %v3087_v57 }
  0xa0   : > { %2961 = vmatprep.mubr.msk.bf16.mxu0 %vm858_vm2, %v3088_v58  ;;  %2997 = vmatprep.mubr.msk.bf16.mxu1 %vm858_vm2, %v3089_v59 }
  0xa7   : > { %2962 = vmatmul.mubr.msk.bf16.gmra.mrb[52].mxu0 %vm858_vm2, %v3090_v60  ;;  %2998 = vmatmul.mubr.msk.bf16.gmra.mrb[52].mxu1 %vm858_vm2, %v3091_v61 }
  0xa8   : > { %2965 = vmatprep.mubr.msk.bf16.mxu0 %vm858_vm2, %v3092_v62  ;;  %3001 = vmatprep.mubr.msk.bf16.mxu1 %vm858_vm2, %v3093_v63 }
  0xaf   : > { %2966 = vmatmul.mubr.msk.bf16.gmra.mrb[56].mxu0 %vm858_vm2, %v3094_v0  ;;  %3002 = vmatmul.mubr.msk.bf16.gmra.mrb[56].mxu1 %vm858_vm2, %v3095_v1 }
  0xb0   : > { %2969 = vmatprep.mubr.msk.bf16.mxu0 %vm858_vm2, %v3096_v2  ;;  %3005 = vmatprep.mubr.msk.bf16.mxu1 %vm858_vm2, %v3097_v3 }
  0xb7   : > { %2970 = vmatmul.mubr.msk.bf16.gmra.mrb[60].mxu0 %vm858_vm2, %v3098_v4  ;;  %3006 = vmatmul.mubr.msk.bf16.gmra.mrb[60].mxu1 %vm858_vm2, %v3099_v5 }
 0x112   : > { %v2871_v7 = vpop.f32.mrb[0].mxu0  ;;  %v2907_v8 = vpop.f32.mrb[0].mxu1 }
 0x113   : > { %v957_v9 = vadd.f32 %v2871_v7, %v3454_v6  ;;  %v1311_v10 = vadd.f32 %v2907_v8, %v3454_v6  ;;  %v948_v11 = vpop.f32.mrb[1].mxu0  ;;  %v1302_v12 = vpop.f32.mrb[1].mxu1 }
 0x114   : > { %v949_v13 = vadd.f32 %v3454_v6, %v948_v11  ;;  %v1303_v14 = vadd.f32 %v3454_v6, %v1302_v12  ;;  %v2872_v15 = vpop.f32.mrb[2].mxu0  ;;  %v2908_v16 = vpop.f32.mrb[2].mxu1 }
 0x115   : > { %v1077_v17 = vmax.f32 %v957_v9, 0.0  ;;  %v1431_v18 = vmax.f32 %v1311_v10, 0.0  ;;  %v960_v19 = vadd.f32 %v2872_v15, %v3454_v6  ;;  %v1314_v20 = vadd.f32 %v2908_v16, %v3454_v6  ;;  %v951_v21 = vpop.f32.mrb[3].mxu0  ;;  %v1305_v22 = vpop.f32.mrb[3].mxu1 }
 0x116   : > { %v1075_v23 = vmax.f32 %v949_v13, 0.0  ;;  %v1429_v24 = vmax.f32 %v1303_v14, 0.0  ;;  %v952_v25 = vadd.f32 %v3454_v6, %v951_v21  ;;  %v1306_v26 = vadd.f32 %v3454_v6, %v1305_v22 }
 0x117   : > { %v3464_v27 = vmax.f32 %v1077_v17, %v1431_v18  ;;  %v1078_v28 = vmax.f32 %v960_v19, 0.0  ;;  %v1432_v29 = vmax.f32 %v1314_v20, 0.0 }
 0x118   : > { %v3466_v30 = vmax.f32 %v1075_v23, %v1429_v24  ;;  %v1076_v31 = vmax.f32 %v952_v25, 0.0  ;;  %v1430_v32 = vmax.f32 %v1306_v26, 0.0 }
 0x119   : > { %v3468_v33 = vmax.f32 %v1078_v28, %v1432_v29 }
 0x11a   : > { %v3470_v34 = vmax.f32 %v1076_v31, %v1430_v32  ;;  %v2875_v35 = vpop.f32.mrb[4].mxu0  ;;  %v2911_v36 = vpop.f32.mrb[4].mxu1 }
 0x11b   : > { %v973_v37 = vadd.f32 %v2875_v35, %v3454_v6  ;;  %v1327_v38 = vadd.f32 %v2911_v36, %v3454_v6  ;;  %v964_v39 = vpop.f32.mrb[5].mxu0  ;;  %v1318_v40 = vpop.f32.mrb[5].mxu1 }
 0x11c   : > { %v965_v41 = vadd.f32 %v3454_v6, %v964_v39  ;;  %v1319_v42 = vadd.f32 %v3454_v6, %v1318_v40  ;;  %v2876_v43 = vpop.f32.mrb[6].mxu0  ;;  %v2912_v44 = vpop.f32.mrb[6].mxu1 }
 0x11d   : > { %v1081_v45 = vmax.f32 %v973_v37, 0.0  ;;  %v1435_v46 = vmax.f32 %v1327_v38, 0.0  ;;  %v976_v47 = vadd.f32 %v2876_v43, %v3454_v6  ;;  %v1330_v48 = vadd.f32 %v2912_v44, %v3454_v6  ;;  %v967_v49 = vpop.f32.mrb[7].mxu0  ;;  %v1321_v50 = vpop.f32.mrb[7].mxu1 }
 0x11e   : > { %v1079_v51 = vmax.f32 %v965_v41, 0.0  ;;  %v1433_v52 = vmax.f32 %v1319_v42, 0.0  ;;  %v968_v53 = vadd.f32 %v3454_v6, %v967_v49  ;;  %v1322_v54 = vadd.f32 %v3454_v6, %v1321_v50 }
 0x11f   : > { %v3480_v55 = vmax.f32 %v1081_v45, %v1435_v46  ;;  %v1082_v56 = vmax.f32 %v976_v47, 0.0  ;;  %v1436_v57 = vmax.f32 %v1330_v48, 0.0 }
 0x120   : > { %v3482_v58 = vmax.f32 %v1079_v51, %v1433_v52  ;;  %v1080_v59 = vmax.f32 %v968_v53, 0.0  ;;  %v1434_v60 = vmax.f32 %v1322_v54, 0.0 }
 0x121   : > { %v3484_v61 = vmax.f32 %v1082_v56, %v1436_v57 }
 0x122   : > { %v3486_v62 = vmax.f32 %v1080_v59, %v1434_v60  ;;  %v2879_v63 = vpop.f32.mrb[8].mxu0  ;;  %v2915_v0 = vpop.f32.mrb[8].mxu1 }
 0x123   : > { %v989_v1 = vadd.f32 %v2879_v63, %v3454_v6  ;;  %v1343_v2 = vadd.f32 %v2915_v0, %v3454_v6  ;;  %v980_v3 = vpop.f32.mrb[9].mxu0  ;;  %v1334_v4 = vpop.f32.mrb[9].mxu1 }
 0x124   : > { %v981_v5 = vadd.f32 %v3454_v6, %v980_v3  ;;  %v1335_v7 = vadd.f32 %v3454_v6, %v1334_v4  ;;  %v2880_v8 = vpop.f32.mrb[10].mxu0  ;;  %v2916_v9 = vpop.f32.mrb[10].mxu1 }
 0x125   : > { %v1085_v10 = vmax.f32 %v989_v1, 0.0  ;;  %v1439_v11 = vmax.f32 %v1343_v2, 0.0  ;;  %v992_v12 = vadd.f32 %v2880_v8, %v3454_v6  ;;  %v1346_v13 = vadd.f32 %v2916_v9, %v3454_v6  ;;  %v983_v14 = vpop.f32.mrb[11].mxu0  ;;  %v1337_v15 = vpop.f32.mrb[11].mxu1 }
 0x126   : > { %v1083_v16 = vmax.f32 %v981_v5, 0.0  ;;  %v1437_v17 = vmax.f32 %v1335_v7, 0.0  ;;  %v984_v18 = vadd.f32 %v3454_v6, %v983_v14  ;;  %v1338_v19 = vadd.f32 %v3454_v6, %v1337_v15 }
 0x127   : > { %v3496_v20 = vmax.f32 %v1085_v10, %v1439_v11  ;;  %v1086_v21 = vmax.f32 %v992_v12, 0.0  ;;  %v1440_v22 = vmax.f32 %v1346_v13, 0.0 }
 0x128   : > { %v3498_v23 = vmax.f32 %v1083_v16, %v1437_v17  ;;  %v1084_v24 = vmax.f32 %v984_v18, 0.0  ;;  %v1438_v25 = vmax.f32 %v1338_v19, 0.0 }
 0x129   : > { %v3500_v26 = vmax.f32 %v1086_v21, %v1440_v22 }
 0x12a   : > { %v3502_v28 = vmax.f32 %v1084_v24, %v1438_v25  ;;  %v2883_v29 = vpop.f32.mrb[12].mxu0  ;;  %v2919_v31 = vpop.f32.mrb[12].mxu1 }
 0x12b   : > { %v1005_v32 = vadd.f32 %v2883_v29, %v3454_v6  ;;  %v1359_v35 = vadd.f32 %v2919_v31, %v3454_v6  ;;  %v996_v36 = vpop.f32.mrb[13].mxu0  ;;  %v1350_v37 = vpop.f32.mrb[13].mxu1 }
 0x12c   : > { %v997_v38 = vadd.f32 %v3454_v6, %v996_v36  ;;  %v1351_v39 = vadd.f32 %v3454_v6, %v1350_v37  ;;  %v2884_v40 = vpop.f32.mrb[14].mxu0  ;;  %v2920_v41 = vpop.f32.mrb[14].mxu1 }
 0x12d   : > { %v1089_v42 = vmax.f32 %v1005_v32, 0.0  ;;  %v1443_v43 = vmax.f32 %v1359_v35, 0.0  ;;  %v1008_v44 = vadd.f32 %v2884_v40, %v3454_v6  ;;  %v1362_v45 = vadd.f32 %v2920_v41, %v3454_v6  ;;  %v999_v46 = vpop.f32.mrb[15].mxu0  ;;  %v1353_v47 = vpop.f32.mrb[15].mxu1 }
 0x12e   : > { %v1087_v48 = vmax.f32 %v997_v38, 0.0  ;;  %v1441_v49 = vmax.f32 %v1351_v39, 0.0  ;;  %v1000_v50 = vadd.f32 %v3454_v6, %v999_v46  ;;  %v1354_v51 = vadd.f32 %v3454_v6, %v1353_v47 }
 0x12f   : > { %v3512_v52 = vmax.f32 %v1089_v42, %v1443_v43  ;;  %v1090_v53 = vmax.f32 %v1008_v44, 0.0  ;;  %v1444_v54 = vmax.f32 %v1362_v45, 0.0 }
 0x130   : > { %v3514_v56 = vmax.f32 %v1087_v48, %v1441_v49  ;;  %v1088_v57 = vmax.f32 %v1000_v50, 0.0  ;;  %v1442_v59 = vmax.f32 %v1354_v51, 0.0 }
 0x131   : > { %v3516_v60 = vmax.f32 %v1090_v53, %v1444_v54 }
 0x132   : > { %v3518_v63 = vmax.f32 %v1088_v57, %v1442_v59  ;;  %v2887_v0 = vpop.f32.mrb[16].mxu0  ;;  %v2923_v1 = vpop.f32.mrb[16].mxu1 }
 0x133   : > { %v1021_v2 = vadd.f32 %v2887_v0, %v3454_v6  ;;  %v1375_v3 = vadd.f32 %v2923_v1, %v3454_v6  ;;  %v1012_v4 = vpop.f32.mrb[17].mxu0  ;;  %v1366_v5 = vpop.f32.mrb[17].mxu1 }
 0x134   : > { %v1013_v7 = vadd.f32 %v3454_v6, %v1012_v4  ;;  %v1367_v8 = vadd.f32 %v3454_v6, %v1366_v5  ;;  %v2888_v9 = vpop.f32.mrb[18].mxu0  ;;  %v2924_v10 = vpop.f32.mrb[18].mxu1 }
 0x135   : > { %v1093_v11 = vmax.f32 %v1021_v2, 0.0  ;;  %v1447_v12 = vmax.f32 %v1375_v3, 0.0  ;;  %v1024_v13 = vadd.f32 %v2888_v9, %v3454_v6  ;;  %v1378_v14 = vadd.f32 %v2924_v10, %v3454_v6  ;;  %v1015_v15 = vpop.f32.mrb[19].mxu0  ;;  %v1369_v16 = vpop.f32.mrb[19].mxu1 }
 0x136   : > { %v1091_v17 = vmax.f32 %v1013_v7, 0.0  ;;  %v1445_v18 = vmax.f32 %v1367_v8, 0.0  ;;  %v1016_v19 = vadd.f32 %v3454_v6, %v1015_v15  ;;  %v1370_v21 = vadd.f32 %v3454_v6, %v1369_v16 }
 0x137   : > { %v3528_v22 = vmax.f32 %v1093_v11, %v1447_v12  ;;  %v1094_v24 = vmax.f32 %v1024_v13, 0.0  ;;  %v1448_v25 = vmax.f32 %v1378_v14, 0.0 }
 0x138   : > { %v3530_v29 = vmax.f32 %v1091_v17, %v1445_v18  ;;  %v1092_v31 = vmax.f32 %v1016_v19, 0.0  ;;  %v1446_v32 = vmax.f32 %v1370_v21, 0.0 }
 0x139   : > { %v3532_v35 = vmax.f32 %v1094_v24, %v1448_v25 }
 0x13a   : > { %v3534_v36 = vmax.f32 %v1092_v31, %v1446_v32  ;;  %v2891_v37 = vpop.f32.mrb[20].mxu0  ;;  %v2927_v38 = vpop.f32.mrb[20].mxu1 }
 0x13b   : > { %v1037_v39 = vadd.f32 %v2891_v37, %v3454_v6  ;;  %v1391_v40 = vadd.f32 %v2927_v38, %v3454_v6  ;;  %v1028_v41 = vpop.f32.mrb[21].mxu0  ;;  %v1382_v42 = vpop.f32.mrb[21].mxu1 }
 0x13c   : > { %v1029_v43 = vadd.f32 %v3454_v6, %v1028_v41  ;;  %v1383_v44 = vadd.f32 %v3454_v6, %v1382_v42  ;;  %v2892_v45 = vpop.f32.mrb[22].mxu0  ;;  %v2928_v46 = vpop.f32.mrb[22].mxu1 }
 0x13d   : > { %v1097_v47 = vmax.f32 %v1037_v39, 0.0  ;;  %v1451_v48 = vmax.f32 %v1391_v40, 0.0  ;;  %v1040_v49 = vadd.f32 %v2892_v45, %v3454_v6  ;;  %v1394_v50 = vadd.f32 %v2928_v46, %v3454_v6  ;;  %v1031_v51 = vpop.f32.mrb[23].mxu0  ;;  %v1385_v53 = vpop.f32.mrb[23].mxu1 }
 0x13e   : > { %v1095_v54 = vmax.f32 %v1029_v43, 0.0  ;;  %v1449_v57 = vmax.f32 %v1383_v44, 0.0  ;;  %v1032_v59 = vadd.f32 %v3454_v6, %v1031_v51  ;;  %v1386_v0 = vadd.f32 %v3454_v6, %v1385_v53 }
 0x13f   : > { %v3544_v1 = vmax.f32 %v1097_v47, %v1451_v48  ;;  %v1098_v2 = vmax.f32 %v1040_v49, 0.0  ;;  %v1452_v3 = vmax.f32 %v1394_v50, 0.0 }
 0x140   : > { %v3546_v4 = vmax.f32 %v1095_v54, %v1449_v57  ;;  %v1096_v5 = vmax.f32 %v1032_v59, 0.0  ;;  %v1450_v7 = vmax.f32 %v1386_v0, 0.0 }
 0x141   : > { %v3548_v8 = vmax.f32 %v1098_v2, %v1452_v3 }
 0x142   : > { %v3550_v9 = vmax.f32 %v1096_v5, %v1450_v7  ;;  %v2895_v10 = vpop.f32.mrb[24].mxu0  ;;  %v2931_v11 = vpop.f32.mrb[24].mxu1 }
 0x143   : > { %v1053_v12 = vadd.f32 %v2895_v10, %v3454_v6  ;;  %v1407_v13 = vadd.f32 %v2931_v11, %v3454_v6  ;;  %v1044_v14 = vpop.f32.mrb[25].mxu0  ;;  %v1398_v15 = vpop.f32.mrb[25].mxu1 }
 0x144   : > { %v1045_v16 = vadd.f32 %v3454_v6, %v1044_v14  ;;  %v1399_v17 = vadd.f32 %v3454_v6, %v1398_v15  ;;  %v2896_v18 = vpop.f32.mrb[26].mxu0  ;;  %v2932_v19 = vpop.f32.mrb[26].mxu1 }
 0x145   : > { %v1101_v21 = vmax.f32 %v1053_v12, 0.0  ;;  %v1455_v24 = vmax.f32 %v1407_v13, 0.0  ;;  %v1056_v25 = vadd.f32 %v2896_v18, %v3454_v6  ;;  %v1410_v31 = vadd.f32 %v2932_v19, %v3454_v6  ;;  %v1047_v32 = vpop.f32.mrb[27].mxu0  ;;  %v1401_v37 = vpop.f32.mrb[27].mxu1 }
 0x146   : > { %v1099_v38 = vmax.f32 %v1045_v16, 0.0  ;;  %v1453_v39 = vmax.f32 %v1399_v17, 0.0  ;;  %v1048_v40 = vadd.f32 %v3454_v6, %v1047_v32  ;;  %v1402_v41 = vadd.f32 %v3454_v6, %v1401_v37 }
 0x147   : > { %v3560_v42 = vmax.f32 %v1101_v21, %v1455_v24  ;;  %v1102_v43 = vmax.f32 %v1056_v25, 0.0  ;;  %v1456_v44 = vmax.f32 %v1410_v31, 0.0 }
 0x148   : > { %v3562_v45 = vmax.f32 %v1099_v38, %v1453_v39  ;;  %v1100_v46 = vmax.f32 %v1048_v40, 0.0  ;;  %v1454_v47 = vmax.f32 %v1402_v41, 0.0 }
 0x149   : > { %v3564_v48 = vmax.f32 %v1102_v43, %v1456_v44 }
 0x14a   : > { %v3566_v49 = vmax.f32 %v1100_v46, %v1454_v47  ;;  %v2899_v50 = vpop.f32.mrb[28].mxu0  ;;  %v2935_v51 = vpop.f32.mrb[28].mxu1 }
 0x14b   : > { %v1069_v53 = vadd.f32 %v2899_v50, %v3454_v6  ;;  %v1423_v54 = vadd.f32 %v2935_v51, %v3454_v6  ;;  %v1060_v57 = vpop.f32.mrb[29].mxu0  ;;  %v1414_v59 = vpop.f32.mrb[29].mxu1 }
 0x14c   : > { %v1061_v0 = vadd.f32 %v3454_v6, %v1060_v57  ;;  %v1415_v2 = vadd.f32 %v3454_v6, %v1414_v59  ;;  %v2900_v3 = vpop.f32.mrb[30].mxu0  ;;  %v2936_v5 = vpop.f32.mrb[30].mxu1 }
 0x14d   : > { %v1105_v7 = vmax.f32 %v1069_v53, 0.0  ;;  %v1459_v10 = vmax.f32 %v1423_v54, 0.0  ;;  %v1072_v11 = vadd.f32 %v2900_v3, %v3454_v6  ;;  %v1426_v12 = vadd.f32 %v2936_v5, %v3454_v6  ;;  %v1063_v13 = vpop.f32.mrb[31].mxu0  ;;  %v1417_v14 = vpop.f32.mrb[31].mxu1 }
 0x14e   : > { %v1103_v15 = vmax.f32 %v1061_v0, 0.0  ;;  %v1457_v16 = vmax.f32 %v1415_v2, 0.0  ;;  %v1064_v17 = vadd.f32 %v3454_v6, %v1063_v13  ;;  %v1418_v18 = vadd.f32 %v3454_v6, %v1417_v14 }
 0x14f   : > { %v3578_v19 = vmax.f32 %v1105_v7, %v1459_v10  ;;  %v1106_v21 = vmax.f32 %v1072_v11, 0.0  ;;  %v1460_v24 = vmax.f32 %v1426_v12, 0.0 }
 0x150   : > { %v3580_v25 = vmax.f32 %v1103_v15, %v1457_v16  ;;  %v1104_v31 = vmax.f32 %v1064_v17, 0.0  ;;  %v1458_v32 = vmax.f32 %v1418_v18, 0.0 }
 0x151   : > { %v3582_v37 = vmax.f32 %v1106_v21, %v1460_v24 }
 0x152   : > { %v3584_v38 = vmax.f32 %v1104_v31, %v1458_v32  ;;  %v2943_v39 = vpop.f32.mrb[32].mxu0  ;;  %v2979_v40 = vpop.f32.mrb[32].mxu1 }
 0x153   : > { %v1697_v41 = vadd.f32 %v2943_v39, %v3454_v6  ;;  %v2051_v43 = vadd.f32 %v2979_v40, %v3454_v6  ;;  %v1688_v44 = vpop.f32.mrb[33].mxu0  ;;  %v2042_v46 = vpop.f32.mrb[33].mxu1 }
 0x154   : > { %v1689_v47 = vadd.f32 %v3454_v6, %v1688_v44  ;;  %v2043_v50 = vadd.f32 %v3454_v6, %v2042_v46  ;;  %v2944_v51 = vpop.f32.mrb[34].mxu0  ;;  %v2980_v53 = vpop.f32.mrb[34].mxu1 }
 0x155   : > { %v1817_v54 = vmax.f32 %v1697_v41, 0.0  ;;  %v2171_v57 = vmax.f32 %v2051_v43, 0.0  ;;  %v1700_v59 = vadd.f32 %v2944_v51, %v3454_v6  ;;  %v2054_v0 = vadd.f32 %v2980_v53, %v3454_v6  ;;  %v1691_v2 = vpop.f32.mrb[35].mxu0  ;;  %v2045_v3 = vpop.f32.mrb[35].mxu1 }
 0x156   : > { %v1815_v5 = vmax.f32 %v1689_v47, 0.0  ;;  %v2169_v7 = vmax.f32 %v2043_v50, 0.0  ;;  %v1692_v10 = vadd.f32 %v3454_v6, %v1691_v2  ;;  %v2046_v11 = vadd.f32 %v3454_v6, %v2045_v3 }
 0x157   : > { %v2203_v12 = vmax.f32 %v1817_v54, %v2171_v57  ;;  %v1818_v13 = vmax.f32 %v1700_v59, 0.0  ;;  %v2172_v14 = vmax.f32 %v2054_v0, 0.0 }
 0x158   : > { %v2201_v15 = vmax.f32 %v1815_v5, %v2169_v7  ;;  %v1816_v16 = vmax.f32 %v1692_v10, 0.0  ;;  %v2170_v17 = vmax.f32 %v2046_v11, 0.0 }
 0x159   : > { %v2235_v18 = vmax.f32 %v3464_v27, %v2203_v12  ;;  %v2204_v21 = vmax.f32 %v1818_v13, %v2172_v14 }
 0x15a   : > { %v2233_v24 = vmax.f32 %v3466_v30, %v2201_v15  ;;  %v2202_v31 = vmax.f32 %v1816_v16, %v2170_v17  ;;  %v2947_v32 = vpop.f32.mrb[36].mxu0  ;;  %v2983_v39 = vpop.f32.mrb[36].mxu1 }
 0x15b   : > { %v2763_v40 = vpack.c.bf16 %v2235_v18, %v2235_v18  ;;  %v2236_v41 = vmax.f32 %v3468_v33, %v2204_v21  ;;  %v1713_v43 = vadd.f32 %v2947_v32, %v3454_v6  ;;  %v2067_v27 = vadd.f32 %v2983_v39, %v3454_v6  ;;  %v1704_v44 = vpop.f32.mrb[37].mxu0  ;;  %v2058_v46 = vpop.f32.mrb[37].mxu1 }
 0x15c   : > { %v2761_v47 = vpack.c.bf16 %v2233_v24, %v2233_v24  ;;  %v2234_v50 = vmax.f32 %v3470_v34, %v2202_v31  ;;  %v1705_v51 = vadd.f32 %v3454_v6, %v1704_v44  ;;  %v2059_v30 = vadd.f32 %v3454_v6, %v2058_v46  ;;  %v2948_v53 = vpop.f32.mrb[38].mxu0  ;;  %v2984_v54 = vpop.f32.mrb[38].mxu1 }
 0x15d   : > { %2396 = vst.msk [vmem:[%s3598_s14 + $0x8] sm:$0xf] %vm2393_vm3, %v2763_v40  ;;  %v2764_v33 = vpack.c.bf16 %v2236_v41, %v2236_v41  ;;  %v1821_v57 = vmax.f32 %v1713_v43, 0.0  ;;  %v2175_v59 = vmax.f32 %v2067_v27, 0.0  ;;  %v1716_v0 = vadd.f32 %v2948_v53, %v3454_v6  ;;  %v1707_v2 = vpop.f32.mrb[39].mxu0  ;;  %v2061_v3 = vpop.f32.mrb[39].mxu1 }
 0x15e   : > { %2394 = vst.msk [vmem:[%s3598_s14] sm:$0xf] %vm2393_vm3, %v2761_v47  ;;  %v2762_v34 = vpack.c.bf16 %v2234_v50, %v2234_v50  ;;  %v1819_v5 = vmax.f32 %v1705_v51, 0.0  ;;  %v2173_v7 = vmax.f32 %v2059_v30, 0.0  ;;  %v2070_v10 = vadd.f32 %v2984_v54, %v3454_v6 }
 0x15f   : > { %2397 = vst.msk [vmem:[%s3598_s14 + $0xc] sm:$0xf] %vm2393_vm3, %v2764_v33  ;;  %v2207_v11 = vmax.f32 %v1821_v57, %v2175_v59  ;;  %v1822_v12 = vmax.f32 %v1716_v0, 0.0  ;;  %v1708_v13 = vadd.f32 %v3454_v6, %v1707_v2  ;;  %v2062_v14 = vadd.f32 %v3454_v6, %v2061_v3 }
 0x160   : > { %2395 = vst.msk [vmem:[%s3598_s14 + $0x4] sm:$0xf] %vm2393_vm3, %v2762_v34  ;;  %v2205_v15 = vmax.f32 %v1819_v5, %v2173_v7  ;;  %v2176_v16 = vmax.f32 %v2070_v10, 0.0 }
 0x161   : > { %v2239_v17 = vmax.f32 %v3480_v55, %v2207_v11  ;;  %v1820_v18 = vmax.f32 %v1708_v13, 0.0  ;;  %v2174_v21 = vmax.f32 %v2062_v14, 0.0 }
 0x162   : > { %v2237_v24 = vmax.f32 %v3482_v58, %v2205_v15  ;;  %v2208_v31 = vmax.f32 %v1822_v12, %v2176_v16  ;;  %v2951_v32 = vpop.f32.mrb[40].mxu0  ;;  %v2987_v39 = vpop.f32.mrb[40].mxu1 }
 0x163   : > { %v2767_v40 = vpack.c.bf16 %v2239_v17, %v2239_v17  ;;  %v2206_v41 = vmax.f32 %v1820_v18, %v2174_v21  ;;  %v1729_v43 = vadd.f32 %v2951_v32, %v3454_v6  ;;  %v2083_v27 = vadd.f32 %v2987_v39, %v3454_v6  ;;  %v1720_v44 = vpop.f32.mrb[41].mxu0  ;;  %v2074_v46 = vpop.f32.mrb[41].mxu1 }
 0x164   : > { %v2765_v47 = vpack.c.bf16 %v2237_v24, %v2237_v24  ;;  %v2240_v55 = vmax.f32 %v3484_v61, %v2208_v31  ;;  %v1721_v50 = vadd.f32 %v3454_v6, %v1720_v44  ;;  %v2075_v58 = vadd.f32 %v3454_v6, %v2074_v46  ;;  %v2952_v51 = vpop.f32.mrb[42].mxu0  ;;  %v2988_v30 = vpop.f32.mrb[42].mxu1 }
 0x165   : > { %2400 = vst.msk [vmem:[%s3598_s14 + $0x18] sm:$0xf] %vm2393_vm3, %v2767_v40  ;;  %v2238_v53 = vmax.f32 %v3486_v62, %v2206_v41  ;;  %v1825_v54 = vmax.f32 %v1729_v43, 0.0  ;;  %v2179_v33 = vmax.f32 %v2083_v27, 0.0  ;;  %v1732_v57 = vadd.f32 %v2952_v51, %v3454_v6  ;;  %v1723_v59 = vpop.f32.mrb[43].mxu0  ;;  %v2077_v0 = vpop.f32.mrb[43].mxu1 }
 0x166   : > { %2398 = vst.msk [vmem:[%s3598_s14 + $0x10] sm:$0xf] %vm2393_vm3, %v2765_v47  ;;  %v2768_v61 = vpack.c.bf16 %v2240_v55, %v2240_v55  ;;  %v1823_v2 = vmax.f32 %v1721_v50, 0.0  ;;  %v2177_v3 = vmax.f32 %v2075_v58, 0.0  ;;  %v2086_v34 = vadd.f32 %v2988_v30, %v3454_v6 }
 0x167   : > { %v2766_v5 = vpack.c.bf16 %v2238_v53, %v2238_v53  ;;  %v2211_v7 = vmax.f32 %v1825_v54, %v2179_v33  ;;  %v1826_v10 = vmax.f32 %v1732_v57, 0.0  ;;  %v1724_v11 = vadd.f32 %v3454_v6, %v1723_v59 }
 0x168   : > { %2401 = vst.msk [vmem:[%s3598_s14 + $0x1c] sm:$0xf] %vm2393_vm3, %v2768_v61  ;;  %v2209_v62 = vmax.f32 %v1823_v2, %v2177_v3  ;;  %v2180_v12 = vmax.f32 %v2086_v34, 0.0  ;;  %v2078_v13 = vadd.f32 %v3454_v6, %v2077_v0 }
 0x169   : > { %2399 = vst.msk [vmem:[%s3598_s14 + $0x14] sm:$0xf] %vm2393_vm3, %v2766_v5  ;;  %v2243_v14 = vmax.f32 %v3496_v20, %v2211_v7  ;;  %v1824_v15 = vmax.f32 %v1724_v11, 0.0 }
 0x16a   : > { %v2241_v16 = vmax.f32 %v3498_v23, %v2209_v62  ;;  %v2212_v17 = vmax.f32 %v1826_v10, %v2180_v12  ;;  %v2178_v18 = vmax.f32 %v2078_v13, 0.0  ;;  %v2955_v21 = vpop.f32.mrb[44].mxu0  ;;  %v2991_v24 = vpop.f32.mrb[44].mxu1 }
 0x16b   : > { %v2771_v31 = vpack.c.bf16 %v2243_v14, %v2243_v14  ;;  %v1745_v32 = vadd.f32 %v2955_v21, %v3454_v6  ;;  %v2099_v39 = vadd.f32 %v2991_v24, %v3454_v6  ;;  %v1736_v40 = vpop.f32.mrb[45].mxu0  ;;  %v2090_v41 = vpop.f32.mrb[45].mxu1 }
 0x16c   : > { %v2769_v43 = vpack.c.bf16 %v2241_v16, %v2241_v16  ;;  %v2244_v27 = vmax.f32 %v3500_v26, %v2212_v17  ;;  %v2210_v20 = vmax.f32 %v1824_v15, %v2178_v18  ;;  %v1737_v44 = vadd.f32 %v3454_v6, %v1736_v40  ;;  %v2956_v23 = vpop.f32.mrb[46].mxu0  ;;  %v2992_v46 = vpop.f32.mrb[46].mxu1 }
 0x16d   : > { %2404 = vst.msk [vmem:[%s3598_s14 + $0x28] sm:$0xf] %vm2393_vm3, %v2771_v31  ;;  %v1829_v47 = vmax.f32 %v1745_v32, 0.0  ;;  %v2183_v55 = vmax.f32 %v2099_v39, 0.0  ;;  %v2091_v50 = vadd.f32 %v3454_v6, %v2090_v41  ;;  %v1748_v58 = vadd.f32 %v2956_v23, %v3454_v6  ;;  %v1739_v51 = vpop.f32.mrb[47].mxu0  ;;  %v2093_v30 = vpop.f32.mrb[47].mxu1 }
 0x16e   : > { %2402 = vst.msk [vmem:[%s3598_s14 + $0x20] sm:$0xf] %vm2393_vm3, %v2769_v43  ;;  %v2772_v26 = vpack.c.bf16 %v2244_v27, %v2244_v27  ;;  %v2242_v53 = vmax.f32 %v3502_v28, %v2210_v20  ;;  %v1827_v54 = vmax.f32 %v1737_v44, 0.0  ;;  %v2102_v33 = vadd.f32 %v2992_v46, %v3454_v6 }
 0x16f   : > { %v2215_v57 = vmax.f32 %v1829_v47, %v2183_v55  ;;  %v2181_v59 = vmax.f32 %v2091_v50, 0.0  ;;  %v1830_v0 = vmax.f32 %v1748_v58, 0.0  ;;  %v1740_v61 = vadd.f32 %v3454_v6, %v1739_v51 }
 0x170   : > { %2405 = vst.msk [vmem:[%s3598_s14 + $0x2c] sm:$0xf] %vm2393_vm3, %v2772_v26  ;;  %v2770_v2 = vpack.c.bf16 %v2242_v53, %v2242_v53  ;;  %v2184_v3 = vmax.f32 %v2102_v33, 0.0  ;;  %v2094_v34 = vadd.f32 %v3454_v6, %v2093_v30 }
 0x171   : > { %v2247_v5 = vmax.f32 %v3512_v52, %v2215_v57  ;;  %v2213_v7 = vmax.f32 %v1827_v54, %v2181_v59  ;;  %v1828_v10 = vmax.f32 %v1740_v61, 0.0 }
 0x172   : > { %2403 = vst.msk [vmem:[%s3598_s14 + $0x24] sm:$0xf] %vm2393_vm3, %v2770_v2  ;;  %v2216_v28 = vmax.f32 %v1830_v0, %v2184_v3  ;;  %v2182_v11 = vmax.f32 %v2094_v34, 0.0  ;;  %v2959_v62 = vpop.f32.mrb[48].mxu0  ;;  %v2995_v12 = vpop.f32.mrb[48].mxu1 }
 0x173   : > { %v2775_v13 = vpack.c.bf16 %v2247_v5, %v2247_v5  ;;  %v2245_v14 = vmax.f32 %v3514_v56, %v2213_v7  ;;  %v1761_v15 = vadd.f32 %v2959_v62, %v3454_v6  ;;  %v2115_v16 = vadd.f32 %v2995_v12, %v3454_v6  ;;  %v1752_v17 = vpop.f32.mrb[49].mxu0  ;;  %v2106_v18 = vpop.f32.mrb[49].mxu1 }
 0x174   : > { %v2248_v52 = vmax.f32 %v3516_v60, %v2216_v28  ;;  %v2214_v21 = vmax.f32 %v1828_v10, %v2182_v11  ;;  %v1753_v24 = vadd.f32 %v3454_v6, %v1752_v17  ;;  %v2107_v31 = vadd.f32 %v3454_v6, %v2106_v18  ;;  %v2960_v32 = vpop.f32.mrb[50].mxu0  ;;  %v2996_v39 = vpop.f32.mrb[50].mxu1 }
 0x175   : > { %2408 = vst.msk [vmem:[%s3598_s14 + $0x38] sm:$0xf] %vm2393_vm3, %v2775_v13  ;;  %v2773_v56 = vpack.c.bf16 %v2245_v14, %v2245_v14  ;;  %v1833_v40 = vmax.f32 %v1761_v15, 0.0  ;;  %v2187_v41 = vmax.f32 %v2115_v16, 0.0  ;;  %v1764_v43 = vadd.f32 %v2960_v32, %v3454_v6  ;;  %v1755_v27 = vpop.f32.mrb[51].mxu0  ;;  %v2109_v20 = vpop.f32.mrb[51].mxu1 }
 0x176   : > { %v2776_v44 = vpack.c.bf16 %v2248_v52, %v2248_v52  ;;  %v2246_v60 = vmax.f32 %v3518_v63, %v2214_v21  ;;  %v1831_v23 = vmax.f32 %v1753_v24, 0.0  ;;  %v2185_v46 = vmax.f32 %v2107_v31, 0.0 }
 0x177   : > { %2406 = vst.msk [vmem:[%s3598_s14 + $0x30] sm:$0xf] %vm2393_vm3, %v2773_v56  ;;  %v2219_v47 = vmax.f32 %v1833_v40, %v2187_v41  ;;  %v1834_v55 = vmax.f32 %v1764_v43, 0.0  ;;  %v2118_v50 = vadd.f32 %v2996_v39, %v3454_v6  ;;  %v1756_v58 = vadd.f32 %v3454_v6, %v1755_v27 }
 0x178   : > { %2409 = vst.msk [vmem:[%s3598_s14 + $0x3c] sm:$0xf] %vm2393_vm3, %v2776_v44  ;;  %v2774_v51 = vpack.c.bf16 %v2246_v60, %v2246_v60  ;;  %v2217_v30 = vmax.f32 %v1831_v23, %v2185_v46  ;;  %v2110_v26 = vadd.f32 %v3454_v6, %v2109_v20 }
 0x179   : > { %v2251_v53 = vmax.f32 %v3528_v22, %v2219_v47  ;;  %v2188_v54 = vmax.f32 %v2118_v50, 0.0  ;;  %v1832_v63 = vmax.f32 %v1756_v58, 0.0 }
 0x17a   : > { %2407 = vst.msk [vmem:[%s3598_s14 + $0x34] sm:$0xf] %vm2393_vm3, %v2774_v51  ;;  %v2249_v33 = vmax.f32 %v3530_v29, %v2217_v30  ;;  %v2186_v57 = vmax.f32 %v2110_v26, 0.0  ;;  %v2963_v59 = vpop.f32.mrb[52].mxu0  ;;  %v2999_v0 = vpop.f32.mrb[52].mxu1 }
 0x17b   : > { %v2779_v61 = vpack.c.bf16 %v2251_v53, %v2251_v53  ;;  %v2220_v2 = vmax.f32 %v1834_v55, %v2188_v54  ;;  %v1777_v3 = vadd.f32 %v2963_v59, %v3454_v6  ;;  %v2131_v34 = vadd.f32 %v2999_v0, %v3454_v6  ;;  %v1768_v5 = vpop.f32.mrb[53].mxu0  ;;  %v2122_v7 = vpop.f32.mrb[53].mxu1 }
 0x17c   : > { %v2777_v22 = vpack.c.bf16 %v2249_v33, %v2249_v33  ;;  %v2218_v10 = vmax.f32 %v1832_v63, %v2186_v57  ;;  %v1769_v28 = vadd.f32 %v3454_v6, %v1768_v5  ;;  %v2123_v11 = vadd.f32 %v3454_v6, %v2122_v7  ;;  %v2964_v29 = vpop.f32.mrb[54].mxu0  ;;  %v3000_v62 = vpop.f32.mrb[54].mxu1 }
 0x17d   : > { %2412 = vst.msk [vmem:[%s3598_s14 + $0x48] sm:$0xf] %vm2393_vm3, %v2779_v61  ;;  %v2252_v12 = vmax.f32 %v3532_v35, %v2220_v2  ;;  %v1837_v13 = vmax.f32 %v1777_v3, 0.0  ;;  %v2191_v14 = vmax.f32 %v2131_v34, 0.0  ;;  %v1780_v15 = vadd.f32 %v2964_v29, %v3454_v6  ;;  %v1771_v16 = vpop.f32.mrb[55].mxu0  ;;  %v2125_v17 = vpop.f32.mrb[55].mxu1 }
 0x17e   : > { %2410 = vst.msk [vmem:[%s3598_s14 + $0x40] sm:$0xf] %vm2393_vm3, %v2777_v22  ;;  %v2250_v18 = vmax.f32 %v3534_v36, %v2218_v10  ;;  %v1835_v52 = vmax.f32 %v1769_v28, 0.0  ;;  %v2189_v21 = vmax.f32 %v2123_v11, 0.0  ;;  %v2134_v24 = vadd.f32 %v3000_v62, %v3454_v6 }
 0x17f   : > { %v2780_v31 = vpack.c.bf16 %v2252_v12, %v2252_v12  ;;  %v2223_v32 = vmax.f32 %v1837_v13, %v2191_v14  ;;  %v1838_v39 = vmax.f32 %v1780_v15, 0.0  ;;  %v1772_v35 = vadd.f32 %v3454_v6, %v1771_v16 }
 0x180   : > { %v2778_v56 = vpack.c.bf16 %v2250_v18, %v2250_v18  ;;  %v2221_v40 = vmax.f32 %v1835_v52, %v2189_v21  ;;  %v2192_v41 = vmax.f32 %v2134_v24, 0.0  ;;  %v2126_v43 = vadd.f32 %v3454_v6, %v2125_v17 }
 0x181   : > { %2413 = vst.msk [vmem:[%s3598_s14 + $0x4c] sm:$0xf] %vm2393_vm3, %v2780_v31  ;;  %v2255_v27 = vmax.f32 %v3544_v1, %v2223_v32  ;;  %v1836_v20 = vmax.f32 %v1772_v35, 0.0 }
 0x182   : > { %2411 = vst.msk [vmem:[%s3598_s14 + $0x44] sm:$0xf] %vm2393_vm3, %v2778_v56  ;;  %v2253_v36 = vmax.f32 %v3546_v4, %v2221_v40  ;;  %v2224_v44 = vmax.f32 %v1838_v39, %v2192_v41  ;;  %v2190_v60 = vmax.f32 %v2126_v43, 0.0  ;;  %v2967_v23 = vpop.f32.mrb[56].mxu0  ;;  %v3003_v46 = vpop.f32.mrb[56].mxu1 }
 0x183   : > { %v2783_v47 = vpack.c.bf16 %v2255_v27, %v2255_v27  ;;  %v1793_v55 = vadd.f32 %v2967_v23, %v3454_v6  ;;  %v2147_v50 = vadd.f32 %v3003_v46, %v3454_v6  ;;  %v1784_v58 = vpop.f32.mrb[57].mxu0  ;;  %v2138_v51 = vpop.f32.mrb[57].mxu1  ;;  %v3100_v27 = vld [vmem:[%s3762_s2] ss:$0 sm:$0xff] }
 0x184   : > { %v2781_v30 = vpack.c.bf16 %v2253_v36, %v2253_v36  ;;  %v2256_v1 = vmax.f32 %v3548_v8, %v2224_v44  ;;  %v2222_v26 = vmax.f32 %v1836_v20, %v2190_v60  ;;  %v1785_v53 = vadd.f32 %v3454_v6, %v1784_v58  ;;  %v2968_v4 = vpop.f32.mrb[58].mxu0  ;;  %v3004_v54 = vpop.f32.mrb[58].mxu1 }
 0x185   : > { %2416 = vst.msk [vmem:[%s3598_s14 + $0x58] sm:$0xf] %vm2393_vm3, %v2783_v47  ;;  %v1841_v63 = vmax.f32 %v1793_v55, 0.0  ;;  %v2195_v33 = vmax.f32 %v2147_v50, 0.0  ;;  %v2139_v57 = vadd.f32 %v3454_v6, %v2138_v51  ;;  %v1796_v59 = vadd.f32 %v2968_v4, %v3454_v6  ;;  %v1787_v0 = vpop.f32.mrb[59].mxu0  ;;  %v2141_v61 = vpop.f32.mrb[59].mxu1 }
 0x186   : > { %2414 = vst.msk [vmem:[%s3598_s14 + $0x50] sm:$0xf] %vm2393_vm3, %v2781_v30  ;;  %v2784_v8 = vpack.c.bf16 %v2256_v1, %v2256_v1  ;;  %v2254_v2 = vmax.f32 %v3550_v9, %v2222_v26  ;;  %v1839_v3 = vmax.f32 %v1785_v53, 0.0  ;;  %v2150_v34 = vadd.f32 %v3004_v54, %v3454_v6 }
 0x187   : > { %v2227_v5 = vmax.f32 %v1841_v63, %v2195_v33  ;;  %v2193_v7 = vmax.f32 %v2139_v57, 0.0  ;;  %v1842_v22 = vmax.f32 %v1796_v59, 0.0  ;;  %v1788_v10 = vadd.f32 %v3454_v6, %v1787_v0 }
 0x188   : > { %2417 = vst.msk [vmem:[%s3598_s14 + $0x5c] sm:$0xf] %vm2393_vm3, %v2784_v8  ;;  %v2782_v28 = vpack.c.bf16 %v2254_v2, %v2254_v2  ;;  %v2196_v11 = vmax.f32 %v2150_v34, 0.0  ;;  %v2142_v29 = vadd.f32 %v3454_v6, %v2141_v61 }
 0x189   : > { %v2259_v62 = vmax.f32 %v3560_v42, %v2227_v5  ;;  %v2225_v12 = vmax.f32 %v1839_v3, %v2193_v7  ;;  %v1840_v13 = vmax.f32 %v1788_v10, 0.0 }
 0x18a   : > { %2415 = vst.msk [vmem:[%s3598_s14 + $0x54] sm:$0xf] %vm2393_vm3, %v2782_v28  ;;  %v2228_v9 = vmax.f32 %v1842_v22, %v2196_v11  ;;  %v2194_v14 = vmax.f32 %v2142_v29, 0.0  ;;  %v2971_v15 = vpop.f32.mrb[60].mxu0  ;;  %v3007_v16 = vpop.f32.mrb[60].mxu1 }
 0x18b   : > { %v2787_v17 = vpack.c.bf16 %v2259_v62, %v2259_v62  ;;  %v2257_v18 = vmax.f32 %v3562_v45, %v2225_v12  ;;  %v1809_v52 = vadd.f32 %v2971_v15, %v3454_v6  ;;  %v2163_v21 = vadd.f32 %v3007_v16, %v3454_v6  ;;  %v1800_v24 = vpop.f32.mrb[61].mxu0  ;;  %v2154_v31 = vpop.f32.mrb[61].mxu1 }
 0x18c   : > { %v2260_v42 = vmax.f32 %v3564_v48, %v2228_v9  ;;  %v2226_v32 = vmax.f32 %v1840_v13, %v2194_v14  ;;  %v1801_v39 = vadd.f32 %v3454_v6, %v1800_v24  ;;  %v2155_v35 = vadd.f32 %v3454_v6, %v2154_v31  ;;  %v2972_v56 = vpop.f32.mrb[62].mxu0  ;;  %v3008_v40 = vpop.f32.mrb[62].mxu1 }
 0x18d   : > { %2420 = vst.msk [vmem:[%s3598_s14 + $0x68] sm:$0xf] %vm2393_vm3, %v2787_v17  ;;  %v2785_v41 = vpack.c.bf16 %v2257_v18, %v2257_v18  ;;  %v1845_v45 = vmax.f32 %v1809_v52, 0.0  ;;  %v2199_v43 = vmax.f32 %v2163_v21, 0.0  ;;  %v1812_v20 = vadd.f32 %v3100_v27, %v2972_v56  ;;  %v1803_v48 = vpop.f32.mrb[63].mxu0  ;;  %v2157_v36 = vpop.f32.mrb[63].mxu1 }
 0x18e   : > { %v2788_v44 = vpack.c.bf16 %v2260_v42, %v2260_v42  ;;  %v2258_v60 = vmax.f32 %v3566_v49, %v2226_v32  ;;  %v1843_v6 = vmax.f32 %v1801_v39, 0.0  ;;  %v2197_v23 = vmax.f32 %v2155_v35, 0.0 }
 0x18f   : > { %2418 = vst.msk [vmem:[%s3598_s14 + $0x60] sm:$0xf] %vm2393_vm3, %v2785_v41  ;;  %v2231_v46 = vmax.f32 %v1845_v45, %v2199_v43  ;;  %v1846_v47 = vmax.f32 %v1812_v20, 0.0  ;;  %v2166_v55 = vadd.f32 %v3100_v27, %v3008_v40  ;;  %v1804_v50 = vadd.f32 %v3100_v27, %v1803_v48 }
 0x190   : > { %2421 = vst.msk [vmem:[%s3598_s14 + $0x6c] sm:$0xf] %vm2393_vm3, %v2788_v44  ;;  %v2786_v58 = vpack.c.bf16 %v2258_v60, %v2258_v60  ;;  %v2229_v51 = vmax.f32 %v1843_v6, %v2197_v23  ;;  %v2158_v30 = vadd.f32 %v3100_v27, %v2157_v36 }
 0x191   : > { %v2263_v1 = vmax.f32 %v3578_v19, %v2231_v46  ;;  %v2200_v26 = vmax.f32 %v2166_v55, 0.0  ;;  %v1844_v49 = vmax.f32 %v1804_v50, 0.0 }
 0x192   : > { %2419 = vst.msk [vmem:[%s3598_s14 + $0x64] sm:$0xf] %vm2393_vm3, %v2786_v58  ;;  %v2261_v53 = vmax.f32 %v3580_v25, %v2229_v51  ;;  %v2198_v4 = vmax.f32 %v2158_v30, 0.0 }
 0x193   : > { %v2791_v54 = vpack.c.bf16 %v2263_v1, %v2263_v1  ;;  %v2232_v63 = vmax.f32 %v1846_v47, %v2200_v26 }
 0x194   : > { %v2789_v33 = vpack.c.bf16 %v2261_v53, %v2261_v53  ;;  %v2230_v57 = vmax.f32 %v1844_v49, %v2198_v4 }
 0x195   : > { %2424 = vst.msk [vmem:[%s3598_s14 + $0x78] sm:$0xf] %vm2393_vm3, %v2791_v54  ;;  %v2264_v59 = vmax.f32 %v3582_v37, %v2232_v63 }
 0x196   : > { %2422 = vst.msk [vmem:[%s3598_s14 + $0x70] sm:$0xf] %vm2393_vm3, %v2789_v33  ;;  %v2262_v19 = vmax.f32 %v3584_v38, %v2230_v57 }
 0x197   : > { %v2792_v0 = vpack.c.bf16 %v2264_v59, %v2264_v59 }
 0x198   : > { %v2790_v61 = vpack.c.bf16 %v2262_v19, %v2262_v19 }
 0x199   : > { %2425 = vst.msk [vmem:[%s3598_s14 + $0x7c] sm:$0xf] %vm2393_vm3, %v2792_v0 }
 0x19a   : > { %2423 = vst.msk [vmem:[%s3598_s14 + $0x74] sm:$0xf] %vm2393_vm3, %v2790_v61 }
 0x19b PF: > { %p10_p9 = scmp.ge.s32.totalorder %s3163_s16, 4   ;;  %s3764_s12 = smov %s3119_s13 }
 0x19c   : > { %s3765_s13 = smov %s3172_s19  ;;  %s3766_s14 = smov %s3163_s16 }
 0x19d   :  { %12 = sbr.rel (!%p10_p9) target bundleno = 2 (0x2), region = 111 }

// kernel: cnn_forward.4
= control target key start
LH: loop header
LB: loop body
LE: loop exit
PB: predicated region body
PF: predicated region fallthrough
CT: control target
= control target key end

     0   :  { %v1423_v0 = vmov 0   ;;  %vm182_vm0 = vcmask 130048   ;;  %vm1110_vm1 = vcmask 257024   ;;  %s1960_s1 = inlined_call_operand.vmem [shape: bf16[144,32], index: 1, kind: input, shape index: {}]   ;;  %s1961_s0 = inlined_call_operand.vmem [shape: bf16[4,128,144], index: 0, kind: input, shape index: {}]   ;;  %s1962_s2 = inlined_call_operand.vmem [shape: f32[1,32], index: 2, kind: input, shape index: {}]   ;;  %s1963_s3 = inlined_call_operand.vmem [shape: bf16[128,32], index: 3, kind: output, shape index: {}]  }
   0x1   :  { %207 = vmatprep.subr.bf16.mxu0 %v1423_v0  ;;  %433 = vmatprep.subr.bf16.mxu1 %v1423_v0  ;;  %v1318_v1 = vld [vmem:[%s1960_s1] sm:$0xff]   ;;  %v1452_v2 = vld [vmem:[%s1960_s1 + $0x8] sm:$0xff]   ;;  %v1461_v3 = vld [vmem:[%s1960_s1 + $0x10] sm:$0xff]  }
   0x2   :  { %208 = vmatpush1.bf16.msra.mxu0 %v1318_v1  ;;  %434 = vmatpush1.bf16.msra.mxu1 %v1318_v1  ;;  %v1468_v4 = vld [vmem:[%s1960_s1 + $0x18] sm:$0xff]   ;;  %v1329_v5 = vld [vmem:[%s1961_s0 + $0x4] ss:$8 sps:$4 sm:$0xff]   ;;  %v1505_v9 = vld [vmem:[%s1960_s1 + $0x30] sm:$0xff]  }
   0x3   :  { %209 = vmatprep.subr.bf16.mxu0 %v1423_v0  ;;  %435 = vmatprep.subr.bf16.mxu1 %v1423_v0  ;;  %v1332_v6 = vld [vmem:[%s1961_s0 + $0x84] ss:$8 sps:$4 sm:$0xff]   ;;  %v1514_v10 = vld [vmem:[%s1960_s1 + $0x38] sm:$0xff]   ;;  %v1327_v12 = vld [vmem:[%s1961_s0] ss:$8 sps:$4 sm:$0xff]  }
   0x4   :  { %1157 = vmatprep.mubr.msk.bf16.mxu0 %vm182_vm0, %v1329_v5  ;;  %1197 = vmatprep.mubr.msk.bf16.mxu1 %vm182_vm0, %v1332_v6  ;;  %v1487_v7 = vld [vmem:[%s1960_s1 + $0x20] sm:$0xff]   ;;  %v1496_v8 = vld [vmem:[%s1960_s1 + $0x28] sm:$0xff]   ;;  %v1333_v14 = vld [vmem:[%s1961_s0 + $0x14] ss:$8 sps:$4 sm:$0xff]  }
   0x5   :  { %v1523_v11 = vld [vmem:[%s1960_s1 + $0x40] sm:$0xff]   ;;  %v1335_v15 = vld [vmem:[%s1961_s0 + $0x94] ss:$8 sps:$4 sm:$0xff]   ;;  %v1337_v16 = vld [vmem:[%s1961_s0 + $0x10] ss:$8 sps:$4 sm:$0xff]  }
   0x6   :  { %210 = vmatpush1.bf16.msra.mxu0 %v1452_v2  ;;  %436 = vmatpush1.bf16.msra.mxu1 %v1452_v2  ;;  %v1330_v13 = vld [vmem:[%s1961_s0 + $0x80] ss:$8 sps:$4 sm:$0xff]   ;;  %v1338_v17 = vld [vmem:[%s1961_s0 + $0x90] ss:$8 sps:$4 sm:$0xff]   ;;  %v1339_v18 = vld [vmem:[%s1961_s0 + $0x24] ss:$8 sps:$4 sm:$0xff]  }
   0x7   :  { %211 = vmatprep.subr.bf16.mxu0 %v1423_v0  ;;  %437 = vmatprep.subr.bf16.mxu1 %v1423_v0  ;;  %v1341_v19 = vld [vmem:[%s1961_s0 + $0xa4] ss:$8 sps:$4 sm:$0xff]   ;;  %v1343_v20 = vld [vmem:[%s1961_s0 + $0x20] ss:$8 sps:$4 sm:$0xff]   ;;  %v1345_v22 = vld [vmem:[%s1961_s0 + $0x34] ss:$8 sps:$4 sm:$0xff]  }
   0x8   :  { %v1344_v21 = vld [vmem:[%s1961_s0 + $0xa0] ss:$8 sps:$4 sm:$0xff]   ;;  %v1347_v23 = vld [vmem:[%s1961_s0 + $0xb4] ss:$8 sps:$4 sm:$0xff]   ;;  %v1349_v24 = vld [vmem:[%s1961_s0 + $0x30] ss:$8 sps:$4 sm:$0xff]  }
   0x9   :  { %v1350_v25 = vld [vmem:[%s1961_s0 + $0xb0] ss:$8 sps:$4 sm:$0xff]   ;;  %v1351_v26 = vld [vmem:[%s1961_s0 + $0x44] ss:$8 sps:$4 sm:$0xff]   ;;  %v1355_v28 = vld [vmem:[%s1961_s0 + $0x40] ss:$8 sps:$4 sm:$0xff]  }
   0xa   :  { %212 = vmatpush1.bf16.msra.mxu0 %v1461_v3  ;;  %438 = vmatpush1.bf16.msra.mxu1 %v1461_v3  ;;  %v1353_v27 = vld [vmem:[%s1961_s0 + $0xc4] ss:$8 sps:$4 sm:$0xff]   ;;  %v1356_v29 = vld [vmem:[%s1961_s0 + $0xc0] ss:$8 sps:$4 sm:$0xff]   ;;  %v1357_v30 = vld [vmem:[%s1961_s0 + $0x54] ss:$8 sps:$4 sm:$0xff]  }
   0xb   :  { %213 = vmatprep.subr.bf16.mxu0 %v1423_v0  ;;  %439 = vmatprep.subr.bf16.mxu1 %v1423_v0  ;;  %v1359_v31 = vld [vmem:[%s1961_s0 + $0xd4] ss:$8 sps:$4 sm:$0xff]   ;;  %v1361_v32 = vld [vmem:[%s1961_s0 + $0x50] ss:$8 sps:$4 sm:$0xff]   ;;  %v1363_v34 = vld [vmem:[%s1961_s0 + $0x64] ss:$8 sps:$4 sm:$0xff]  }
   0xc   :  { %v1362_v33 = vld [vmem:[%s1961_s0 + $0xd0] ss:$8 sps:$4 sm:$0xff]   ;;  %v1365_v35 = vld [vmem:[%s1961_s0 + $0xe4] ss:$8 sps:$4 sm:$0xff]   ;;  %v1367_v36 = vld [vmem:[%s1961_s0 + $0x60] ss:$8 sps:$4 sm:$0xff]  }
   0xd   :  { %v1368_v37 = vld [vmem:[%s1961_s0 + $0xe0] ss:$8 sps:$4 sm:$0xff]   ;;  %v1369_v38 = vld [vmem:[%s1961_s0 + $0x74] ss:$8 sps:$4 sm:$0xff]   ;;  %v1373_v40 = vld [vmem:[%s1961_s0 + $0x70] ss:$8 sps:$4 sm:$0xff]  }
   0xe   :  { %214 = vmatpush1.bf16.msra.mxu0 %v1468_v4  ;;  %440 = vmatpush1.bf16.msra.mxu1 %v1468_v4  ;;  %v1371_v39 = vld [vmem:[%s1961_s0 + $0xf4] ss:$8 sps:$4 sm:$0xff]   ;;  %v1374_v41 = vld [vmem:[%s1961_s0 + $0xf0] ss:$8 sps:$4 sm:$0xff]   ;;  %v1377_v42 = vld [vmem:[%s1961_s0 + $0x104] ss:$8 sps:$4 sm:$0xff]  }
   0xf   :  { %215 = vmatprep.subr.bf16.mxu0 %v1423_v0  ;;  %441 = vmatprep.subr.bf16.mxu1 %v1423_v0  ;;  %v1380_v43 = vld [vmem:[%s1961_s0 + $0x184] ss:$8 sps:$4 sm:$0xff]   ;;  %v1375_v44 = vld [vmem:[%s1961_s0 + $0x100] ss:$8 sps:$4 sm:$0xff]   ;;  %v1381_v46 = vld [vmem:[%s1961_s0 + $0x114] ss:$8 sps:$4 sm:$0xff]  }
  0x10   :  { %v1378_v45 = vld [vmem:[%s1961_s0 + $0x180] ss:$8 sps:$4 sm:$0xff]   ;;  %v1383_v47 = vld [vmem:[%s1961_s0 + $0x194] ss:$8 sps:$4 sm:$0xff]   ;;  %v1385_v48 = vld [vmem:[%s1961_s0 + $0x110] ss:$8 sps:$4 sm:$0xff]  }
  0x11   :  { %v1386_v49 = vld [vmem:[%s1961_s0 + $0x190] ss:$8 sps:$4 sm:$0xff]   ;;  %v1387_v50 = vld [vmem:[%s1961_s0 + $0x124] ss:$8 sps:$4 sm:$0xff]   ;;  %v1391_v52 = vld [vmem:[%s1961_s0 + $0x120] ss:$8 sps:$4 sm:$0xff]  }
  0x12   :  { %216 = vmatpush1.bf16.msra.mxu0 %v1487_v7  ;;  %442 = vmatpush1.bf16.msra.mxu1 %v1487_v7  ;;  %v1389_v51 = vld [vmem:[%s1961_s0 + $0x1a4] ss:$8 sps:$4 sm:$0xff]   ;;  %v1392_v53 = vld [vmem:[%s1961_s0 + $0x1a0] ss:$8 sps:$4 sm:$0xff]   ;;  %v1393_v54 = vld [vmem:[%s1961_s0 + $0x134] ss:$8 sps:$4 sm:$0xff]  }
  0x13   :  { %217 = vmatprep.subr.bf16.mxu0 %v1423_v0  ;;  %443 = vmatprep.subr.bf16.mxu1 %v1423_v0  ;;  %v1395_v55 = vld [vmem:[%s1961_s0 + $0x1b4] ss:$8 sps:$4 sm:$0xff]   ;;  %v1397_v56 = vld [vmem:[%s1961_s0 + $0x130] ss:$8 sps:$4 sm:$0xff]   ;;  %v1399_v58 = vld [vmem:[%s1961_s0 + $0x144] ss:$8 sps:$4 sm:$0xff]  }
  0x14   :  { %v1398_v57 = vld [vmem:[%s1961_s0 + $0x1b0] ss:$8 sps:$4 sm:$0xff]   ;;  %v1401_v59 = vld [vmem:[%s1961_s0 + $0x1c4] ss:$8 sps:$4 sm:$0xff]   ;;  %v1403_v60 = vld [vmem:[%s1961_s0 + $0x140] ss:$8 sps:$4 sm:$0xff]  }
  0x15   :  { %v1404_v61 = vld [vmem:[%s1961_s0 + $0x1c0] ss:$8 sps:$4 sm:$0xff]   ;;  %v1405_v62 = vld [vmem:[%s1961_s0 + $0x154] ss:$8 sps:$4 sm:$0xff]  }
  0x16   :  { %218 = vmatpush1.bf16.msra.mxu0 %v1496_v8  ;;  %444 = vmatpush1.bf16.msra.mxu1 %v1496_v8  ;;  %v1407_v63 = vld [vmem:[%s1961_s0 + $0x1d4] ss:$8 sps:$4 sm:$0xff]   ;;  %v1416_v5 = vld [vmem:[%s1961_s0 + $0x1e0] ss:$8 sps:$4 sm:$0xff]  }
  0x17   :  { %219 = vmatprep.subr.bf16.mxu0 %v1423_v0  ;;  %445 = vmatprep.subr.bf16.mxu1 %v1423_v0  ;;  %v1417_v6 = vld [vmem:[%s1961_s0 + $0x174] ss:$8 sps:$4 sm:$0xff]  }
  0x1a   :  { %220 = vmatpush1.bf16.msra.mxu0 %v1505_v9  ;;  %446 = vmatpush1.bf16.msra.mxu1 %v1505_v9 }
  0x1b   :  { %221 = vmatprep.subr.bf16.mxu0 %v1423_v0  ;;  %447 = vmatprep.subr.bf16.mxu1 %v1423_v0 }
  0x1e   :  { %222 = vmatpush1.bf16.msra.mxu0 %v1514_v10  ;;  %448 = vmatpush1.bf16.msra.mxu1 %v1514_v10 }
  0x1f   :  { %223 = vmatprep.subr.bf16.mxu0 %v1423_v0  ;;  %449 = vmatprep.subr.bf16.mxu1 %v1423_v0 }
  0x22   :  { %224 = vmatpush1.bf16.msra.mxu0 %v1523_v11  ;;  %450 = vmatpush1.bf16.msra.mxu1 %v1523_v11 }
  0x23   :  { %675 = vmatprep.subr.bf16.mxu0 %v1423_v0  ;;  %901 = vmatprep.subr.bf16.mxu1 %v1423_v0 }
  0x25   :  { %240 = vmatmul.mubr.bf16.vlgmr.msra.gmra.mrb[0].mxu0 %v1327_v12  ;;  %466 = vmatmul.mubr.bf16.vlgmr.msra.gmra.mrb[0].mxu1 %v1330_v13 }
  0x26   :  { %676 = vmatpush1.bf16.msra.mxu0 %v1318_v1  ;;  %902 = vmatpush1.bf16.msra.mxu1 %v1318_v1  ;;  %v1410_v1 = vld [vmem:[%s1961_s0 + $0x1d0] ss:$8 sps:$4 sm:$0xff]  }
  0x27   :  { %1158 = vmatprep.mubr.msk.bf16.mxu0 %vm182_vm0, %v1333_v14  ;;  %1198 = vmatprep.mubr.msk.bf16.mxu1 %vm182_vm0, %v1335_v15 }
  0x28   :  { %677 = vmatprep.subr.bf16.mxu0 %v1423_v0  ;;  %903 = vmatprep.subr.bf16.mxu1 %v1423_v0 }
  0x2a   :  { %678 = vmatpush1.bf16.msra.mxu0 %v1452_v2  ;;  %904 = vmatpush1.bf16.msra.mxu1 %v1452_v2  ;;  %v1411_v2 = vld [vmem:[%s1961_s0 + $0x164] ss:$8 sps:$4 sm:$0xff]  }
  0x2b   :  { %679 = vmatprep.subr.bf16.mxu0 %v1423_v0  ;;  %905 = vmatprep.subr.bf16.mxu1 %v1423_v0 }
  0x2d   :  { %248 = vmatmul.mubr.bf16.gmra.mrb[4].mxu0 %v1337_v16  ;;  %474 = vmatmul.mubr.bf16.gmra.mrb[4].mxu1 %v1338_v17 }
  0x2e   :  { %1159 = vmatprep.mubr.msk.bf16.mxu0 %vm182_vm0, %v1339_v18  ;;  %1199 = vmatprep.mubr.msk.bf16.mxu1 %vm182_vm0, %v1341_v19 }
  0x2f   :  { %680 = vmatpush1.bf16.msra.mxu0 %v1461_v3  ;;  %906 = vmatpush1.bf16.msra.mxu1 %v1461_v3  ;;  %v1413_v3 = vld [vmem:[%s1961_s0 + $0x1e4] ss:$8 sps:$4 sm:$0xff]  }
  0x30   :  { %681 = vmatprep.subr.bf16.mxu0 %v1423_v0  ;;  %907 = vmatprep.subr.bf16.mxu1 %v1423_v0 }
  0x33   :  { %682 = vmatpush1.bf16.msra.mxu0 %v1468_v4  ;;  %908 = vmatpush1.bf16.msra.mxu1 %v1468_v4  ;;  %v1415_v4 = vld [vmem:[%s1961_s0 + $0x160] ss:$8 sps:$4 sm:$0xff]  }
  0x34   :  { %683 = vmatprep.subr.bf16.mxu0 %v1423_v0  ;;  %909 = vmatprep.subr.bf16.mxu1 %v1423_v0 }
  0x35   :  { %256 = vmatmul.mubr.bf16.gmra.mrb[8].mxu0 %v1343_v20  ;;  %482 = vmatmul.mubr.bf16.gmra.mrb[8].mxu1 %v1344_v21 }
  0x36   :  { %1160 = vmatprep.mubr.msk.bf16.mxu0 %vm182_vm0, %v1345_v22  ;;  %1200 = vmatprep.mubr.msk.bf16.mxu1 %vm182_vm0, %v1347_v23 }
  0x37   :  { %684 = vmatpush1.bf16.msra.mxu0 %v1487_v7  ;;  %910 = vmatpush1.bf16.msra.mxu1 %v1487_v7  ;;  %v1419_v7 = vld [vmem:[%s1961_s0 + $0x1f4] ss:$8 sps:$4 sm:$0xff]  }
  0x38   :  { %685 = vmatprep.subr.bf16.mxu0 %v1423_v0  ;;  %911 = vmatprep.subr.bf16.mxu1 %v1423_v0 }
  0x3b   :  { %686 = vmatpush1.bf16.msra.mxu0 %v1496_v8  ;;  %912 = vmatpush1.bf16.msra.mxu1 %v1496_v8  ;;  %v1421_v8 = vld [vmem:[%s1961_s0 + $0x170] ss:$8 sps:$4 sm:$0xff]  }
  0x3c   :  { %687 = vmatprep.subr.bf16.mxu0 %v1423_v0  ;;  %913 = vmatprep.subr.bf16.mxu1 %v1423_v0 }
  0x3d   :  { %264 = vmatmul.mubr.bf16.gmra.mrb[12].mxu0 %v1349_v24  ;;  %490 = vmatmul.mubr.bf16.gmra.mrb[12].mxu1 %v1350_v25 }
  0x3e   :  { %1161 = vmatprep.mubr.msk.bf16.mxu0 %vm182_vm0, %v1351_v26  ;;  %1201 = vmatprep.mubr.msk.bf16.mxu1 %vm182_vm0, %v1353_v27 }
  0x3f   :  { %688 = vmatpush1.bf16.msra.mxu0 %v1505_v9  ;;  %914 = vmatpush1.bf16.msra.mxu1 %v1505_v9  ;;  %v1422_v9 = vld [vmem:[%s1961_s0 + $0x1f0] ss:$8 sps:$4 sm:$0xff]  }
  0x40   :  { %689 = vmatprep.subr.bf16.mxu0 %v1423_v0  ;;  %915 = vmatprep.subr.bf16.mxu1 %v1423_v0 }
  0x43   :  { %690 = vmatpush1.bf16.msra.mxu0 %v1514_v10  ;;  %916 = vmatpush1.bf16.msra.mxu1 %v1514_v10  ;;  %v1782_v10 = vld [vmem:[%s1962_s2] ss:$0 sm:$0xff] }
  0x44   :  { %691 = vmatprep.subr.bf16.mxu0 %v1423_v0  ;;  %917 = vmatprep.subr.bf16.mxu1 %v1423_v0  ;;  %v1409_v0 = vld [vmem:[%s1961_s0 + $0x150] ss:$8 sps:$4 sm:$0xff]  }
  0x45   :  { %272 = vmatmul.mubr.bf16.gmra.mrb[16].mxu0 %v1355_v28  ;;  %498 = vmatmul.mubr.bf16.gmra.mrb[16].mxu1 %v1356_v29 }
  0x46   :  { %1162 = vmatprep.mubr.msk.bf16.mxu0 %vm182_vm0, %v1357_v30  ;;  %1202 = vmatprep.mubr.msk.bf16.mxu1 %vm182_vm0, %v1359_v31 }
  0x47   :  { %692 = vmatpush1.bf16.msra.mxu0 %v1523_v11  ;;  %918 = vmatpush1.bf16.msra.mxu1 %v1523_v11 }
  0x4d   :  { %280 = vmatmul.mubr.bf16.gmra.mrb[20].mxu0 %v1361_v32  ;;  %506 = vmatmul.mubr.bf16.gmra.mrb[20].mxu1 %v1362_v33 }
  0x4e   :  { %1163 = vmatprep.mubr.msk.bf16.mxu0 %vm182_vm0, %v1363_v34  ;;  %1203 = vmatprep.mubr.msk.bf16.mxu1 %vm182_vm0, %v1365_v35 }
  0x55   :  { %288 = vmatmul.mubr.bf16.gmra.mrb[24].mxu0 %v1367_v36  ;;  %514 = vmatmul.mubr.bf16.gmra.mrb[24].mxu1 %v1368_v37 }
  0x56   :  { %1164 = vmatprep.mubr.msk.bf16.mxu0 %vm182_vm0, %v1369_v38  ;;  %1204 = vmatprep.mubr.msk.bf16.mxu1 %vm182_vm0, %v1371_v39 }
  0x5d   :  { %296 = vmatmul.mubr.bf16.gmra.mrb[28].mxu0 %v1373_v40  ;;  %522 = vmatmul.mubr.bf16.gmra.mrb[28].mxu1 %v1374_v41 }
  0x5e   :  { %1237 = vmatprep.mubr.msk.bf16.mxu0 %vm182_vm0, %v1377_v42  ;;  %1277 = vmatprep.mubr.msk.bf16.mxu1 %vm182_vm0, %v1380_v43 }
  0x65   :  { %708 = vmatmul.mubr.bf16.vlgmr.msra.gmra.mrb[32].mxu0 %v1375_v44  ;;  %934 = vmatmul.mubr.bf16.vlgmr.msra.gmra.mrb[32].mxu1 %v1378_v45 }
  0x66   :  { %1238 = vmatprep.mubr.msk.bf16.mxu0 %vm182_vm0, %v1381_v46  ;;  %1278 = vmatprep.mubr.msk.bf16.mxu1 %vm182_vm0, %v1383_v47 }
  0x6d   :  { %716 = vmatmul.mubr.bf16.gmra.mrb[36].mxu0 %v1385_v48  ;;  %942 = vmatmul.mubr.bf16.gmra.mrb[36].mxu1 %v1386_v49 }
  0x6e   :  { %1239 = vmatprep.mubr.msk.bf16.mxu0 %vm182_vm0, %v1387_v50  ;;  %1279 = vmatprep.mubr.msk.bf16.mxu1 %vm182_vm0, %v1389_v51 }
  0x75   :  { %724 = vmatmul.mubr.bf16.gmra.mrb[40].mxu0 %v1391_v52  ;;  %950 = vmatmul.mubr.bf16.gmra.mrb[40].mxu1 %v1392_v53 }
  0x76   :  { %1240 = vmatprep.mubr.msk.bf16.mxu0 %vm182_vm0, %v1393_v54  ;;  %1280 = vmatprep.mubr.msk.bf16.mxu1 %vm182_vm0, %v1395_v55 }
  0x7d   :  { %732 = vmatmul.mubr.bf16.gmra.mrb[44].mxu0 %v1397_v56  ;;  %958 = vmatmul.mubr.bf16.gmra.mrb[44].mxu1 %v1398_v57 }
  0x7e   :  { %1241 = vmatprep.mubr.msk.bf16.mxu0 %vm182_vm0, %v1399_v58  ;;  %1281 = vmatprep.mubr.msk.bf16.mxu1 %vm182_vm0, %v1401_v59 }
  0x85   :  { %740 = vmatmul.mubr.bf16.gmra.mrb[48].mxu0 %v1403_v60  ;;  %966 = vmatmul.mubr.bf16.gmra.mrb[48].mxu1 %v1404_v61 }
  0x86   :  { %1242 = vmatprep.mubr.msk.bf16.mxu0 %vm182_vm0, %v1405_v62  ;;  %1282 = vmatprep.mubr.msk.bf16.mxu1 %vm182_vm0, %v1407_v63 }
  0x8d   :  { %748 = vmatmul.mubr.bf16.gmra.mrb[52].mxu0 %v1409_v0  ;;  %974 = vmatmul.mubr.bf16.gmra.mrb[52].mxu1 %v1410_v1 }
  0x8e   :  { %1243 = vmatprep.mubr.msk.bf16.mxu0 %vm182_vm0, %v1411_v2  ;;  %1283 = vmatprep.mubr.msk.bf16.mxu1 %vm182_vm0, %v1413_v3 }
  0x95   :  { %756 = vmatmul.mubr.bf16.gmra.mrb[56].mxu0 %v1415_v4  ;;  %982 = vmatmul.mubr.bf16.gmra.mrb[56].mxu1 %v1416_v5 }
  0x96   :  { %1244 = vmatprep.mubr.msk.bf16.mxu0 %vm182_vm0, %v1417_v6  ;;  %1284 = vmatprep.mubr.msk.bf16.mxu1 %vm182_vm0, %v1419_v7 }
  0x9d   :  { %764 = vmatmul.mubr.bf16.gmra.mrb[60].mxu0 %v1421_v8  ;;  %990 = vmatmul.mubr.bf16.gmra.mrb[60].mxu1 %v1422_v9 }
  0xf8   :  { %v241_v11 = vpop.f32.mrb[0].mxu0  ;;  %v467_v12 = vpop.f32.mrb[0].mxu1 }
  0xf9   :  { %v242_v13 = vadd.f32 %v1782_v10, %v241_v11  ;;  %v468_v14 = vadd.f32 %v1782_v10, %v467_v12  ;;  %v243_v15 = vpop.f32.mrb[1].mxu0  ;;  %v469_v16 = vpop.f32.mrb[1].mxu1 }
  0xfa   :  { %v244_v17 = vpop.f32.mrb[2].mxu0  ;;  %v470_v18 = vpop.f32.mrb[2].mxu1 }
  0xfb   :  { %v304_v19 = vmax.f32 %v242_v13, 0.0  ;;  %v530_v20 = vmax.f32 %v468_v14, 0.0  ;;  %v245_v21 = vadd.f32 %v1782_v10, %v244_v17  ;;  %v471_v22 = vadd.f32 %v1782_v10, %v470_v18  ;;  %v246_v23 = vpop.f32.mrb[3].mxu0  ;;  %v472_v24 = vpop.f32.mrb[3].mxu1 }
  0xfd   :  { %v1788_v25 = vmax.f32 %v304_v19, %v530_v20  ;;  %v305_v26 = vmax.f32 %v245_v21, 0.0  ;;  %v531_v27 = vmax.f32 %v471_v22, 0.0 }
  0xff   :  { %v1790_v28 = vmax.f32 %v305_v26, %v531_v27 }
 0x100   :  { %v249_v29 = vpop.f32.mrb[4].mxu0  ;;  %v475_v30 = vpop.f32.mrb[4].mxu1 }
 0x101   :  { %v250_v31 = vadd.f32 %v1782_v10, %v249_v29  ;;  %v476_v32 = vadd.f32 %v1782_v10, %v475_v30  ;;  %v251_v33 = vpop.f32.mrb[5].mxu0  ;;  %v477_v34 = vpop.f32.mrb[5].mxu1 }
 0x102   :  { %v252_v35 = vpop.f32.mrb[6].mxu0  ;;  %v478_v36 = vpop.f32.mrb[6].mxu1 }
 0x103   :  { %v306_v37 = vmax.f32 %v250_v31, 0.0  ;;  %v532_v38 = vmax.f32 %v476_v32, 0.0  ;;  %v253_v39 = vadd.f32 %v1782_v10, %v252_v35  ;;  %v479_v40 = vadd.f32 %v1782_v10, %v478_v36  ;;  %v254_v41 = vpop.f32.mrb[7].mxu0  ;;  %v480_v42 = vpop.f32.mrb[7].mxu1 }
 0x105   :  { %v1796_v43 = vmax.f32 %v306_v37, %v532_v38  ;;  %v307_v44 = vmax.f32 %v253_v39, 0.0  ;;  %v533_v45 = vmax.f32 %v479_v40, 0.0 }
 0x107   :  { %v1798_v46 = vmax.f32 %v307_v44, %v533_v45 }
 0x108   :  { %v257_v47 = vpop.f32.mrb[8].mxu0  ;;  %v483_v48 = vpop.f32.mrb[8].mxu1 }
 0x109   :  { %v258_v49 = vadd.f32 %v1782_v10, %v257_v47  ;;  %v484_v50 = vadd.f32 %v1782_v10, %v483_v48  ;;  %v259_v51 = vpop.f32.mrb[9].mxu0  ;;  %v485_v52 = vpop.f32.mrb[9].mxu1 }
 0x10a   :  { %v260_v53 = vpop.f32.mrb[10].mxu0  ;;  %v486_v54 = vpop.f32.mrb[10].mxu1 }
 0x10b   :  { %v308_v55 = vmax.f32 %v258_v49, 0.0  ;;  %v534_v56 = vmax.f32 %v484_v50, 0.0  ;;  %v261_v57 = vadd.f32 %v1782_v10, %v260_v53  ;;  %v487_v58 = vadd.f32 %v1782_v10, %v486_v54  ;;  %v262_v59 = vpop.f32.mrb[11].mxu0  ;;  %v488_v60 = vpop.f32.mrb[11].mxu1 }
 0x10d   :  { %v1804_v61 = vmax.f32 %v308_v55, %v534_v56  ;;  %v309_v62 = vmax.f32 %v261_v57, 0.0  ;;  %v535_v63 = vmax.f32 %v487_v58, 0.0 }
 0x10f   :  { %v1806_v0 = vmax.f32 %v309_v62, %v535_v63 }
 0x110   :  { %v265_v1 = vpop.f32.mrb[12].mxu0  ;;  %v491_v2 = vpop.f32.mrb[12].mxu1 }
 0x111   :  { %v266_v3 = vadd.f32 %v1782_v10, %v265_v1  ;;  %v492_v4 = vadd.f32 %v1782_v10, %v491_v2  ;;  %v267_v5 = vpop.f32.mrb[13].mxu0  ;;  %v493_v6 = vpop.f32.mrb[13].mxu1 }
 0x112   :  { %v268_v7 = vpop.f32.mrb[14].mxu0  ;;  %v494_v8 = vpop.f32.mrb[14].mxu1 }
 0x113   :  { %v310_v9 = vmax.f32 %v266_v3, 0.0  ;;  %v536_v11 = vmax.f32 %v492_v4, 0.0  ;;  %v269_v12 = vadd.f32 %v1782_v10, %v268_v7  ;;  %v495_v13 = vadd.f32 %v1782_v10, %v494_v8  ;;  %v270_v14 = vpop.f32.mrb[15].mxu0  ;;  %v496_v15 = vpop.f32.mrb[15].mxu1 }
 0x115   :  { %v1812_v16 = vmax.f32 %v310_v9, %v536_v11  ;;  %v311_v17 = vmax.f32 %v269_v12, 0.0  ;;  %v537_v18 = vmax.f32 %v495_v13, 0.0 }
 0x117   :  { %v1814_v19 = vmax.f32 %v311_v17, %v537_v18 }
 0x118   :  { %v273_v20 = vpop.f32.mrb[16].mxu0  ;;  %v499_v21 = vpop.f32.mrb[16].mxu1 }
 0x119   :  { %v274_v22 = vadd.f32 %v1782_v10, %v273_v20  ;;  %v500_v23 = vadd.f32 %v1782_v10, %v499_v21  ;;  %v275_v24 = vpop.f32.mrb[17].mxu0  ;;  %v501_v26 = vpop.f32.mrb[17].mxu1 }
 0x11a   :  { %v276_v27 = vpop.f32.mrb[18].mxu0  ;;  %v502_v29 = vpop.f32.mrb[18].mxu1 }
 0x11b   :  { %v312_v30 = vmax.f32 %v274_v22, 0.0  ;;  %v538_v31 = vmax.f32 %v500_v23, 0.0  ;;  %v277_v32 = vadd.f32 %v1782_v10, %v276_v27  ;;  %v503_v33 = vadd.f32 %v1782_v10, %v502_v29  ;;  %v278_v34 = vpop.f32.mrb[19].mxu0  ;;  %v504_v35 = vpop.f32.mrb[19].mxu1 }
 0x11d   :  { %v1820_v36 = vmax.f32 %v312_v30, %v538_v31  ;;  %v313_v37 = vmax.f32 %v277_v32, 0.0  ;;  %v539_v38 = vmax.f32 %v503_v33, 0.0 }
 0x11f   :  { %v1822_v39 = vmax.f32 %v313_v37, %v539_v38 }
 0x120   :  { %v281_v40 = vpop.f32.mrb[20].mxu0  ;;  %v507_v41 = vpop.f32.mrb[20].mxu1 }
 0x121   :  { %v282_v42 = vadd.f32 %v1782_v10, %v281_v40  ;;  %v508_v44 = vadd.f32 %v1782_v10, %v507_v41  ;;  %v283_v45 = vpop.f32.mrb[21].mxu0  ;;  %v509_v47 = vpop.f32.mrb[21].mxu1 }
 0x122   :  { %v284_v48 = vpop.f32.mrb[22].mxu0  ;;  %v510_v49 = vpop.f32.mrb[22].mxu1 }
 0x123   :  { %v314_v50 = vmax.f32 %v282_v42, 0.0  ;;  %v540_v51 = vmax.f32 %v508_v44, 0.0  ;;  %v285_v52 = vadd.f32 %v1782_v10, %v284_v48  ;;  %v511_v53 = vadd.f32 %v1782_v10, %v510_v49  ;;  %v286_v54 = vpop.f32.mrb[23].mxu0  ;;  %v512_v55 = vpop.f32.mrb[23].mxu1 }
 0x125   :  { %v1828_v56 = vmax.f32 %v314_v50, %v540_v51  ;;  %v315_v57 = vmax.f32 %v285_v52, 0.0  ;;  %v541_v58 = vmax.f32 %v511_v53, 0.0 }
 0x127   :  { %v1830_v59 = vmax.f32 %v315_v57, %v541_v58 }
 0x128   :  { %v289_v60 = vpop.f32.mrb[24].mxu0  ;;  %v515_v62 = vpop.f32.mrb[24].mxu1 }
 0x129   :  { %v290_v63 = vadd.f32 %v1782_v10, %v289_v60  ;;  %v516_v1 = vadd.f32 %v1782_v10, %v515_v62  ;;  %v291_v2 = vpop.f32.mrb[25].mxu0  ;;  %v517_v3 = vpop.f32.mrb[25].mxu1 }
 0x12a   :  { %v292_v4 = vpop.f32.mrb[26].mxu0  ;;  %v518_v5 = vpop.f32.mrb[26].mxu1 }
 0x12b   :  { %v316_v6 = vmax.f32 %v290_v63, 0.0  ;;  %v542_v7 = vmax.f32 %v516_v1, 0.0  ;;  %v293_v8 = vadd.f32 %v1782_v10, %v292_v4  ;;  %v519_v9 = vadd.f32 %v1782_v10, %v518_v5  ;;  %v294_v11 = vpop.f32.mrb[27].mxu0  ;;  %v520_v12 = vpop.f32.mrb[27].mxu1 }
 0x12d   :  { %v1836_v13 = vmax.f32 %v316_v6, %v542_v7  ;;  %v317_v14 = vmax.f32 %v293_v8, 0.0  ;;  %v543_v15 = vmax.f32 %v519_v9, 0.0 }
 0x12f   :  { %v1838_v17 = vmax.f32 %v317_v14, %v543_v15 }
 0x130   :  { %v297_v18 = vpop.f32.mrb[28].mxu0  ;;  %v523_v20 = vpop.f32.mrb[28].mxu1 }
 0x131   :  { %v298_v21 = vadd.f32 %v1782_v10, %v297_v18  ;;  %v524_v22 = vadd.f32 %v1782_v10, %v523_v20  ;;  %v299_v23 = vpop.f32.mrb[29].mxu0  ;;  %v525_v24 = vpop.f32.mrb[29].mxu1 }
 0x132   :  { %v300_v26 = vpop.f32.mrb[30].mxu0  ;;  %v526_v27 = vpop.f32.mrb[30].mxu1 }
 0x133   :  { %v318_v29 = vmax.f32 %v298_v21, 0.0  ;;  %v544_v30 = vmax.f32 %v524_v22, 0.0  ;;  %v301_v31 = vadd.f32 %v1782_v10, %v300_v26  ;;  %v527_v32 = vadd.f32 %v1782_v10, %v526_v27  ;;  %v302_v33 = vpop.f32.mrb[31].mxu0  ;;  %v528_v34 = vpop.f32.mrb[31].mxu1 }
 0x135   :  { %v1844_v35 = vmax.f32 %v318_v29, %v544_v30  ;;  %v319_v37 = vmax.f32 %v301_v31, 0.0  ;;  %v545_v38 = vmax.f32 %v527_v32, 0.0 }
 0x137   :  { %v1846_v40 = vmax.f32 %v319_v37, %v545_v38 }
 0x138   :  { %v709_v41 = vpop.f32.mrb[32].mxu0  ;;  %v935_v42 = vpop.f32.mrb[32].mxu1 }
 0x139   :  { %v710_v44 = vadd.f32 %v1782_v10, %v709_v41  ;;  %v936_v45 = vadd.f32 %v1782_v10, %v935_v42  ;;  %v711_v47 = vpop.f32.mrb[33].mxu0  ;;  %v937_v48 = vpop.f32.mrb[33].mxu1 }
 0x13a   :  { %v712_v49 = vpop.f32.mrb[34].mxu0  ;;  %v938_v50 = vpop.f32.mrb[34].mxu1 }
 0x13b   :  { %v772_v51 = vmax.f32 %v710_v44, 0.0  ;;  %v998_v52 = vmax.f32 %v936_v45, 0.0  ;;  %v713_v53 = vadd.f32 %v1782_v10, %v712_v49  ;;  %v939_v54 = vadd.f32 %v1782_v10, %v938_v50  ;;  %v714_v55 = vpop.f32.mrb[35].mxu0  ;;  %v940_v57 = vpop.f32.mrb[35].mxu1 }
 0x13d   :  { %v1014_v58 = vmax.f32 %v772_v51, %v998_v52  ;;  %v773_v60 = vmax.f32 %v713_v53, 0.0  ;;  %v999_v62 = vmax.f32 %v939_v54, 0.0 }
 0x13f   :  { %v1030_v63 = vmax.f32 %v1788_v25, %v1014_v58  ;;  %v1015_v1 = vmax.f32 %v773_v60, %v999_v62 }
 0x140   :  { %v717_v2 = vpop.f32.mrb[36].mxu0  ;;  %v943_v3 = vpop.f32.mrb[36].mxu1 }
 0x141   :  { %v1301_v4 = vpack.c.bf16 %v1030_v63, %v1030_v63  ;;  %v1031_v5 = vmax.f32 %v1790_v28, %v1015_v1  ;;  %v718_v6 = vadd.f32 %v1782_v10, %v717_v2  ;;  %v944_v7 = vadd.f32 %v1782_v10, %v943_v3  ;;  %v719_v8 = vpop.f32.mrb[37].mxu0  ;;  %v945_v9 = vpop.f32.mrb[37].mxu1 }
 0x142   :  { %v720_v11 = vpop.f32.mrb[38].mxu0  ;;  %v946_v12 = vpop.f32.mrb[38].mxu1 }
 0x143   :  { %1111 = vst.msk [vmem:[%s1963_s3] sm:$0xf] %vm1110_vm1, %v1301_v4  ;;  %v1302_v25 = vpack.c.bf16 %v1031_v5, %v1031_v5  ;;  %v774_v14 = vmax.f32 %v718_v6, 0.0  ;;  %v1000_v15 = vmax.f32 %v944_v7, 0.0  ;;  %v721_v18 = vadd.f32 %v1782_v10, %v720_v11  ;;  %v722_v20 = vpop.f32.mrb[39].mxu0  ;;  %v948_v28 = vpop.f32.mrb[39].mxu1 }
 0x144   :  { %v947_v21 = vadd.f32 %v1782_v10, %v946_v12 }
 0x145   :  { %1112 = vst.msk [vmem:[%s1963_s3 + $0x4] sm:$0xf] %vm1110_vm1, %v1302_v25  ;;  %v1016_v22 = vmax.f32 %v774_v14, %v1000_v15  ;;  %v775_v23 = vmax.f32 %v721_v18, 0.0 }
 0x146   :  { %v1001_v24 = vmax.f32 %v947_v21, 0.0 }
 0x147   :  { %v1032_v26 = vmax.f32 %v1796_v43, %v1016_v22 }
 0x148   :  { %v1017_v27 = vmax.f32 %v775_v23, %v1001_v24  ;;  %v725_v29 = vpop.f32.mrb[40].mxu0  ;;  %v951_v30 = vpop.f32.mrb[40].mxu1 }
 0x149   :  { %v1303_v31 = vpack.c.bf16 %v1032_v26, %v1032_v26  ;;  %v726_v32 = vadd.f32 %v1782_v10, %v725_v29  ;;  %v952_v33 = vadd.f32 %v1782_v10, %v951_v30  ;;  %v727_v34 = vpop.f32.mrb[41].mxu0  ;;  %v953_v37 = vpop.f32.mrb[41].mxu1 }
 0x14a   :  { %v1033_v38 = vmax.f32 %v1798_v46, %v1017_v27  ;;  %v728_v41 = vpop.f32.mrb[42].mxu0  ;;  %v954_v42 = vpop.f32.mrb[42].mxu1 }
 0x14b   :  { %1113 = vst.msk [vmem:[%s1963_s3 + $0x8] sm:$0xf] %vm1110_vm1, %v1303_v31  ;;  %v776_v43 = vmax.f32 %v726_v32, 0.0  ;;  %v1002_v44 = vmax.f32 %v952_v33, 0.0  ;;  %v729_v45 = vadd.f32 %v1782_v10, %v728_v41  ;;  %v955_v47 = vadd.f32 %v1782_v10, %v954_v42  ;;  %v730_v48 = vpop.f32.mrb[43].mxu0  ;;  %v956_v49 = vpop.f32.mrb[43].mxu1 }
 0x14c   :  { %v1304_v50 = vpack.c.bf16 %v1033_v38, %v1033_v38 }
 0x14d   :  { %v1018_v51 = vmax.f32 %v776_v43, %v1002_v44  ;;  %v777_v52 = vmax.f32 %v729_v45, 0.0  ;;  %v1003_v53 = vmax.f32 %v955_v47, 0.0 }
 0x14e   :  { %1114 = vst.msk [vmem:[%s1963_s3 + $0xc] sm:$0xf] %vm1110_vm1, %v1304_v50 }
 0x14f   :  { %v1034_v46 = vmax.f32 %v1804_v61, %v1018_v51  ;;  %v1019_v54 = vmax.f32 %v777_v52, %v1003_v53 }
 0x150   :  { %v733_v55 = vpop.f32.mrb[44].mxu0  ;;  %v959_v57 = vpop.f32.mrb[44].mxu1 }
 0x151   :  { %v1305_v58 = vpack.c.bf16 %v1034_v46, %v1034_v46  ;;  %v1035_v60 = vmax.f32 %v1806_v0, %v1019_v54  ;;  %v734_v62 = vadd.f32 %v1782_v10, %v733_v55  ;;  %v960_v63 = vadd.f32 %v1782_v10, %v959_v57  ;;  %v735_v1 = vpop.f32.mrb[45].mxu0  ;;  %v961_v2 = vpop.f32.mrb[45].mxu1 }
 0x152   :  { %v736_v3 = vpop.f32.mrb[46].mxu0  ;;  %v962_v4 = vpop.f32.mrb[46].mxu1 }
 0x153   :  { %1115 = vst.msk [vmem:[%s1963_s3 + $0x10] sm:$0xf] %vm1110_vm1, %v1305_v58  ;;  %v1306_v61 = vpack.c.bf16 %v1035_v60, %v1035_v60  ;;  %v778_v5 = vmax.f32 %v734_v62, 0.0  ;;  %v1004_v6 = vmax.f32 %v960_v63, 0.0  ;;  %v737_v7 = vadd.f32 %v1782_v10, %v736_v3  ;;  %v738_v8 = vpop.f32.mrb[47].mxu0  ;;  %v964_v0 = vpop.f32.mrb[47].mxu1 }
 0x154   :  { %v963_v9 = vadd.f32 %v1782_v10, %v962_v4 }
 0x155   :  { %1116 = vst.msk [vmem:[%s1963_s3 + $0x14] sm:$0xf] %vm1110_vm1, %v1306_v61  ;;  %v1020_v11 = vmax.f32 %v778_v5, %v1004_v6  ;;  %v779_v12 = vmax.f32 %v737_v7, 0.0 }
 0x156   :  { %v1005_v25 = vmax.f32 %v963_v9, 0.0 }
 0x157   :  { %v1036_v14 = vmax.f32 %v1812_v16, %v1020_v11 }
 0x158   :  { %v1021_v15 = vmax.f32 %v779_v12, %v1005_v25  ;;  %v741_v18 = vpop.f32.mrb[48].mxu0  ;;  %v967_v20 = vpop.f32.mrb[48].mxu1 }
 0x159   :  { %v1307_v28 = vpack.c.bf16 %v1036_v14, %v1036_v14  ;;  %v742_v21 = vadd.f32 %v1782_v10, %v741_v18  ;;  %v968_v22 = vadd.f32 %v1782_v10, %v967_v20  ;;  %v743_v23 = vpop.f32.mrb[49].mxu0  ;;  %v969_v24 = vpop.f32.mrb[49].mxu1 }
 0x15a   :  { %v1037_v26 = vmax.f32 %v1814_v19, %v1021_v15  ;;  %v744_v27 = vpop.f32.mrb[50].mxu0  ;;  %v970_v29 = vpop.f32.mrb[50].mxu1 }
 0x15b   :  { %1117 = vst.msk [vmem:[%s1963_s3 + $0x18] sm:$0xf] %vm1110_vm1, %v1307_v28  ;;  %v780_v16 = vmax.f32 %v742_v21, 0.0  ;;  %v1006_v30 = vmax.f32 %v968_v22, 0.0  ;;  %v745_v31 = vadd.f32 %v1782_v10, %v744_v27  ;;  %v971_v32 = vadd.f32 %v1782_v10, %v970_v29  ;;  %v746_v33 = vpop.f32.mrb[51].mxu0  ;;  %v972_v34 = vpop.f32.mrb[51].mxu1 }
 0x15c   :  { %v1308_v37 = vpack.c.bf16 %v1037_v26, %v1037_v26 }
 0x15d   :  { %v1022_v38 = vmax.f32 %v780_v16, %v1006_v30  ;;  %v781_v41 = vmax.f32 %v745_v31, 0.0  ;;  %v1007_v42 = vmax.f32 %v971_v32, 0.0 }
 0x15e   :  { %1118 = vst.msk [vmem:[%s1963_s3 + $0x1c] sm:$0xf] %vm1110_vm1, %v1308_v37 }
 0x15f   :  { %v1038_v19 = vmax.f32 %v1820_v36, %v1022_v38  ;;  %v1023_v43 = vmax.f32 %v781_v41, %v1007_v42 }
 0x160   :  { %v749_v44 = vpop.f32.mrb[52].mxu0  ;;  %v975_v45 = vpop.f32.mrb[52].mxu1 }
 0x161   :  { %v1309_v47 = vpack.c.bf16 %v1038_v19, %v1038_v19  ;;  %v1039_v48 = vmax.f32 %v1822_v39, %v1023_v43  ;;  %v750_v49 = vadd.f32 %v1782_v10, %v749_v44  ;;  %v976_v50 = vadd.f32 %v1782_v10, %v975_v45  ;;  %v751_v51 = vpop.f32.mrb[53].mxu0  ;;  %v977_v52 = vpop.f32.mrb[53].mxu1 }
 0x162   :  { %v752_v53 = vpop.f32.mrb[54].mxu0  ;;  %v978_v46 = vpop.f32.mrb[54].mxu1 }
 0x163   :  { %1119 = vst.msk [vmem:[%s1963_s3 + $0x20] sm:$0xf] %vm1110_vm1, %v1309_v47  ;;  %v1310_v36 = vpack.c.bf16 %v1039_v48, %v1039_v48  ;;  %v782_v54 = vmax.f32 %v750_v49, 0.0  ;;  %v1008_v55 = vmax.f32 %v976_v50, 0.0  ;;  %v753_v57 = vadd.f32 %v1782_v10, %v752_v53  ;;  %v754_v58 = vpop.f32.mrb[55].mxu0  ;;  %v980_v39 = vpop.f32.mrb[55].mxu1 }
 0x164   :  { %v979_v60 = vadd.f32 %v1782_v10, %v978_v46 }
 0x165   :  { %1120 = vst.msk [vmem:[%s1963_s3 + $0x24] sm:$0xf] %vm1110_vm1, %v1310_v36  ;;  %v1024_v62 = vmax.f32 %v782_v54, %v1008_v55  ;;  %v783_v63 = vmax.f32 %v753_v57, 0.0 }
 0x166   :  { %v1009_v1 = vmax.f32 %v979_v60, 0.0 }
 0x167   :  { %v1040_v2 = vmax.f32 %v1828_v56, %v1024_v62 }
 0x168   :  { %v1025_v3 = vmax.f32 %v783_v63, %v1009_v1  ;;  %v757_v4 = vpop.f32.mrb[56].mxu0  ;;  %v983_v61 = vpop.f32.mrb[56].mxu1 }
 0x169   :  { %v1311_v5 = vpack.c.bf16 %v1040_v2, %v1040_v2  ;;  %v758_v6 = vadd.f32 %v1782_v10, %v757_v4  ;;  %v984_v7 = vadd.f32 %v1782_v10, %v983_v61  ;;  %v759_v8 = vpop.f32.mrb[57].mxu0  ;;  %v985_v0 = vpop.f32.mrb[57].mxu1 }
 0x16a   :  { %v1041_v9 = vmax.f32 %v1830_v59, %v1025_v3  ;;  %v760_v11 = vpop.f32.mrb[58].mxu0  ;;  %v986_v12 = vpop.f32.mrb[58].mxu1 }
 0x16b   :  { %1121 = vst.msk [vmem:[%s1963_s3 + $0x28] sm:$0xf] %vm1110_vm1, %v1311_v5  ;;  %v784_v56 = vmax.f32 %v758_v6, 0.0  ;;  %v1010_v25 = vmax.f32 %v984_v7, 0.0  ;;  %v761_v14 = vadd.f32 %v1782_v10, %v760_v11  ;;  %v987_v15 = vadd.f32 %v1782_v10, %v986_v12  ;;  %v762_v18 = vpop.f32.mrb[59].mxu0  ;;  %v988_v20 = vpop.f32.mrb[59].mxu1 }
 0x16c   :  { %v1312_v28 = vpack.c.bf16 %v1041_v9, %v1041_v9 }
 0x16d   :  { %v1026_v21 = vmax.f32 %v784_v56, %v1010_v25  ;;  %v785_v22 = vmax.f32 %v761_v14, 0.0  ;;  %v1011_v23 = vmax.f32 %v987_v15, 0.0 }
 0x16e   :  { %1122 = vst.msk [vmem:[%s1963_s3 + $0x2c] sm:$0xf] %vm1110_vm1, %v1312_v28 }
 0x16f   :  { %v1042_v59 = vmax.f32 %v1836_v13, %v1026_v21  ;;  %v1027_v24 = vmax.f32 %v785_v22, %v1011_v23 }
 0x170   :  { %v765_v26 = vpop.f32.mrb[60].mxu0  ;;  %v991_v27 = vpop.f32.mrb[60].mxu1 }
 0x171   :  { %v1313_v29 = vpack.c.bf16 %v1042_v59, %v1042_v59  ;;  %v1043_v16 = vmax.f32 %v1838_v17, %v1027_v24  ;;  %v766_v30 = vadd.f32 %v1782_v10, %v765_v26  ;;  %v992_v31 = vadd.f32 %v1782_v10, %v991_v27  ;;  %v767_v32 = vpop.f32.mrb[61].mxu0  ;;  %v993_v33 = vpop.f32.mrb[61].mxu1 }
 0x172   :  { %v768_v34 = vpop.f32.mrb[62].mxu0  ;;  %v994_v37 = vpop.f32.mrb[62].mxu1 }
 0x173   :  { %1123 = vst.msk [vmem:[%s1963_s3 + $0x30] sm:$0xf] %vm1110_vm1, %v1313_v29  ;;  %v1314_v13 = vpack.c.bf16 %v1043_v16, %v1043_v16  ;;  %v786_v38 = vmax.f32 %v766_v30, 0.0  ;;  %v1012_v41 = vmax.f32 %v992_v31, 0.0  ;;  %v769_v42 = vadd.f32 %v1782_v10, %v768_v34  ;;  %v770_v19 = vpop.f32.mrb[63].mxu0  ;;  %v996_v17 = vpop.f32.mrb[63].mxu1 }
 0x174   :  { %v995_v43 = vadd.f32 %v1782_v10, %v994_v37 }
 0x175   :  { %1124 = vst.msk [vmem:[%s1963_s3 + $0x34] sm:$0xf] %vm1110_vm1, %v1314_v13  ;;  %v1028_v44 = vmax.f32 %v786_v38, %v1012_v41  ;;  %v787_v45 = vmax.f32 %v769_v42, 0.0 }
 0x176   :  { %v1013_v47 = vmax.f32 %v995_v43, 0.0 }
 0x177   :  { %v1044_v48 = vmax.f32 %v1844_v35, %v1028_v44 }
 0x178   :  { %v1029_v49 = vmax.f32 %v787_v45, %v1013_v47 }
 0x179   :  { %v1315_v50 = vpack.c.bf16 %v1044_v48, %v1044_v48 }
 0x17a   :  { %v1045_v51 = vmax.f32 %v1846_v40, %v1029_v49 }
 0x17b   :  { %1125 = vst.msk [vmem:[%s1963_s3 + $0x38] sm:$0xf] %vm1110_vm1, %v1315_v50 }
 0x17c   :  { %v1316_v10 = vpack.c.bf16 %v1045_v51, %v1045_v51 }
 0x17e   :  { %1126 = vst.msk [vmem:[%s1963_s3 + $0x3c] sm:$0xf] %vm1110_vm1, %v1316_v10 }

// kernel: cnn_forward.5
= control target key start
LH: loop header
LB: loop body
LE: loop exit
PB: predicated region body
PF: predicated region fallthrough
CT: control target
= control target key end

     0   :  { %v293_v28 = vlaneseq  ;;  %v2129_v36 = vmov 1966171168   ;;  %s2619_s0 = inlined_call_operand.vmem [shape: bf16[2,2048], index: 0, kind: input, shape index: {}]   ;;  %s2620_s1 = inlined_call_operand.vmem [shape: bf16[2048,128], index: 1, kind: input, shape index: {}]   ;;  %s2621_s2 = inlined_call_operand.vmem [shape: f32[1,128], index: 2, kind: input, shape index: {}]   ;;  %s2622_s3 = inlined_call_operand.vmem [shape: bf16[128,10], index: 3, kind: input, shape index: {}]   ;;  %s2623_s4 = inlined_call_operand.vmem [shape: f32[1,10], index: 4, kind: input, shape index: {}]   ;;  %s2624_s5 = inlined_call_operand.hbm [shape: f32[2,10], index: 5, kind: output, shape index: {}]  }
   0x1   :  { %v1967_v0 = vld [vmem:[%s2620_s1 + $0x40] sm:$0xff]   ;;  %v1971_v4 = vld [vmem:[%s2620_s1 + $0x48] sm:$0xff]   ;;  %v1975_v8 = vld [vmem:[%s2620_s1 + $0x50] sm:$0xff]   ;;  %v291_v37 = vunpack.c.l.s4 %v2129_v36 }
   0x2   :  { %v1968_v1 = vld [vmem:[%s2620_s1 + $0xc0] sm:$0xff]   ;;  %1758 = vmatprep.subr.bf16.mxu0 %v1967_v0  ;;  %v1972_v5 = vld [vmem:[%s2620_s1 + $0xc8] sm:$0xff]   ;;  %v1976_v9 = vld [vmem:[%s2620_s1 + $0xd0] sm:$0xff]   ;;  %v294_v33 = vshrl.u32 %v293_v28, 7 }
   0x3   :  { %v1969_v2 = vld [vmem:[%s2620_s1] sm:$0xff]   ;;  %1780 = vmatprep.subr.bf16.mxu1 %v1968_v1  ;;  %v1973_v6 = vld [vmem:[%s2620_s1 + $0x8] sm:$0xff]   ;;  %v1977_v10 = vld [vmem:[%s2620_s1 + $0x10] sm:$0xff]   ;;  %v292_v40 = vunpack.c.0.s8 %v291_v37 }
   0x4   :  { %v1970_v3 = vld [vmem:[%s2620_s1 + $0x80] sm:$0xff]   ;;  %1759 = vmatpush3.bf16.msra.mxu0 %v1969_v2  ;;  %v1974_v7 = vld [vmem:[%s2620_s1 + $0x88] sm:$0xff]   ;;  %v1978_v11 = vld [vmem:[%s2620_s1 + $0x90] sm:$0xff]  }
   0x5   :  { %1781 = vmatpush3.bf16.msra.mxu1 %v1970_v3  ;;  %1760 = vmatprep.subr.bf16.mxu0 %v1971_v4  ;;  %v1979_v12 = vld [vmem:[%s2620_s1 + $0x58] sm:$0xff]   ;;  %v1983_v16 = vld [vmem:[%s2620_s1 + $0x60] sm:$0xff]   ;;  %v1987_v20 = vld [vmem:[%s2620_s1 + $0x68] sm:$0xff]   ;;  %v2268_v41 = vsub.s32 %v292_v40, %v294_v33 }
   0x6   :  { %1782 = vmatprep.subr.bf16.mxu1 %v1972_v5  ;;  %v1980_v13 = vld [vmem:[%s2620_s1 + $0xd8] sm:$0xff]   ;;  %v1984_v17 = vld [vmem:[%s2620_s1 + $0xe0] sm:$0xff]   ;;  %v1988_v21 = vld [vmem:[%s2620_s1 + $0xe8] sm:$0xff]  }
   0x7   :  { %v1981_v14 = vld [vmem:[%s2620_s1 + $0x18] sm:$0xff]   ;;  %v1985_v18 = vld [vmem:[%s2620_s1 + $0x20] sm:$0xff]   ;;  %v1989_v22 = vld [vmem:[%s2620_s1 + $0x28] sm:$0xff]  }
   0x8   :  { %1761 = vmatpush3.bf16.msra.mxu0 %v1973_v6  ;;  %v1982_v15 = vld [vmem:[%s2620_s1 + $0x98] sm:$0xff]   ;;  %v1986_v19 = vld [vmem:[%s2620_s1 + $0xa0] sm:$0xff]   ;;  %v1990_v23 = vld [vmem:[%s2620_s1 + $0xa8] sm:$0xff]  }
   0x9   :  { %1783 = vmatpush3.bf16.msra.mxu1 %v1974_v7  ;;  %1762 = vmatprep.subr.bf16.mxu0 %v1975_v8  ;;  %v1991_v24 = vld [vmem:[%s2620_s1 + $0x70] sm:$0xff]   ;;  %v1995_v29 = vld [vmem:[%s2620_s1 + $0x78] sm:$0xff]   ;;  %v22_v34 = vld [vmem:[%s2619_s0] sm:$0xff] }
   0xa   :  { %1784 = vmatprep.subr.bf16.mxu1 %v1976_v9  ;;  %v1992_v25 = vld [vmem:[%s2620_s1 + $0xf0] sm:$0xff]   ;;  %v1996_v30 = vld [vmem:[%s2620_s1 + $0xf8] sm:$0xff]   ;;  %v2000_v35 = vld [vmem:[%s2620_s1 + $0x140] sm:$0xff]   ;;  %v289_v39 = vcombine.high %v22_v34, %v22_v34  ;;  %v296_v42 = vrot.slane %v22_v34, %v2268_v41 }
   0xb   :  { %v1993_v26 = vld [vmem:[%s2620_s1 + $0x30] sm:$0xff]   ;;  %v1997_v31 = vld [vmem:[%s2620_s1 + $0x38] sm:$0xff]   ;;  %v2001_v38 = vld [vmem:[%s2620_s1 + $0x1c0] sm:$0xff]  }
   0xc   :  { %1763 = vmatpush3.bf16.msra.mxu0 %v1977_v10  ;;  %v1994_v27 = vld [vmem:[%s2620_s1 + $0xb0] sm:$0xff]   ;;  %v1998_v32 = vld [vmem:[%s2620_s1 + $0xb8] sm:$0xff]   ;;  %v2272_v43 = vrot.slane %v289_v39, %v2268_v41  ;;  %v304_v44 = vcombine.high %v296_v42, %v296_v42  ;;  %v312_v45 = vrot.slane %v296_v42, %v2268_v41  ;;  %v2002_v47 = vld [vmem:[%s2620_s1 + $0x100] sm:$0xff]  }
   0xd   :  { %1785 = vmatpush3.bf16.msra.mxu1 %v1978_v11  ;;  %1764 = vmatprep.subr.bf16.mxu0 %v1979_v12  ;;  %v2003_v49 = vld [vmem:[%s2620_s1 + $0x180] sm:$0xff]   ;;  %v2004_v52 = vld [vmem:[%s2620_s1 + $0x148] sm:$0xff]   ;;  %v2008_v58 = vld [vmem:[%s2620_s1 + $0x150] sm:$0xff]  }
   0xe   :  { %1786 = vmatprep.subr.bf16.mxu1 %v1980_v13  ;;  %v305_v46 = vcombine.high %v2272_v43, %v2272_v43  ;;  %v326_v48 = vrot.slane %v304_v44, %v2268_v41  ;;  %v334_v51 = vcombine.high %v312_v45, %v312_v45  ;;  %v2005_v54 = vld [vmem:[%s2620_s1 + $0x1c8] sm:$0xff]   ;;  %v2009_v59 = vld [vmem:[%s2620_s1 + $0x1d0] sm:$0xff]   ;;  %v2012_v62 = vld [vmem:[%s2620_s1 + $0x158] sm:$0xff]  }
   0xf   :  { %v2006_v55 = vld [vmem:[%s2620_s1 + $0x108] sm:$0xff]   ;;  %v2010_v60 = vld [vmem:[%s2620_s1 + $0x110] sm:$0xff]   ;;  %v2013_v63 = vld [vmem:[%s2620_s1 + $0x1d8] sm:$0xff]  }
  0x10   :  { %1765 = vmatpush3.bf16.msra.mxu0 %v1981_v14  ;;  %v333_v50 = vrot.slane %v305_v46, %v2268_v41  ;;  %1203 = vmatprep.mubr.bf16.mxu0 %v326_v48  ;;  %v336_v53 = vcombine.high %v326_v48, %v326_v48  ;;  %v2007_v57 = vld [vmem:[%s2620_s1 + $0x188] sm:$0xff]   ;;  %v2011_v61 = vld [vmem:[%s2620_s1 + $0x190] sm:$0xff]   ;;  %v2014_v0 = vld [vmem:[%s2620_s1 + $0x118] sm:$0xff]  }
  0x11   :  { %1787 = vmatpush3.bf16.msra.mxu1 %v1982_v15  ;;  %1766 = vmatprep.subr.bf16.mxu0 %v1983_v16  ;;  %v2015_v1 = vld [vmem:[%s2620_s1 + $0x198] sm:$0xff]   ;;  %v2016_v2 = vld [vmem:[%s2620_s1 + $0x160] sm:$0xff]   ;;  %v2020_v6 = vld [vmem:[%s2620_s1 + $0x168] sm:$0xff]  }
  0x12   :  { %1788 = vmatprep.subr.bf16.mxu1 %v1984_v17  ;;  %v337_v56 = vcombine.high %v333_v50, %v333_v50  ;;  %1243 = vmatprep.mubr.bf16.mxu1 %v336_v53  ;;  %v2017_v3 = vld [vmem:[%s2620_s1 + $0x1e0] sm:$0xff]   ;;  %v2021_v7 = vld [vmem:[%s2620_s1 + $0x1e8] sm:$0xff]   ;;  %v2024_v10 = vld [vmem:[%s2620_s1 + $0x170] sm:$0xff]  }
  0x13   :  { %v2018_v4 = vld [vmem:[%s2620_s1 + $0x120] sm:$0xff]   ;;  %v2022_v8 = vld [vmem:[%s2620_s1 + $0x128] sm:$0xff]   ;;  %v2025_v11 = vld [vmem:[%s2620_s1 + $0x1f0] sm:$0xff]  }
  0x14   :  { %1767 = vmatpush3.bf16.msra.mxu0 %v1985_v18  ;;  %v2019_v5 = vld [vmem:[%s2620_s1 + $0x1a0] sm:$0xff]   ;;  %v2023_v9 = vld [vmem:[%s2620_s1 + $0x1a8] sm:$0xff]   ;;  %v2026_v12 = vld [vmem:[%s2620_s1 + $0x130] sm:$0xff]   ;;  %v319_v18 = vrot.slane %v2272_v43, %v2268_v41 }
  0x15   :  { %1789 = vmatpush3.bf16.msra.mxu1 %v1986_v19  ;;  %1768 = vmatprep.subr.bf16.mxu0 %v1987_v20  ;;  %v2027_v13 = vld [vmem:[%s2620_s1 + $0x1b0] sm:$0xff]   ;;  %v2028_v14 = vld [vmem:[%s2620_s1 + $0x178] sm:$0xff]   ;;  %v2032_v19 = vld [vmem:[%s2620_s1 + $0x240] sm:$0xff]  }
  0x16   :  { %1790 = vmatprep.subr.bf16.mxu1 %v1988_v21  ;;  %v2029_v15 = vld [vmem:[%s2620_s1 + $0x1f8] sm:$0xff]   ;;  %v2033_v20 = vld [vmem:[%s2620_s1 + $0x2c0] sm:$0xff]   ;;  %v2040_v28 = vld [vmem:[%s2620_s1 + $0x250] sm:$0xff]  }
  0x17   :  { %v2030_v16 = vld [vmem:[%s2620_s1 + $0x138] sm:$0xff]   ;;  %v2034_v21 = vld [vmem:[%s2620_s1 + $0x200] sm:$0xff]   ;;  %v2052_v40 = vld [vmem:[%s2620_s1 + $0x268] sm:$0xff]  }
  0x18   :  { %1769 = vmatpush3.bf16.msra.mxu0 %v1989_v22  ;;  %v2031_v17 = vld [vmem:[%s2620_s1 + $0x1b8] sm:$0xff]   ;;  %v2035_v22 = vld [vmem:[%s2620_s1 + $0x280] sm:$0xff]   ;;  %v2053_v42 = vld [vmem:[%s2620_s1 + $0x2e8] sm:$0xff]  }
  0x19   :  { %1791 = vmatpush3.bf16.msra.mxu1 %v1990_v23  ;;  %1770 = vmatprep.subr.bf16.mxu0 %v1991_v24  ;;  %v335_v23 = vcombine.high %v319_v18, %v319_v18  ;;  %v2036_v24 = vld [vmem:[%s2620_s1 + $0x248] sm:$0xff]   ;;  %v2045_v33 = vld [vmem:[%s2620_s1 + $0x2d8] sm:$0xff]   ;;  %v2048_v36 = vld [vmem:[%s2620_s1 + $0x260] sm:$0xff]  }
  0x1a   :  { %1792 = vmatprep.subr.bf16.mxu1 %v1992_v25  ;;  %v2037_v25 = vld [vmem:[%s2620_s1 + $0x2c8] sm:$0xff]   ;;  %v2046_v34 = vld [vmem:[%s2620_s1 + $0x218] sm:$0xff]   ;;  %v2049_v37 = vld [vmem:[%s2620_s1 + $0x2e0] sm:$0xff]  }
  0x1b   :  { %v2051_v39 = vld [vmem:[%s2620_s1 + $0x2a0] sm:$0xff]   ;;  %v2054_v43 = vld [vmem:[%s2620_s1 + $0x228] sm:$0xff]  }
  0x1c   :  { %1771 = vmatpush3.bf16.msra.mxu0 %v1993_v26  ;;  %v2038_v26 = vld [vmem:[%s2620_s1 + $0x208] sm:$0xff]  }
  0x1d   :  { %1793 = vmatpush3.bf16.msra.mxu1 %v1994_v27  ;;  %1772 = vmatprep.subr.bf16.mxu0 %v1995_v29  ;;  %v2039_v27 = vld [vmem:[%s2620_s1 + $0x288] sm:$0xff]   ;;  %v2041_v29 = vld [vmem:[%s2620_s1 + $0x2d0] sm:$0xff]  }
  0x1e   :  { %1794 = vmatprep.subr.bf16.mxu1 %v1996_v30  ;;  %v2042_v30 = vld [vmem:[%s2620_s1 + $0x210] sm:$0xff]   ;;  %v2055_v44 = vld [vmem:[%s2620_s1 + $0x2a8] sm:$0xff]  }
  0x1f   :  { %v23_v46 = vld [vmem:[%s2619_s0 + $0x8] sm:$0xff] }
  0x20   :  { %1773 = vmatpush3.bf16.msra.mxu0 %v1997_v31  ;;  %v2043_v31 = vld [vmem:[%s2620_s1 + $0x290] sm:$0xff]   ;;  %v345_v48 = vrot.slane %v23_v46, %v2268_v41 }
  0x21   :  { %1795 = vmatpush3.bf16.msra.mxu1 %v1998_v32  ;;  %1802 = vmatprep.subr.bf16.mxu0 %v2000_v35  ;;  %v2044_v32 = vld [vmem:[%s2620_s1 + $0x258] sm:$0xff]  }
  0x22   :  { %1824 = vmatprep.subr.bf16.mxu1 %v2001_v38  ;;  %v2047_v35 = vld [vmem:[%s2620_s1 + $0x298] sm:$0xff]   ;;  %v2050_v38 = vld [vmem:[%s2620_s1 + $0x220] sm:$0xff]  }
  0x23   :  { %1204 = vmatmul.mubr.bf16.vlgmr.msra.gmra.mrb[0].mxu0 %v312_v45  ;;  %v2056_v45 = vld [vmem:[%s2620_s1 + $0x270] sm:$0xff]  }
  0x24   :  { %1803 = vmatpush3.bf16.msra.mxu0 %v2002_v47  ;;  %1244 = vmatmul.mubr.bf16.vlgmr.msra.gmra.mrb[0].mxu1 %v334_v51  ;;  %v2057_v47 = vld [vmem:[%s2620_s1 + $0x2f0] sm:$0xff]  }
  0x25   :  { %1804 = vmatprep.subr.bf16.mxu0 %v2004_v52  ;;  %1825 = vmatpush3.bf16.msra.mxu1 %v2003_v49  ;;  %v338_v49 = vcombine.high %v23_v46, %v23_v46  ;;  %v2059_v51 = vld [vmem:[%s2620_s1 + $0x2b0] sm:$0xff]   ;;  %v353_v52 = vcombine.high %v345_v48, %v345_v48 }
  0x26   :  { %1283 = vmatprep.mubr.bf16.mxu0 %v333_v50  ;;  %1826 = vmatprep.subr.bf16.mxu1 %v2005_v54  ;;  %v2058_v50 = vld [vmem:[%s2620_s1 + $0x230] sm:$0xff]   ;;  %v2060_v54 = vld [vmem:[%s2620_s1 + $0x278] sm:$0xff]  }
  0x27   :  { %1323 = vmatprep.mubr.bf16.mxu1 %v337_v56  ;;  %v2460_v53 = vrot.slane %v338_v49, %v2268_v41  ;;  %v375_v56 = vrot.slane %v353_v52, %v2268_v41 }
  0x28   :  { %1805 = vmatpush3.bf16.msra.mxu0 %v2006_v55  ;;  %v2061_v55 = vld [vmem:[%s2620_s1 + $0x2f8] sm:$0xff]  }
  0x29   :  { %1806 = vmatprep.subr.bf16.mxu0 %v2008_v58  ;;  %1827 = vmatpush3.bf16.msra.mxu1 %v2007_v57  ;;  %v354_v57 = vcombine.high %v2460_v53, %v2460_v53  ;;  %v2062_v58 = vld [vmem:[%s2620_s1 + $0x238] sm:$0xff]  }
  0x2a   :  { %1828 = vmatprep.subr.bf16.mxu1 %v2009_v59  ;;  %v2063_v59 = vld [vmem:[%s2620_s1 + $0x2b8] sm:$0xff]  }
  0x2c   :  { %1807 = vmatpush3.bf16.msra.mxu0 %v2010_v60  ;;  %v385_v60 = vcombine.high %v375_v56, %v375_v56 }
  0x2d   :  { %1808 = vmatprep.subr.bf16.mxu0 %v2012_v62  ;;  %1829 = vmatpush3.bf16.msra.mxu1 %v2011_v61  ;;  %v361_v61 = vrot.slane %v345_v48, %v2268_v41  ;;  %v2064_v62 = vld [vmem:[%s2620_s1 + $0x340] sm:$0xff]  }
  0x2e   :  { %1830 = vmatprep.subr.bf16.mxu1 %v2013_v63  ;;  %v2065_v63 = vld [vmem:[%s2620_s1 + $0x3c0] sm:$0xff]  }
  0x30   :  { %1809 = vmatpush3.bf16.msra.mxu0 %v2014_v0  ;;  %v382_v0 = vrot.slane %v354_v57, %v2268_v41 }
  0x31   :  { %1810 = vmatprep.subr.bf16.mxu0 %v2016_v2  ;;  %1831 = vmatpush3.bf16.msra.mxu1 %v2015_v1  ;;  %v2066_v1 = vld [vmem:[%s2620_s1 + $0x300] sm:$0xff]  }
  0x32   :  { %1832 = vmatprep.subr.bf16.mxu1 %v2017_v3  ;;  %v2067_v2 = vld [vmem:[%s2620_s1 + $0x380] sm:$0xff]   ;;  %v383_v3 = vcombine.high %v361_v61, %v361_v61 }
  0x34   :  { %1811 = vmatpush3.bf16.msra.mxu0 %v2018_v4  ;;  %v2068_v4 = vld [vmem:[%s2620_s1 + $0x348] sm:$0xff]  }
  0x35   :  { %1812 = vmatprep.subr.bf16.mxu0 %v2020_v6  ;;  %1833 = vmatpush3.bf16.msra.mxu1 %v2019_v5  ;;  %v2069_v5 = vld [vmem:[%s2620_s1 + $0x3c8] sm:$0xff]   ;;  %v386_v6 = vcombine.high %v382_v0, %v382_v0 }
  0x36   :  { %1834 = vmatprep.subr.bf16.mxu1 %v2021_v7  ;;  %v2070_v7 = vld [vmem:[%s2620_s1 + $0x308] sm:$0xff]  }
  0x38   :  { %1813 = vmatpush3.bf16.msra.mxu0 %v2022_v8  ;;  %v2071_v8 = vld [vmem:[%s2620_s1 + $0x388] sm:$0xff]  }
  0x39   :  { %1814 = vmatprep.subr.bf16.mxu0 %v2024_v10  ;;  %1835 = vmatpush3.bf16.msra.mxu1 %v2023_v9  ;;  %v2072_v9 = vld [vmem:[%s2620_s1 + $0x350] sm:$0xff]  }
  0x3a   :  { %1836 = vmatprep.subr.bf16.mxu1 %v2025_v11  ;;  %v2073_v10 = vld [vmem:[%s2620_s1 + $0x3d0] sm:$0xff]  }
  0x3b   :  { %v2074_v11 = vld [vmem:[%s2620_s1 + $0x310] sm:$0xff]  }
  0x3c   :  { %1815 = vmatpush3.bf16.msra.mxu0 %v2026_v12  ;;  %v2075_v12 = vld [vmem:[%s2620_s1 + $0x390] sm:$0xff]  }
  0x3d   :  { %1816 = vmatprep.subr.bf16.mxu0 %v2028_v14  ;;  %1837 = vmatpush3.bf16.msra.mxu1 %v2027_v13  ;;  %v2076_v13 = vld [vmem:[%s2620_s1 + $0x358] sm:$0xff]  }
  0x3e   :  { %1838 = vmatprep.subr.bf16.mxu1 %v2029_v15  ;;  %v2077_v14 = vld [vmem:[%s2620_s1 + $0x3d8] sm:$0xff]  }
  0x3f   :  { %v2078_v15 = vld [vmem:[%s2620_s1 + $0x318] sm:$0xff]  }
  0x40   :  { %1817 = vmatpush3.bf16.msra.mxu0 %v2030_v16  ;;  %v2079_v16 = vld [vmem:[%s2620_s1 + $0x398] sm:$0xff]  }
  0x41   :  { %1846 = vmatprep.subr.bf16.mxu0 %v2032_v19  ;;  %1839 = vmatpush3.bf16.msra.mxu1 %v2031_v17  ;;  %v2080_v17 = vld [vmem:[%s2620_s1 + $0x360] sm:$0xff]  }
  0x42   :  { %1868 = vmatprep.subr.bf16.mxu1 %v2033_v20  ;;  %v2082_v19 = vld [vmem:[%s2620_s1 + $0x320] sm:$0xff]  }
  0x43   :  { %1284 = vmatmul.mubr.bf16.vlgmr.msra.gmra.mrb[4].mxu0 %v319_v18  ;;  %v2081_v18 = vld [vmem:[%s2620_s1 + $0x3e0] sm:$0xff]  }
  0x44   :  { %1847 = vmatpush3.bf16.msra.mxu0 %v2034_v21  ;;  %1324 = vmatmul.mubr.bf16.vlgmr.msra.gmra.mrb[4].mxu1 %v335_v23  ;;  %v2083_v20 = vld [vmem:[%s2620_s1 + $0x3a0] sm:$0xff]   ;;  %v2084_v21 = vld [vmem:[%s2620_s1 + $0x368] sm:$0xff]  }
  0x45   :  { %1848 = vmatprep.subr.bf16.mxu0 %v2036_v24  ;;  %1869 = vmatpush3.bf16.msra.mxu1 %v2035_v22  ;;  %v2085_v22 = vld [vmem:[%s2620_s1 + $0x3e8] sm:$0xff]  }
  0x46   :  { %1870 = vmatprep.subr.bf16.mxu1 %v2037_v25  ;;  %1363 = vmatprep.mubr.bf16.mxu0 %v375_v56  ;;  %v2086_v23 = vld [vmem:[%s2620_s1 + $0x328] sm:$0xff]   ;;  %v2088_v25 = vld [vmem:[%s2620_s1 + $0x370] sm:$0xff]  }
  0x47   :  { %1403 = vmatprep.mubr.bf16.mxu1 %v385_v60  ;;  %v2087_v24 = vld [vmem:[%s2620_s1 + $0x3a8] sm:$0xff]  }
  0x48   :  { %1849 = vmatpush3.bf16.msra.mxu0 %v2038_v26  ;;  %v2089_v26 = vld [vmem:[%s2620_s1 + $0x3f0] sm:$0xff]  }
  0x49   :  { %1850 = vmatprep.subr.bf16.mxu0 %v2040_v28  ;;  %1871 = vmatpush3.bf16.msra.mxu1 %v2039_v27  ;;  %v2090_v27 = vld [vmem:[%s2620_s1 + $0x330] sm:$0xff]  }
  0x4a   :  { %1872 = vmatprep.subr.bf16.mxu1 %v2041_v29  ;;  %v2091_v28 = vld [vmem:[%s2620_s1 + $0x3b0] sm:$0xff]   ;;  %v2092_v29 = vld [vmem:[%s2620_s1 + $0x378] sm:$0xff]  }
  0x4c   :  { %1851 = vmatpush3.bf16.msra.mxu0 %v2042_v30  ;;  %v2093_v30 = vld [vmem:[%s2620_s1 + $0x3f8] sm:$0xff]  }
  0x4d   :  { %1852 = vmatprep.subr.bf16.mxu0 %v2044_v32  ;;  %1873 = vmatpush3.bf16.msra.mxu1 %v2043_v31 }
  0x4e   :  { %1874 = vmatprep.subr.bf16.mxu1 %v2045_v33 }
  0x50   :  { %1853 = vmatpush3.bf16.msra.mxu0 %v2046_v34 }
  0x51   :  { %1854 = vmatprep.subr.bf16.mxu0 %v2048_v36  ;;  %1875 = vmatpush3.bf16.msra.mxu1 %v2047_v35 }
  0x52   :  { %1876 = vmatprep.subr.bf16.mxu1 %v2049_v37 }
  0x54   :  { %1855 = vmatpush3.bf16.msra.mxu0 %v2050_v38 }
  0x55   :  { %1856 = vmatprep.subr.bf16.mxu0 %v2052_v40  ;;  %1877 = vmatpush3.bf16.msra.mxu1 %v2051_v39 }
  0x56   :  { %1878 = vmatprep.subr.bf16.mxu1 %v2053_v42 }
  0x58   :  { %1857 = vmatpush3.bf16.msra.mxu0 %v2054_v43 }
  0x59   :  { %1858 = vmatprep.subr.bf16.mxu0 %v2056_v45  ;;  %1879 = vmatpush3.bf16.msra.mxu1 %v2055_v44 }
  0x5a   :  { %1880 = vmatprep.subr.bf16.mxu1 %v2057_v47 }
  0x5c   :  { %1859 = vmatpush3.bf16.msra.mxu0 %v2058_v50 }
  0x5d   :  { %1860 = vmatprep.subr.bf16.mxu0 %v2060_v54  ;;  %1881 = vmatpush3.bf16.msra.mxu1 %v2059_v51 }
  0x5e   :  { %1882 = vmatprep.subr.bf16.mxu1 %v2061_v55 }
  0x60   :  { %1861 = vmatpush3.bf16.msra.mxu0 %v2062_v58 }
  0x61   :  { %1890 = vmatprep.subr.bf16.mxu0 %v2064_v62  ;;  %1883 = vmatpush3.bf16.msra.mxu1 %v2063_v59 }
  0x62   :  { %1912 = vmatprep.subr.bf16.mxu1 %v2065_v63 }
  0x63   :  { %1364 = vmatmul.mubr.bf16.vlgmr.msra.gmra.mrb[8].mxu0 %v361_v61 }
  0x64   :  { %1891 = vmatpush3.bf16.msra.mxu0 %v2066_v1  ;;  %1443 = vmatprep.mubr.bf16.mxu0 %v382_v0 }
  0x65   :  { %1404 = vmatmul.mubr.bf16.vlgmr.msra.gmra.mrb[8].mxu1 %v383_v3  ;;  %1892 = vmatprep.subr.bf16.mxu0 %v2068_v4 }
  0x66   :  { %1913 = vmatpush3.bf16.msra.mxu1 %v2067_v2  ;;  %1483 = vmatprep.mubr.bf16.mxu1 %v386_v6 }
  0x67   :  { %1914 = vmatprep.subr.bf16.mxu1 %v2069_v5 }
  0x68   :  { %1893 = vmatpush3.bf16.msra.mxu0 %v2070_v7 }
  0x69   :  { %1894 = vmatprep.subr.bf16.mxu0 %v2072_v9 }
  0x6a   :  { %1915 = vmatpush3.bf16.msra.mxu1 %v2071_v8 }
  0x6b   :  { %1916 = vmatprep.subr.bf16.mxu1 %v2073_v10 }
  0x6c   :  { %1895 = vmatpush3.bf16.msra.mxu0 %v2074_v11 }
  0x6d   :  { %1896 = vmatprep.subr.bf16.mxu0 %v2076_v13 }
  0x6e   :  { %1917 = vmatpush3.bf16.msra.mxu1 %v2075_v12 }
  0x6f   :  { %1918 = vmatprep.subr.bf16.mxu1 %v2077_v14 }
  0x70   :  { %1897 = vmatpush3.bf16.msra.mxu0 %v2078_v15 }
  0x71   :  { %1898 = vmatprep.subr.bf16.mxu0 %v2080_v17 }
  0x72   :  { %1919 = vmatpush3.bf16.msra.mxu1 %v2079_v16 }
  0x73   :  { %1920 = vmatprep.subr.bf16.mxu1 %v2081_v18 }
  0x74   :  { %1899 = vmatpush3.bf16.msra.mxu0 %v2082_v19 }
  0x75   :  { %1900 = vmatprep.subr.bf16.mxu0 %v2084_v21 }
  0x76   :  { %1921 = vmatpush3.bf16.msra.mxu1 %v2083_v20 }
  0x77   :  { %1922 = vmatprep.subr.bf16.mxu1 %v2085_v22 }
  0x78   :  { %1901 = vmatpush3.bf16.msra.mxu0 %v2086_v23 }
  0x79   :  { %1902 = vmatprep.subr.bf16.mxu0 %v2088_v25 }
  0x7a   :  { %1923 = vmatpush3.bf16.msra.mxu1 %v2087_v24 }
  0x7b   :  { %1924 = vmatprep.subr.bf16.mxu1 %v2089_v26 }
  0x7c   :  { %10 = vsyncpa [#allocation3], 0  ;;  %1903 = vmatpush3.bf16.msra.mxu0 %v2090_v27  ;;  %v2094_v31 = vld [vmem:[%s2620_s1 + $0x338] sm:$0xff]   ;;  %v368_v32 = vrot.slane %v2460_v53, %v2268_v41  ;;  %v2097_v35 = vld [vmem:[%s2622_s3] sm:$0xff]   ;;  %v2130_v36 = vmov 0.0   ;;  %vm2131_vm0 = vmmov 0  }
  0x7d   :  { %1904 = vmatprep.subr.bf16.mxu0 %v2092_v29  ;;  %v2095_v33 = vld [vmem:[%s2620_s1 + $0x3b8] sm:$0xff]   ;;  %v2098_v41 = vld [vmem:[%s2622_s3 + $0x8] sm:$0xff]   ;;  %v2099_v37 = vld [vmem:[%s2622_s3 + $0x10] sm:$0xff]   ;;  %s2132_s16 = smov [#allocation2]   ;;  %vm1604_vm1 = vcmask 74752  }
  0x7e   :  { %1925 = vmatpush3.bf16.msra.mxu1 %v2091_v28  ;;  %v384_v34 = vcombine.high %v368_v32, %v368_v32  ;;  %v2100_v38 = vld [vmem:[%s2622_s3 + $0x18] sm:$0xff]   ;;  %v2101_v39 = vld [vmem:[%s2622_s3 + $0x20] sm:$0xff]   ;;  %v2102_v40 = vld [vmem:[%s2622_s3 + $0x28] sm:$0xff]   ;;  %s1612_s17 = sshll.u32 %s2132_s16, 4  ;;  %s1613_s17 = int_to_ptr.vmem [resolvable:$true] %s1612_s17 }
  0x7f   :  { %1926 = vmatprep.subr.bf16.mxu1 %v2093_v30  ;;  %v2103_v42 = vld [vmem:[%s2622_s3 + $0x30] sm:$0xff]   ;;  %v2104_v43 = vld [vmem:[%s2622_s3 + $0x38] sm:$0xff]   ;;  %v1620_v45 = vld [vmem:[%s2621_s2] ss:$0 sm:$0xff]  ;;  %s2105_s18 = scalar_lea.vmem %s1613_s17, 32  ;;  %p2110_p1 = scmp.lt.s32.totalorder %s1613_s17, %s1613_s17 }
  0x80   :  { %1905 = vmatpush3.bf16.msra.mxu0 %v2094_v31  ;;  %v1749_v31 = vld [vmem:[%s2623_s4] ss:$0 sm:$0xff]  ;;  %p2106_p0 = scmp.ne.s32.totalorder %s1613_s17, %s2105_s18  ;;  %p2111_p2 = scmp.lt.s32.totalorder %s2105_s18, %s2105_s18 }
  0x81   :  { %1943 = vmatprep.subr.bf16.mxu0 %v2130_v36 }
  0x82   :  { %1927 = vmatpush3.bf16.msra.mxu1 %v2095_v33  ;;  %p2112_p3 = por %p2111_p2, %p2110_p1 }
  0x83   :  { %1444 = vmatmul.mubr.bf16.vlgmr.msra.gmra.mrb[12].mxu0 %v368_v32 }
  0x84   :  { %1944 = vmatpush3.bf16.msra.mxu0 %v2097_v35  ;;  %1959 = vmatprep.mubr.msk.bf16.mxu0 %vm2131_vm0, %v2130_v36  ;;  %p2113_p4 = pnand %p2112_p3, %p2106_p0 }
  0x85   :  { %1484 = vmatmul.mubr.bf16.vlgmr.msra.gmra.mrb[12].mxu1 %v384_v34  ;;  %1945 = vmatprep.subr.bf16.mxu0 %v2130_v36 }
  0x88   :  { %1946 = vmatpush3.bf16.msra.mxu0 %v2098_v41 }
  0x89   :  { %1947 = vmatprep.subr.bf16.mxu0 %v2130_v36 }
  0x8c   :  { %1948 = vmatpush3.bf16.msra.mxu0 %v2099_v37 }
  0x8d   :  { %1949 = vmatprep.subr.bf16.mxu0 %v2130_v36 }
  0x90   :  { %1950 = vmatpush3.bf16.msra.mxu0 %v2100_v38 }
  0x91   :  { %1951 = vmatprep.subr.bf16.mxu0 %v2130_v36 }
  0x94   :  { %1952 = vmatpush3.bf16.msra.mxu0 %v2101_v39 }
  0x95   :  { %1953 = vmatprep.subr.bf16.mxu0 %v2130_v36 }
  0x98   :  { %1954 = vmatpush3.bf16.msra.mxu0 %v2102_v40 }
  0x99   :  { %1955 = vmatprep.subr.bf16.mxu0 %v2130_v36 }
  0x9c   :  { %1956 = vmatpush3.bf16.msra.mxu0 %v2103_v42 }
  0x9d   :  { %1957 = vmatprep.subr.bf16.mxu0 %v2130_v36 }
  0xa0   :  { %1958 = vmatpush3.bf16.msra.mxu0 %v2104_v43 }
  0xf6   :  { %v1774_v44 = vpop.f32.mrb[0].mxu0 }
  0xf7   :  { %v1775_v46 = vpop.f32.mrb[1].mxu0  ;;  %v1796_v47 = vpop.f32.mrb[0].mxu1 }
  0xf8   :  { %v1776_v48 = vadd.f32 %v1775_v46, %v1774_v44  ;;  %v1777_v49 = vpop.f32.mrb[2].mxu0  ;;  %v1797_v50 = vpop.f32.mrb[1].mxu1 }
  0xf9   :  { %v1778_v51 = vpop.f32.mrb[3].mxu0  ;;  %v1798_v53 = vadd.f32 %v1797_v50, %v1796_v47  ;;  %v1799_v54 = vpop.f32.mrb[2].mxu1 }
  0xfa   :  { %v1206_v52 = vadd.f32 %v1776_v48, %v1620_v45  ;;  %v1800_v55 = vpop.f32.mrb[3].mxu1 }
  0xfc   :  { %v1246_v56 = vadd.f32 %v1798_v53, %v1206_v52 }
 0x116   :  { %v1818_v57 = vpop.f32.mrb[4].mxu0 }
 0x117   :  { %v1819_v58 = vpop.f32.mrb[5].mxu0  ;;  %v1840_v59 = vpop.f32.mrb[4].mxu1 }
 0x118   :  { %v1820_v60 = vadd.f32 %v1819_v58, %v1818_v57  ;;  %v1821_v61 = vpop.f32.mrb[6].mxu0  ;;  %v1841_v62 = vpop.f32.mrb[5].mxu1 }
 0x119   :  { %v1822_v63 = vpop.f32.mrb[7].mxu0  ;;  %v1842_v1 = vadd.f32 %v1841_v62, %v1840_v59  ;;  %v1843_v2 = vpop.f32.mrb[6].mxu1 }
 0x11a   :  { %v1286_v0 = vadd.f32 %v1820_v60, %v1246_v56  ;;  %v1844_v3 = vpop.f32.mrb[7].mxu1 }
 0x11c   :  { %v1326_v4 = vadd.f32 %v1842_v1, %v1286_v0 }
 0x136   :  { %v1862_v5 = vpop.f32.mrb[8].mxu0 }
 0x137   :  { %v1863_v6 = vpop.f32.mrb[9].mxu0 }
 0x138   :  { %v1884_v7 = vpop.f32.mrb[8].mxu1  ;;  %v1864_v8 = vadd.f32 %v1863_v6, %v1862_v5  ;;  %v1865_v9 = vpop.f32.mrb[10].mxu0 }
 0x139   :  { %v1885_v10 = vpop.f32.mrb[9].mxu1  ;;  %v1866_v11 = vpop.f32.mrb[11].mxu0 }
 0x13a   :  { %v1366_v12 = vadd.f32 %v1864_v8, %v1326_v4  ;;  %v1886_v13 = vadd.f32 %v1885_v10, %v1884_v7  ;;  %v1887_v14 = vpop.f32.mrb[10].mxu1 }
 0x13b   :  { %v1888_v15 = vpop.f32.mrb[11].mxu1 }
 0x13c   :  { %v1406_v16 = vadd.f32 %v1886_v13, %v1366_v12 }
 0x156   :  { %v1906_v17 = vpop.f32.mrb[12].mxu0 }
 0x157   :  { %v1907_v18 = vpop.f32.mrb[13].mxu0 }
 0x158   :  { %v1928_v19 = vpop.f32.mrb[12].mxu1  ;;  %v1908_v20 = vadd.f32 %v1907_v18, %v1906_v17  ;;  %v1909_v21 = vpop.f32.mrb[14].mxu0 }
 0x159   :  { %v1929_v22 = vpop.f32.mrb[13].mxu1  ;;  %v1910_v23 = vpop.f32.mrb[15].mxu0 }
 0x15a   :  { %v1446_v24 = vadd.f32 %v1908_v20, %v1406_v16  ;;  %v1930_v25 = vadd.f32 %v1929_v22, %v1928_v19  ;;  %v1931_v26 = vpop.f32.mrb[14].mxu1 }
 0x15b   :  { %v1932_v27 = vpop.f32.mrb[15].mxu1 }
 0x15c   :  { %v1486_v28 = vadd.f32 %v1930_v25, %v1446_v24 }
 0x15e   :  { %v1491_v29 = vmax.f32 %v1486_v28, 0.0 }
 0x160   :  { %v1492_v30 = vpack.c.bf16 %v1491_v29, %v1491_v29 }
 0x162   :  { %1960 = vmatmul.mubr.bf16.vlgmr.msra.gmra.mrb[16].mxu0 %v1492_v30 }
 0x235   :  { %v1598_v32 = vpop.f32.mrb[16].mxu0 }
 0x236   :  { %v1599_v33 = vadd.f32 %v1749_v31, %v1598_v32  ;;  %v1961_v34 = vpop.f32.mrb[17].mxu0 }
 0x237   :  { %v1601_v35 = vpop.f32.mrb[18].mxu0 }
 0x238   :  { %v1962_v36 = vpop.f32.mrb[19].mxu0  ;;  %1605 = vst.msk [vmem:[#allocation2] sm:$0x3] %vm1604_vm1, %v1599_v33 }
 0x239   :  { %2116 = shalt.err (!%p2113_p4)
}
 0x23a   :  { %s2117_s4 = scalar_lea.hbm %s2624_s5, 32 }
 0x23b   :  { %p2118_p5 = scmp.ne.s32.totalorder %s2624_s5, %s2117_s4  ;;  %p2121_p6 = scmp.lt.u32.totalorder %s2117_s4, %s2624_s5 }
 0x23d   :  { %p2123_p7 = pnand %p2121_p6, %p2118_p5 }
 0x23f   :  { %2126 = shalt.err (!%p2123_p7)
}
 0x240   :  { %1615 = dma.vmem_to_hbm [thread:$0]  %s1613_s17, 32, %s2624_s5, [#allocation3]  }
 0x241   :  { %2127 = dma.done.wait [#allocation3], 32  }
 0x242   :  { %2128 = vsyncadd [#allocation3], 4294967264 }
 0x243   :  { %1619 = vsyncpa [#allocation3], 1 }

</bundles_post_ra>
